<compile_context>
chip_gen: v6e
topology: v6e:2x2x1
jax: 0.10.0
libtpu: 0.0.40
codegen_flags: <defaults>
</compile_context>

<pallas_src>
import functools

import jax
import jax.numpy as jnp
from jax import lax
from jax.experimental import pallas as pl
from jax.experimental.pallas import tpu as pltpu

H = 32          # rnn_hidden
N_CLASSES = 2
G = 8 * H       # stacked (fwd+bwd) gate width = 256


# --------------------------------------------------------------------------- #
# Kernel
# --------------------------------------------------------------------------- #
def _base_lstm_kernel(
    x_ref,                                             # (L, TB, 2): [x | x reversed]
    wf0_ref, wb0_ref, b0_ref, whh0_ref,                # layer 0 (stacked)
    w1_ref, b1_ref, whh1_ref,                          # layer 1 (stacked, merged)
    wc1_ref, bc1_ref, wc2_ref, bc2_ref, wc3_ref, bc3_ref,   # classifier
    out_ref,                                           # (TB, 2)
    a_ref,                                             # scratch (L, TB, 8H), reused
    raw_ref,                                           # scratch (L, TB, 4H) [rawA|rawB]
    *, act_bf16,
):
    L, TB, _ = x_ref.shape
    H2, H4, H6 = 2 * H, 4 * H, 6 * H
    f32 = jnp.float32
    bf16 = jnp.bfloat16

    if L <= 16:
        unroll = True
    else:
        unroll = 8 if TB <= 64 else 4

    # ---- hoisted layer-0 input projection (both directions, bias folded in) ----
    # a0[i] = [x[i]*Wih0_fwd | x[L-1-i]*Wih0_bwd] + (b_ih+b_hh), interleaved gates.
    a_ref[...] = (x_ref[:, :, 0:1] * wf0_ref[...]
                  + x_ref[:, :, 1:2] * wb0_ref[...]
                  + b0_ref[...])

    h_dtype = bf16 if act_bf16 else f32
    zeros_h = jnp.zeros((TB, H2), h_dtype)
    zeros_c = jnp.zeros((TB, H2), f32)

    def cell(a, h, c, whh):
        # a: precomputed input contribution (TB, 8H).  Column layout
        # [i_f,i_b, f_f,f_b, o_f,o_b, g_f,g_b]: one 192-lane sigmoid + one
        # 64-lane tanh cover both directions; h/c are stacked [fwd | bwd].
        hb = h if h.dtype == bf16 else h.astype(bf16)
        gates = a + jnp.dot(hb, whh, preferred_element_type=f32)   # (TB, 8H) f32
        if act_bf16:
            gb = gates.astype(bf16)                # bf16 EUP path (v6e / v7x)
            s = jax.nn.sigmoid(gb[:, :H6])
            g = jnp.tanh(gb[:, H6:])
            c_new = s[:, H2:H4] * c + (s[:, :H2] * g).astype(f32)   # f32 accumulate
            h_new = s[:, H4:H6] * jnp.tanh(c_new.astype(bf16))      # bf16
        else:                                      # f32 EUP path (v5e and older)
            s = jax.nn.sigmoid(gates[:, :H6])
            g = jnp.tanh(gates[:, H6:])
            c_new = s[:, H2:H4] * c + s[:, :H2] * g
            h_new = s[:, H4:H6] * jnp.tanh(c_new)                    # f32
        return h_new, c_new

    # ---- layer 0: fused fwd/bwd recurrence ----
    whh0 = whh0_ref[...]                            # (2H, 8H) bf16, vreg-resident

    def body0(i, carry):
        h, c = cell(a_ref[i], carry[0], carry[1], whh0)
        h32 = h.astype(f32)
        raw_ref[i, :, :H2] = h32            # rawA[i]      = [h_f(i)   | h_b(L-1-i)]
        raw_ref[L - 1 - i, :, H2:] = h32    # rawB[L-1-i]  = same value, other half
        return (h, c)

    lax.fori_loop(0, L, body0, (zeros_h, zeros_c), unroll=unroll)

    # ---- hoisted layer-1 input projection: ONE K=128 bf16 MXU matmul ----
    # a1[i] = [rawA[i] | rawB[i]] @ [[w1a],[w1b]] + bias
    #       = [out0(i)@Wih1_fwd | out0(L-1-i)@Wih1_bwd]  (interleaved columns).
    raw = raw_ref[...].reshape(L * TB, H4).astype(bf16)
    a_ref[...] = (jnp.dot(raw, w1_ref[...], preferred_element_type=f32)
                  .reshape(L, TB, G) + b1_ref[...])

    # ---- layer 1: fused fwd/bwd recurrence (only h @ W_hh left per step) ----
    whh1 = whh1_ref[...]                    # loaded only now: no live range over body0

    def body1(i, carry):
        return cell(a_ref[i], carry[0], carry[1], whh1)

    h1, _ = lax.fori_loop(0, L, body1, (zeros_h, zeros_c), unroll=unroll)

    # h1 == cat([hn[-2], hn[-1]], -1)  (layer-1 fwd final | layer-1 bwd final)
    h1 = h1.astype(f32)
    z = jnp.maximum(
        jnp.dot(h1, wc1_ref[...], preferred_element_type=f32) + bc1_ref[...], 0.0)
    z = jnp.maximum(
        jnp.dot(z, wc2_ref[...], preferred_element_type=f32) + bc2_ref[...], 0.0)
    z = jnp.dot(z, wc3_ref[...], preferred_element_type=f32) + bc3_ref[...]
    out_ref[...] = jax.nn.sigmoid(z)


# --------------------------------------------------------------------------- #
# Weight packing: PyTorch-style per-direction params -> stacked kernel params
# --------------------------------------------------------------------------- #
def _interleave(wf, wb):
    """wf, wb: (rows, 4H) in PyTorch gate order [i,f,g,o].
    Returns (rows, 8H) with columns [i_f,i_b,f_f,f_b,o_f,o_b,g_f,g_b]."""
    i_f, f_f, g_f, o_f = jnp.split(wf, 4, axis=1)
    i_b, f_b, g_b, o_b = jnp.split(wb, 4, axis=1)
    return jnp.concatenate([i_f, i_b, f_f, f_b, o_f, o_b, g_f, g_b], axis=1)


def pack_params(p):
    z1 = jnp.zeros((1, 4 * H), jnp.float32)
    zH = jnp.zeros((H, 4 * H), jnp.float32)
    k = {}
    # layer 0: input weights live on disjoint (fwd / bwd) column blocks
    k["wf0"] = _interleave(p["wih0f"], z1).reshape(1, 1, G)
    k["wb0"] = _interleave(z1, p["wih0b"]).reshape(1, 1, G)
    k["b0"] = _interleave(p["b0f"], p["b0b"]).reshape(1, 1, G)
    k["whh0"] = jnp.concatenate(
        [_interleave(p["whh0f"], zH), _interleave(zH, p["whh0b"])],
        axis=0).astype(jnp.bfloat16)
    # layer 1: rawA[i] = [h_f(i)|h_b(L-1-i)], rawB[i] = [h_f(L-1-i)|h_b(i)]
    #   a1[i] = [rawA[i]|rawB[i]] @ [[w1a],[w1b]] reproduces
    #   [out0(i)@Wih1_f | out0(L-1-i)@Wih1_b]  (interleaved columns).
    w1a = jnp.concatenate(
        [_interleave(p["wih1f"][:H], zH), _interleave(zH, p["wih1b"][H:])], axis=0)
    w1b = jnp.concatenate(
        [_interleave(zH, p["wih1b"][:H]), _interleave(p["wih1f"][H:], zH)], axis=0)
    k["w1"] = jnp.concatenate([w1a, w1b], axis=0).astype(jnp.bfloat16)   # (4H, 8H)
    k["b1"] = _interleave(p["b1f"], p["b1b"]).reshape(1, 1, G)
    k["whh1"] = jnp.concatenate(
        [_interleave(p["whh1f"], zH), _interleave(zH, p["whh1b"])],
        axis=0).astype(jnp.bfloat16)
    # classifier (already stored transposed as (in, out))
    for n in ("wc1", "bc1", "wc2", "bc2", "wc3", "bc3"):
        k[n] = p[n]
    return k


# --------------------------------------------------------------------------- #
# Wrapper
# --------------------------------------------------------------------------- #
def _device_config():
    """bf16 activations only on v6e/v7x (bf16 EUP); VMEM limit per generation."""
    try:
        kind = jax.devices()[0].device_kind.lower()
    except Exception:
        kind = ""
    act_bf16 = not any(v in kind for v in ("v2", "v3", "v4", "v5"))
    big_vmem = any(v in kind for v in ("v5", "v6"))       # 128 MiB VMEM parts
    vmem_limit = (96 if big_vmem else 48) * 1024 * 1024   # v7x/unknown: 48 MiB
    return act_bf16, vmem_limit


def _cdiv(a, b):
    return -(-a // b)


def _pick_batch_tile(B, L, vmem_limit):
    """Per (batch row x timestep) VMEM bytes (f32 unless noted):
         a scratch 8H + raw scratch 4H + x block lane-padded to 128 lanes x2 bufs
         + layer-1 projection intermediates (~8H f32 + 4H bf16)  ~= 4096 B.
       Pick the largest tile within budget, capped at 128 rows (64-vreg file),
       force >=2 grid programs when the padded batch >= 16, and minimize
       over-padding of the final batch."""
    Bp8 = _cdiv(B, 8) * 8
    per_b = L * 4096
    budget = max(vmem_limit - 8 * 1024 * 1024, 2 * 1024 * 1024)
    tb = (budget // max(per_b, 1)) // 8 * 8
    tb = int(max(8, min(128, tb)))
    if Bp8 >= 16:                                   # both TensorCores get work
        tb = min(tb, max(8, (Bp8 // 2) // 8 * 8))
    n = _cdiv(Bp8, tb)
    tb = _cdiv(_cdiv(Bp8, n), 8) * 8                # minimal padding for n tiles
    Bp = n * tb
    return tb, Bp, n


def base_lstm_forward(x_blc, params):
    """x_blc: (B, L, 1) float32, batch-first (PyTorch convention)."""
    B, L, _ = x_blc.shape
    kp = pack_params(params)
    act_bf16, vmem_limit = _device_config()
    tb, Bp, n_tiles = _pick_batch_tile(B, L, vmem_limit)

    x_lb = jnp.transpose(x_blc, (1, 0, 2)).astype(jnp.float32)     # (L, B, 1)
    x2 = jnp.concatenate([x_lb, x_lb[::-1]], axis=-1)              # (L, B, 2)
    if Bp != B:
        x2 = jnp.pad(x2, ((0, 0), (0, Bp - B), (0, 0)))
    grid = (n_tiles,)

    def fixed(shape):
        nd = len(shape)
        return pl.BlockSpec(shape, lambda b, _nd=nd: (0,) * _nd)

    in_specs = [
        pl.BlockSpec((L, tb, 2), lambda b: (0, b, 0)),   # [x | x reversed]
        fixed((1, 1, G)), fixed((1, 1, G)), fixed((1, 1, G)), fixed((2 * H, G)),
        fixed((4 * H, G)), fixed((1, 1, G)), fixed((2 * H, G)),
        fixed((2 * H, 80)), fixed((1, 80)),
        fixed((80, 100)), fixed((1, 100)),
        fixed((100, N_CLASSES)), fixed((1, N_CLASSES)),
    ]

    kernel = functools.partial(_base_lstm_kernel, act_bf16=act_bf16)

    out = pl.pallas_call(
        kernel,
        out_shape=jax.ShapeDtypeStruct((Bp, N_CLASSES), jnp.float32),
        grid=grid,
        in_specs=in_specs,
        out_specs=pl.BlockSpec((tb, N_CLASSES), lambda b: (b, 0)),
        scratch_shapes=[
            pltpu.VMEM((L, tb, G), jnp.float32),         # a0 / a1 (reused)
            pltpu.VMEM((L, tb, 4 * H), jnp.float32),     # [rawA | rawB]
        ],
        compiler_params=pltpu.CompilerParams(
            dimension_semantics=("parallel",),
            vmem_limit_bytes=vmem_limit,
        ),
    )(x2,
      kp["wf0"], kp["wb0"], kp["b0"], kp["whh0"],
      kp["w1"], kp["b1"], kp["whh1"],
      kp["wc1"], kp["bc1"], kp["wc2"], kp["bc2"], kp["wc3"], kp["bc3"])
    return out[:B]


# --------------------------------------------------------------------------- #
# Params & pure-JAX reference
# --------------------------------------------------------------------------- #
def init_params(key):
    """Deterministic init mimicking PyTorch's U(-1/sqrt(fan), 1/sqrt(fan))."""
    ks = list(jax.random.split(key, 24))
    nxt = iter(ks).__next__

    def u(shape, fan):
        bound = 1.0 / jnp.sqrt(jnp.asarray(fan, jnp.float32))
        return jax.random.uniform(nxt(), shape, jnp.float32, -bound, bound)

    p = {}
    for d in ("f", "b"):                                   # LSTM layer 0
        p[f"wih0{d}"] = u((1, 4 * H), H)
        p[f"whh0{d}"] = u((H, 4 * H), H)
        p[f"b0{d}"] = u((1, 4 * H), H) + u((1, 4 * H), H)  # b_ih + b_hh
    for d in ("f", "b"):                                   # LSTM layer 1
        p[f"wih1{d}"] = u((2 * H, 4 * H), H)
        p[f"whh1{d}"] = u((H, 4 * H), H)
        p[f"b1{d}"] = u((1, 4 * H), H) + u((1, 4 * H), H)
    p["wc1"], p["bc1"] = u((2 * H, 80), 2 * H), u((1, 80), 2 * H)
    p["wc2"], p["bc2"] = u((80, 100), 80), u((1, 100), 80)
    p["wc3"], p["bc3"] = u((100, N_CLASSES), 100), u((1, N_CLASSES), 100)
    return p


def reference_forward(x_blc, params):
    """Pure-JAX reference for the same forward pass."""
    B, L, _ = x_blc.shape
    x_lbc = jnp.transpose(x_blc, (1, 0, 2)).astype(jnp.float32)

    def cell(x_t, h, c, w_ih, w_hh, b):
        gates = x_t @ w_ih + h @ w_hh + b
        i = jax.nn.sigmoid(gates[:, :H])
        f = jax.nn.sigmoid(gates[:, H:2 * H])
        g = jnp.tanh(gates[:, 2 * H:3 * H])
        o = jax.nn.sigmoid(gates[:, 3 * H:])
        c = f * c + i * g
        return o * jnp.tanh(c), c

    def run_dir(xs, w_ih, w_hh, b, reverse):
        def step(carry, x_t):
            h, c = carry
            h, c = cell(x_t, h, c, w_ih, w_hh, b)
            return (h, c), h
        (hT, _), hs = lax.scan(step, (jnp.zeros((B, H)), jnp.zeros((B, H))),
                               xs, reverse=reverse)
        return hs, hT

    hsf, _ = run_dir(x_lbc, params["wih0f"], params["whh0f"], params["b0f"], False)
    hsb, _ = run_dir(x_lbc, params["wih0b"], params["whh0b"], params["b0b"], True)
    x1 = jnp.concatenate([hsf, hsb], axis=-1)
    _, h1f = run_dir(x1, params["wih1f"], params["whh1f"], params["b1f"], False)
    _, h1b = run_dir(x1, params["wih1b"], params["whh1b"], params["b1b"], True)
    hidden = jnp.concatenate([h1f, h1b], axis=-1)
    z = jnp.maximum(hidden @ params["wc1"] + params["bc1"], 0.0)
    z = jnp.maximum(z @ params["wc2"] + params["bc2"], 0.0)
    z = z @ params["wc3"] + params["bc3"]
    return jax.nn.sigmoid(z)


if __name__ == "__main__":
    key = jax.random.PRNGKey(0)
    k_param, k_x1, k_x2 = jax.random.split(key, 3)
    params = init_params(k_param)

    # Case 1: tiny fully-unrolled single-tile path.
    B1, L1 = 2, 8
    x1 = jax.random.normal(k_x1, (B1, L1, 1), jnp.float32)
    out1 = jax.block_until_ready(base_lstm_forward(x1, params))
    ref1 = jax.block_until_ready(reference_forward(x1, params))
    assert out1.shape == (B1, N_CLASSES), out1.shape
    assert bool(jnp.all(jnp.isfinite(out1)))
    assert jnp.allclose(out1, ref1, atol=2e-2, rtol=2e-2), (out1, ref1)

    # Case 2: exercises partial unroll (L>16), multi-tile grid (tb < Bp) and
    # non-multiple-of-8 batch padding.
    B2, L2 = 19, 20
    x2 = jax.random.normal(k_x2, (B2, L2, 1), jnp.float32)
    out2 = jax.block_until_ready(base_lstm_forward(x2, params))
    ref2 = jax.block_until_ready(reference_forward(x2, params))
    assert out2.shape == (B2, N_CLASSES), out2.shape
    assert bool(jnp.all(jnp.isfinite(out2)))
    assert jnp.allclose(out2, ref2, atol=2e-2, rtol=2e-2), (out2, ref2)

    print("KERNEL_OK")
</pallas_src>

<mosaic_0001>
module attributes {stable_mosaic.version = 11 : i64} {
  func.func @_base_lstm_kernel(%arg0: i32, %arg1: memref<8x8x2xf32, #tpu.memory_space<vmem>>, %arg2: memref<1x1x256xf32, #tpu.memory_space<vmem>>, %arg3: memref<1x1x256xf32, #tpu.memory_space<vmem>>, %arg4: memref<1x1x256xf32, #tpu.memory_space<vmem>>, %arg5: memref<64x256xbf16, #tpu.memory_space<vmem>>, %arg6: memref<128x256xbf16, #tpu.memory_space<vmem>>, %arg7: memref<1x1x256xf32, #tpu.memory_space<vmem>>, %arg8: memref<64x256xbf16, #tpu.memory_space<vmem>>, %arg9: memref<64x80xf32, #tpu.memory_space<vmem>>, %arg10: memref<1x80xf32, #tpu.memory_space<vmem>>, %arg11: memref<80x100xf32, #tpu.memory_space<vmem>>, %arg12: memref<1x100xf32, #tpu.memory_space<vmem>>, %arg13: memref<100x2xf32, #tpu.memory_space<vmem>>, %arg14: memref<1x2xf32, #tpu.memory_space<vmem>>, %arg15: memref<8x2xf32, #tpu.memory_space<vmem>>, %arg16: memref<8x8x256xf32, #tpu.memory_space<vmem>>, %arg17: memref<8x8x128xf32, #tpu.memory_space<vmem>>) attributes {dimension_semantics = [#tpu.dimension_semantics<parallel>], iteration_bounds = array<i64: 1>, scalar_prefetch = 0 : i64, scratch_operands = 2 : i64, tpu.core_type = #tpu.core_type<tc>, window_params = [{transform_indices = @transform_0, window_bounds = array<i64: 8, 8, 2>}, {pipeline_mode = #tpu.pipeline_mode<synchronous>, transform_indices = @transform_1, window_bounds = array<i64: 1, 1, 256>}, {pipeline_mode = #tpu.pipeline_mode<synchronous>, transform_indices = @transform_2, window_bounds = array<i64: 1, 1, 256>}, {pipeline_mode = #tpu.pipeline_mode<synchronous>, transform_indices = @transform_3, window_bounds = array<i64: 1, 1, 256>}, {pipeline_mode = #tpu.pipeline_mode<synchronous>, transform_indices = @transform_4, window_bounds = array<i64: 64, 256>}, {pipeline_mode = #tpu.pipeline_mode<synchronous>, transform_indices = @transform_5, window_bounds = array<i64: 128, 256>}, {pipeline_mode = #tpu.pipeline_mode<synchronous>, transform_indices = @transform_6, window_bounds = array<i64: 1, 1, 256>}, {pipeline_mode = #tpu.pipeline_mode<synchronous>, transform_indices = @transform_7, window_bounds = array<i64: 64, 256>}, {pipeline_mode = #tpu.pipeline_mode<synchronous>, transform_indices = @transform_8, window_bounds = array<i64: 64, 80>}, {pipeline_mode = #tpu.pipeline_mode<synchronous>, transform_indices = @transform_9, window_bounds = array<i64: 1, 80>}, {pipeline_mode = #tpu.pipeline_mode<synchronous>, transform_indices = @transform_10, window_bounds = array<i64: 80, 100>}, {pipeline_mode = #tpu.pipeline_mode<synchronous>, transform_indices = @transform_11, window_bounds = array<i64: 1, 100>}, {pipeline_mode = #tpu.pipeline_mode<synchronous>, transform_indices = @transform_12, window_bounds = array<i64: 100, 2>}, {pipeline_mode = #tpu.pipeline_mode<synchronous>, transform_indices = @transform_13, window_bounds = array<i64: 1, 2>}, {transform_indices = @transform_14, window_bounds = array<i64: 8, 2>}]} {
    %c0 = arith.constant 0 : index
    %c0_0 = arith.constant 0 : index
    %c0_1 = arith.constant 0 : index
    %0 = vector.load %arg1[%c0, %c0_0, %c0_1] : memref<8x8x2xf32, #tpu.memory_space<vmem>>, vector<8x8x1xf32>
    %c0_2 = arith.constant 0 : index
    %c0_3 = arith.constant 0 : index
    %c0_4 = arith.constant 0 : index
    %1 = vector.load %arg2[%c0_2, %c0_3, %c0_4] : memref<1x1x256xf32, #tpu.memory_space<vmem>>, vector<1x1x256xf32>
    %2 = vector.broadcast %0 : vector<8x8x1xf32> to vector<8x8x256xf32>
    %3 = vector.broadcast %1 : vector<1x1x256xf32> to vector<8x8x256xf32>
    %4 = arith.mulf %2, %3 : vector<8x8x256xf32>
    %c0_5 = arith.constant 0 : index
    %c0_6 = arith.constant 0 : index
    %c1 = arith.constant 1 : index
    %5 = vector.load %arg1[%c0_5, %c0_6, %c1] : memref<8x8x2xf32, #tpu.memory_space<vmem>>, vector<8x8x1xf32>
    %c0_7 = arith.constant 0 : index
    %c0_8 = arith.constant 0 : index
    %c0_9 = arith.constant 0 : index
    %6 = vector.load %arg3[%c0_7, %c0_8, %c0_9] : memref<1x1x256xf32, #tpu.memory_space<vmem>>, vector<1x1x256xf32>
    %7 = vector.broadcast %5 : vector<8x8x1xf32> to vector<8x8x256xf32>
    %8 = vector.broadcast %6 : vector<1x1x256xf32> to vector<8x8x256xf32>
    %9 = arith.mulf %7, %8 : vector<8x8x256xf32>
    %10 = arith.addf %4, %9 : vector<8x8x256xf32>
    %c0_10 = arith.constant 0 : index
    %c0_11 = arith.constant 0 : index
    %c0_12 = arith.constant 0 : index
    %11 = vector.load %arg4[%c0_10, %c0_11, %c0_12] : memref<1x1x256xf32, #tpu.memory_space<vmem>>, vector<1x1x256xf32>
    %12 = vector.broadcast %11 : vector<1x1x256xf32> to vector<8x8x256xf32>
    %13 = arith.addf %10, %12 : vector<8x8x256xf32>
    %c0_13 = arith.constant 0 : index
    %c0_14 = arith.constant 0 : index
    %c0_15 = arith.constant 0 : index
    %14 = vector.load %arg16[%c0_13, %c0_14, %c0_15] : memref<8x8x256xf32, #tpu.memory_space<vmem>>, vector<8x8x256xf32>
    tpu.vector_store %arg16[%c0_13, %c0_14, %c0_15], %13 {strides = array<i32>} : memref<8x8x256xf32, #tpu.memory_space<vmem>>, vector<8x8x256xf32>,
    %cst = arith.constant 0.000000e+00 : bf16
    %15 = vector.broadcast %cst : bf16 to vector<8x64xbf16>
    %cst_16 = arith.constant 0.000000e+00 : f32
    %16 = vector.broadcast %cst_16 : f32 to vector<8x64xf32>
    %c0_17 = arith.constant 0 : index
    %c0_18 = arith.constant 0 : index
    %17 = vector.load %arg5[%c0_17, %c0_18] : memref<64x256xbf16, #tpu.memory_space<vmem>>, vector<64x256xbf16>
    %c0_i32 = arith.constant 0 : i32
    %18 = arith.index_cast %c0_i32 : i32 to index
    %c0_19 = arith.constant 0 : index
    %c0_20 = arith.constant 0 : index
    %19 = vector.load %arg16[%18, %c0_19, %c0_20] : memref<8x8x256xf32, #tpu.memory_space<vmem>>, vector<1x8x256xf32>
    %20 = vector.shape_cast %19 : vector<1x8x256xf32> to vector<8x256xf32>
    %cst_21 = arith.constant dense<0.000000e+00> : vector<8x256xf32>
    %21 = tpu.matmul %15, %17, %cst_21 {dimension_numbers = #tpu.dot_dimension_numbers<[1], [0], [0], [1], [0, 0, 1, 1], [], []>} : vector<8x64xbf16>, vector<64x256xbf16>, vector<8x256xf32> -> vector<8x256xf32>
    %22 = arith.addf %20, %21 : vector<8x256xf32>
    %23 = arith.truncf %22 : vector<8x256xf32> to vector<8x256xbf16>
    %24 = vector.extract_strided_slice %23 {offsets = [0, 0], sizes = [8, 192], strides = [1, 1]} : vector<8x256xbf16> to vector<8x192xbf16>
    %25 = arith.negf %24 : vector<8x192xbf16>
    %26 = math.exp %25 : vector<8x192xbf16>
    %cst_22 = arith.constant 1.000000e+00 : bf16
    %27 = vector.broadcast %cst_22 : bf16 to vector<8x192xbf16>
    %28 = arith.addf %27, %26 : vector<8x192xbf16>
    %29 = arith.divf %27, %28 : vector<8x192xbf16>
    %30 = vector.extract_strided_slice %23 {offsets = [0, 192], sizes = [8, 64], strides = [1, 1]} : vector<8x256xbf16> to vector<8x64xbf16>
    %31 = math.tanh %30 : vector<8x64xbf16>
    %32 = vector.extract_strided_slice %29 {offsets = [0, 64], sizes = [8, 64], strides = [1, 1]} : vector<8x192xbf16> to vector<8x64xbf16>
    %33 = arith.extf %32 : vector<8x64xbf16> to vector<8x64xf32>
    %34 = arith.mulf %33, %16 : vector<8x64xf32>
    %35 = vector.extract_strided_slice %29 {offsets = [0, 0], sizes = [8, 64], strides = [1, 1]} : vector<8x192xbf16> to vector<8x64xbf16>
    %36 = arith.mulf %35, %31 : vector<8x64xbf16>
    %37 = arith.extf %36 : vector<8x64xbf16> to vector<8x64xf32>
    %38 = arith.addf %34, %37 : vector<8x64xf32>
    %39 = vector.extract_strided_slice %29 {offsets = [0, 128], sizes = [8, 64], strides = [1, 1]} : vector<8x192xbf16> to vector<8x64xbf16>
    %40 = arith.truncf %38 : vector<8x64xf32> to vector<8x64xbf16>
    %41 = math.tanh %40 : vector<8x64xbf16>
    %42 = arith.mulf %39, %41 : vector<8x64xbf16>
    %43 = arith.extf %42 : vector<8x64xbf16> to vector<8x64xf32>
    %44 = arith.index_cast %c0_i32 : i32 to index
    %c0_23 = arith.constant 0 : index
    %c0_24 = arith.constant 0 : index
    %45 = vector.load %arg17[%44, %c0_23, %c0_24] : memref<8x8x128xf32, #tpu.memory_space<vmem>>, vector<1x8x64xf32>
    %46 = vector.shape_cast %45 : vector<1x8x64xf32> to vector<8x64xf32>
    %47 = vector.shape_cast %43 : vector<8x64xf32> to vector<1x8x64xf32>
    tpu.vector_store %arg17[%44, %c0_23, %c0_24], %47 {strides = array<i32>} : memref<8x8x128xf32, #tpu.memory_space<vmem>>, vector<1x8x64xf32>,
    %c7_i32 = arith.constant 7 : i32
    %48 = arith.subi %c7_i32, %c0_i32 : i32
    %49 = arith.index_cast %48 : i32 to index
    %c0_25 = arith.constant 0 : index
    %c64 = arith.constant 64 : index
    %50 = vector.load %arg17[%49, %c0_25, %c64] : memref<8x8x128xf32, #tpu.memory_space<vmem>>, vector<1x8x64xf32>
    %51 = vector.shape_cast %50 : vector<1x8x64xf32> to vector<8x64xf32>
    %52 = vector.shape_cast %43 : vector<8x64xf32> to vector<1x8x64xf32>
    tpu.vector_store %arg17[%49, %c0_25, %c64], %52 {strides = array<i32>} : memref<8x8x128xf32, #tpu.memory_space<vmem>>, vector<1x8x64xf32>,
    %c1_i32 = arith.constant 1 : i32
    %53 = arith.index_cast %c1_i32 : i32 to index
    %c0_26 = arith.constant 0 : index
    %c0_27 = arith.constant 0 : index
    %54 = vector.load %arg16[%53, %c0_26, %c0_27] : memref<8x8x256xf32, #tpu.memory_space<vmem>>, vector<1x8x256xf32>
    %55 = vector.shape_cast %54 : vector<1x8x256xf32> to vector<8x256xf32>
    %cst_28 = arith.constant dense<0.000000e+00> : vector<8x256xf32>
    %56 = tpu.matmul %42, %17, %cst_28 {dimension_numbers = #tpu.dot_dimension_numbers<[1], [0], [0], [1], [0, 0, 1, 1], [], []>} : vector<8x64xbf16>, vector<64x256xbf16>, vector<8x256xf32> -> vector<8x256xf32>
    %57 = arith.addf %55, %56 : vector<8x256xf32>
    %58 = arith.truncf %57 : vector<8x256xf32> to vector<8x256xbf16>
    %59 = vector.extract_strided_slice %58 {offsets = [0, 0], sizes = [8, 192], strides = [1, 1]} : vector<8x256xbf16> to vector<8x192xbf16>
    %60 = arith.negf %59 : vector<8x192xbf16>
    %61 = math.exp %60 : vector<8x192xbf16>
    %cst_29 = arith.constant 1.000000e+00 : bf16
    %62 = vector.broadcast %cst_29 : bf16 to vector<8x192xbf16>
    %63 = arith.addf %62, %61 : vector<8x192xbf16>
    %64 = arith.divf %62, %63 : vector<8x192xbf16>
    %65 = vector.extract_strided_slice %58 {offsets = [0, 192], sizes = [8, 64], strides = [1, 1]} : vector<8x256xbf16> to vector<8x64xbf16>
    %66 = math.tanh %65 : vector<8x64xbf16>
    %67 = vector.extract_strided_slice %64 {offsets = [0, 64], sizes = [8, 64], strides = [1, 1]} : vector<8x192xbf16> to vector<8x64xbf16>
    %68 = arith.extf %67 : vector<8x64xbf16> to vector<8x64xf32>
    %69 = arith.mulf %68, %38 : vector<8x64xf32>
    %70 = vector.extract_strided_slice %64 {offsets = [0, 0], sizes = [8, 64], strides = [1, 1]} : vector<8x192xbf16> to vector<8x64xbf16>
    %71 = arith.mulf %70, %66 : vector<8x64xbf16>
    %72 = arith.extf %71 : vector<8x64xbf16> to vector<8x64xf32>
    %73 = arith.addf %69, %72 : vector<8x64xf32>
    %74 = vector.extract_strided_slice %64 {offsets = [0, 128], sizes = [8, 64], strides = [1, 1]} : vector<8x192xbf16> to vector<8x64xbf16>
    %75 = arith.truncf %73 : vector<8x64xf32> to vector<8x64xbf16>
    %76 = math.tanh %75 : vector<8x64xbf16>
    %77 = arith.mulf %74, %76 : vector<8x64xbf16>
    %78 = arith.extf %77 : vector<8x64xbf16> to vector<8x64xf32>
    %79 = arith.index_cast %c1_i32 : i32 to index
    %c0_30 = arith.constant 0 : index
    %c0_31 = arith.constant 0 : index
    %80 = vector.load %arg17[%79, %c0_30, %c0_31] : memref<8x8x128xf32, #tpu.memory_space<vmem>>, vector<1x8x64xf32>
    %81 = vector.shape_cast %80 : vector<1x8x64xf32> to vector<8x64xf32>
    %82 = vector.shape_cast %78 : vector<8x64xf32> to vector<1x8x64xf32>
    tpu.vector_store %arg17[%79, %c0_30, %c0_31], %82 {strides = array<i32>} : memref<8x8x128xf32, #tpu.memory_space<vmem>>, vector<1x8x64xf32>,
    %c7_i32_32 = arith.constant 7 : i32
    %83 = arith.subi %c7_i32_32, %c1_i32 : i32
    %84 = arith.index_cast %83 : i32 to index
    %c0_33 = arith.constant 0 : index
    %c64_34 = arith.constant 64 : index
    %85 = vector.load %arg17[%84, %c0_33, %c64_34] : memref<8x8x128xf32, #tpu.memory_space<vmem>>, vector<1x8x64xf32>
    %86 = vector.shape_cast %85 : vector<1x8x64xf32> to vector<8x64xf32>
    %87 = vector.shape_cast %78 : vector<8x64xf32> to vector<1x8x64xf32>
    tpu.vector_store %arg17[%84, %c0_33, %c64_34], %87 {strides = array<i32>} : memref<8x8x128xf32, #tpu.memory_space<vmem>>, vector<1x8x64xf32>,
    %c2_i32 = arith.constant 2 : i32
    %88 = arith.index_cast %c2_i32 : i32 to index
    %c0_35 = arith.constant 0 : index
    %c0_36 = arith.constant 0 : index
    %89 = vector.load %arg16[%88, %c0_35, %c0_36] : memref<8x8x256xf32, #tpu.memory_space<vmem>>, vector<1x8x256xf32>
    %90 = vector.shape_cast %89 : vector<1x8x256xf32> to vector<8x256xf32>
    %cst_37 = arith.constant dense<0.000000e+00> : vector<8x256xf32>
    %91 = tpu.matmul %77, %17, %cst_37 {dimension_numbers = #tpu.dot_dimension_numbers<[1], [0], [0], [1], [0, 0, 1, 1], [], []>} : vector<8x64xbf16>, vector<64x256xbf16>, vector<8x256xf32> -> vector<8x256xf32>
    %92 = arith.addf %90, %91 : vector<8x256xf32>
    %93 = arith.truncf %92 : vector<8x256xf32> to vector<8x256xbf16>
    %94 = vector.extract_strided_slice %93 {offsets = [0, 0], sizes = [8, 192], strides = [1, 1]} : vector<8x256xbf16> to vector<8x192xbf16>
    %95 = arith.negf %94 : vector<8x192xbf16>
    %96 = math.exp %95 : vector<8x192xbf16>
    %cst_38 = arith.constant 1.000000e+00 : bf16
    %97 = vector.broadcast %cst_38 : bf16 to vector<8x192xbf16>
    %98 = arith.addf %97, %96 : vector<8x192xbf16>
    %99 = arith.divf %97, %98 : vector<8x192xbf16>
    %100 = vector.extract_strided_slice %93 {offsets = [0, 192], sizes = [8, 64], strides = [1, 1]} : vector<8x256xbf16> to vector<8x64xbf16>
    %101 = math.tanh %100 : vector<8x64xbf16>
    %102 = vector.extract_strided_slice %99 {offsets = [0, 64], sizes = [8, 64], strides = [1, 1]} : vector<8x192xbf16> to vector<8x64xbf16>
    %103 = arith.extf %102 : vector<8x64xbf16> to vector<8x64xf32>
    %104 = arith.mulf %103, %73 : vector<8x64xf32>
    %105 = vector.extract_strided_slice %99 {offsets = [0, 0], sizes = [8, 64], strides = [1, 1]} : vector<8x192xbf16> to vector<8x64xbf16>
    %106 = arith.mulf %105, %101 : vector<8x64xbf16>
    %107 = arith.extf %106 : vector<8x64xbf16> to vector<8x64xf32>
    %108 = arith.addf %104, %107 : vector<8x64xf32>
    %109 = vector.extract_strided_slice %99 {offsets = [0, 128], sizes = [8, 64], strides = [1, 1]} : vector<8x192xbf16> to vector<8x64xbf16>
    %110 = arith.truncf %108 : vector<8x64xf32> to vector<8x64xbf16>
    %111 = math.tanh %110 : vector<8x64xbf16>
    %112 = arith.mulf %109, %111 : vector<8x64xbf16>
    %113 = arith.extf %112 : vector<8x64xbf16> to vector<8x64xf32>
    %114 = arith.index_cast %c2_i32 : i32 to index
    %c0_39 = arith.constant 0 : index
    %c0_40 = arith.constant 0 : index
    %115 = vector.load %arg17[%114, %c0_39, %c0_40] : memref<8x8x128xf32, #tpu.memory_space<vmem>>, vector<1x8x64xf32>
    %116 = vector.shape_cast %115 : vector<1x8x64xf32> to vector<8x64xf32>
    %117 = vector.shape_cast %113 : vector<8x64xf32> to vector<1x8x64xf32>
    tpu.vector_store %arg17[%114, %c0_39, %c0_40], %117 {strides = array<i32>} : memref<8x8x128xf32, #tpu.memory_space<vmem>>, vector<1x8x64xf32>,
    %c7_i32_41 = arith.constant 7 : i32
    %118 = arith.subi %c7_i32_41, %c2_i32 : i32
    %119 = arith.index_cast %118 : i32 to index
    %c0_42 = arith.constant 0 : index
    %c64_43 = arith.constant 64 : index
    %120 = vector.load %arg17[%119, %c0_42, %c64_43] : memref<8x8x128xf32, #tpu.memory_space<vmem>>, vector<1x8x64xf32>
    %121 = vector.shape_cast %120 : vector<1x8x64xf32> to vector<8x64xf32>
    %122 = vector.shape_cast %113 : vector<8x64xf32> to vector<1x8x64xf32>
    tpu.vector_store %arg17[%119, %c0_42, %c64_43], %122 {strides = array<i32>} : memref<8x8x128xf32, #tpu.memory_space<vmem>>, vector<1x8x64xf32>,
    %c3_i32 = arith.constant 3 : i32
    %123 = arith.index_cast %c3_i32 : i32 to index
    %c0_44 = arith.constant 0 : index
    %c0_45 = arith.constant 0 : index
    %124 = vector.load %arg16[%123, %c0_44, %c0_45] : memref<8x8x256xf32, #tpu.memory_space<vmem>>, vector<1x8x256xf32>
    %125 = vector.shape_cast %124 : vector<1x8x256xf32> to vector<8x256xf32>
    %cst_46 = arith.constant dense<0.000000e+00> : vector<8x256xf32>
    %126 = tpu.matmul %112, %17, %cst_46 {dimension_numbers = #tpu.dot_dimension_numbers<[1], [0], [0], [1], [0, 0, 1, 1], [], []>} : vector<8x64xbf16>, vector<64x256xbf16>, vector<8x256xf32> -> vector<8x256xf32>
    %127 = arith.addf %125, %126 : vector<8x256xf32>
    %128 = arith.truncf %127 : vector<8x256xf32> to vector<8x256xbf16>
    %129 = vector.extract_strided_slice %128 {offsets = [0, 0], sizes = [8, 192], strides = [1, 1]} : vector<8x256xbf16> to vector<8x192xbf16>
    %130 = arith.negf %129 : vector<8x192xbf16>
    %131 = math.exp %130 : vector<8x192xbf16>
    %cst_47 = arith.constant 1.000000e+00 : bf16
    %132 = vector.broadcast %cst_47 : bf16 to vector<8x192xbf16>
    %133 = arith.addf %132, %131 : vector<8x192xbf16>
    %134 = arith.divf %132, %133 : vector<8x192xbf16>
    %135 = vector.extract_strided_slice %128 {offsets = [0, 192], sizes = [8, 64], strides = [1, 1]} : vector<8x256xbf16> to vector<8x64xbf16>
    %136 = math.tanh %135 : vector<8x64xbf16>
    %137 = vector.extract_strided_slice %134 {offsets = [0, 64], sizes = [8, 64], strides = [1, 1]} : vector<8x192xbf16> to vector<8x64xbf16>
    %138 = arith.extf %137 : vector<8x64xbf16> to vector<8x64xf32>
    %139 = arith.mulf %138, %108 : vector<8x64xf32>
    %140 = vector.extract_strided_slice %134 {offsets = [0, 0], sizes = [8, 64], strides = [1, 1]} : vector<8x192xbf16> to vector<8x64xbf16>
    %141 = arith.mulf %140, %136 : vector<8x64xbf16>
    %142 = arith.extf %141 : vector<8x64xbf16> to vector<8x64xf32>
    %143 = arith.addf %139, %142 : vector<8x64xf32>
    %144 = vector.extract_strided_slice %134 {offsets = [0, 128], sizes = [8, 64], strides = [1, 1]} : vector<8x192xbf16> to vector<8x64xbf16>
    %145 = arith.truncf %143 : vector<8x64xf32> to vector<8x64xbf16>
    %146 = math.tanh %145 : vector<8x64xbf16>
    %147 = arith.mulf %144, %146 : vector<8x64xbf16>
    %148 = arith.extf %147 : vector<8x64xbf16> to vector<8x64xf32>
    %149 = arith.index_cast %c3_i32 : i32 to index
    %c0_48 = arith.constant 0 : index
    %c0_49 = arith.constant 0 : index
    %150 = vector.load %arg17[%149, %c0_48, %c0_49] : memref<8x8x128xf32, #tpu.memory_space<vmem>>, vector<1x8x64xf32>
    %151 = vector.shape_cast %150 : vector<1x8x64xf32> to vector<8x64xf32>
    %152 = vector.shape_cast %148 : vector<8x64xf32> to vector<1x8x64xf32>
    tpu.vector_store %arg17[%149, %c0_48, %c0_49], %152 {strides = array<i32>} : memref<8x8x128xf32, #tpu.memory_space<vmem>>, vector<1x8x64xf32>,
    %c7_i32_50 = arith.constant 7 : i32
    %153 = arith.subi %c7_i32_50, %c3_i32 : i32
    %154 = arith.index_cast %153 : i32 to index
    %c0_51 = arith.constant 0 : index
    %c64_52 = arith.constant 64 : index
    %155 = vector.load %arg17[%154, %c0_51, %c64_52] : memref<8x8x128xf32, #tpu.memory_space<vmem>>, vector<1x8x64xf32>
    %156 = vector.shape_cast %155 : vector<1x8x64xf32> to vector<8x64xf32>
    %157 = vector.shape_cast %148 : vector<8x64xf32> to vector<1x8x64xf32>
    tpu.vector_store %arg17[%154, %c0_51, %c64_52], %157 {strides = array<i32>} : memref<8x8x128xf32, #tpu.memory_space<vmem>>, vector<1x8x64xf32>,
    %c4_i32 = arith.constant 4 : i32
    %158 = arith.index_cast %c4_i32 : i32 to index
    %c0_53 = arith.constant 0 : index
    %c0_54 = arith.constant 0 : index
    %159 = vector.load %arg16[%158, %c0_53, %c0_54] : memref<8x8x256xf32, #tpu.memory_space<vmem>>, vector<1x8x256xf32>
    %160 = vector.shape_cast %159 : vector<1x8x256xf32> to vector<8x256xf32>
    %cst_55 = arith.constant dense<0.000000e+00> : vector<8x256xf32>
    %161 = tpu.matmul %147, %17, %cst_55 {dimension_numbers = #tpu.dot_dimension_numbers<[1], [0], [0], [1], [0, 0, 1, 1], [], []>} : vector<8x64xbf16>, vector<64x256xbf16>, vector<8x256xf32> -> vector<8x256xf32>
    %162 = arith.addf %160, %161 : vector<8x256xf32>
    %163 = arith.truncf %162 : vector<8x256xf32> to vector<8x256xbf16>
    %164 = vector.extract_strided_slice %163 {offsets = [0, 0], sizes = [8, 192], strides = [1, 1]} : vector<8x256xbf16> to vector<8x192xbf16>
    %165 = arith.negf %164 : vector<8x192xbf16>
    %166 = math.exp %165 : vector<8x192xbf16>
    %cst_56 = arith.constant 1.000000e+00 : bf16
    %167 = vector.broadcast %cst_56 : bf16 to vector<8x192xbf16>
    %168 = arith.addf %167, %166 : vector<8x192xbf16>
    %169 = arith.divf %167, %168 : vector<8x192xbf16>
    %170 = vector.extract_strided_slice %163 {offsets = [0, 192], sizes = [8, 64], strides = [1, 1]} : vector<8x256xbf16> to vector<8x64xbf16>
    %171 = math.tanh %170 : vector<8x64xbf16>
    %172 = vector.extract_strided_slice %169 {offsets = [0, 64], sizes = [8, 64], strides = [1, 1]} : vector<8x192xbf16> to vector<8x64xbf16>
    %173 = arith.extf %172 : vector<8x64xbf16> to vector<8x64xf32>
    %174 = arith.mulf %173, %143 : vector<8x64xf32>
    %175 = vector.extract_strided_slice %169 {offsets = [0, 0], sizes = [8, 64], strides = [1, 1]} : vector<8x192xbf16> to vector<8x64xbf16>
    %176 = arith.mulf %175, %171 : vector<8x64xbf16>
    %177 = arith.extf %176 : vector<8x64xbf16> to vector<8x64xf32>
    %178 = arith.addf %174, %177 : vector<8x64xf32>
    %179 = vector.extract_strided_slice %169 {offsets = [0, 128], sizes = [8, 64], strides = [1, 1]} : vector<8x192xbf16> to vector<8x64xbf16>
    %180 = arith.truncf %178 : vector<8x64xf32> to vector<8x64xbf16>
    %181 = math.tanh %180 : vector<8x64xbf16>
    %182 = arith.mulf %179, %181 : vector<8x64xbf16>
    %183 = arith.extf %182 : vector<8x64xbf16> to vector<8x64xf32>
    %184 = arith.index_cast %c4_i32 : i32 to index
    %c0_57 = arith.constant 0 : index
    %c0_58 = arith.constant 0 : index
    %185 = vector.load %arg17[%184, %c0_57, %c0_58] : memref<8x8x128xf32, #tpu.memory_space<vmem>>, vector<1x8x64xf32>
    %186 = vector.shape_cast %185 : vector<1x8x64xf32> to vector<8x64xf32>
    %187 = vector.shape_cast %183 : vector<8x64xf32> to vector<1x8x64xf32>
    tpu.vector_store %arg17[%184, %c0_57, %c0_58], %187 {strides = array<i32>} : memref<8x8x128xf32, #tpu.memory_space<vmem>>, vector<1x8x64xf32>,
    %c7_i32_59 = arith.constant 7 : i32
    %188 = arith.subi %c7_i32_59, %c4_i32 : i32
    %189 = arith.index_cast %188 : i32 to index
    %c0_60 = arith.constant 0 : index
    %c64_61 = arith.constant 64 : index
    %190 = vector.load %arg17[%189, %c0_60, %c64_61] : memref<8x8x128xf32, #tpu.memory_space<vmem>>, vector<1x8x64xf32>
    %191 = vector.shape_cast %190 : vector<1x8x64xf32> to vector<8x64xf32>
    %192 = vector.shape_cast %183 : vector<8x64xf32> to vector<1x8x64xf32>
    tpu.vector_store %arg17[%189, %c0_60, %c64_61], %192 {strides = array<i32>} : memref<8x8x128xf32, #tpu.memory_space<vmem>>, vector<1x8x64xf32>,
    %c5_i32 = arith.constant 5 : i32
    %193 = arith.index_cast %c5_i32 : i32 to index
    %c0_62 = arith.constant 0 : index
    %c0_63 = arith.constant 0 : index
    %194 = vector.load %arg16[%193, %c0_62, %c0_63] : memref<8x8x256xf32, #tpu.memory_space<vmem>>, vector<1x8x256xf32>
    %195 = vector.shape_cast %194 : vector<1x8x256xf32> to vector<8x256xf32>
    %cst_64 = arith.constant dense<0.000000e+00> : vector<8x256xf32>
    %196 = tpu.matmul %182, %17, %cst_64 {dimension_numbers = #tpu.dot_dimension_numbers<[1], [0], [0], [1], [0, 0, 1, 1], [], []>} : vector<8x64xbf16>, vector<64x256xbf16>, vector<8x256xf32> -> vector<8x256xf32>
    %197 = arith.addf %195, %196 : vector<8x256xf32>
    %198 = arith.truncf %197 : vector<8x256xf32> to vector<8x256xbf16>
    %199 = vector.extract_strided_slice %198 {offsets = [0, 0], sizes = [8, 192], strides = [1, 1]} : vector<8x256xbf16> to vector<8x192xbf16>
    %200 = arith.negf %199 : vector<8x192xbf16>
    %201 = math.exp %200 : vector<8x192xbf16>
    %cst_65 = arith.constant 1.000000e+00 : bf16
    %202 = vector.broadcast %cst_65 : bf16 to vector<8x192xbf16>
    %203 = arith.addf %202, %201 : vector<8x192xbf16>
    %204 = arith.divf %202, %203 : vector<8x192xbf16>
    %205 = vector.extract_strided_slice %198 {offsets = [0, 192], sizes = [8, 64], strides = [1, 1]} : vector<8x256xbf16> to vector<8x64xbf16>
    %206 = math.tanh %205 : vector<8x64xbf16>
    %207 = vector.extract_strided_slice %204 {offsets = [0, 64], sizes = [8, 64], strides = [1, 1]} : vector<8x192xbf16> to vector<8x64xbf16>
    %208 = arith.extf %207 : vector<8x64xbf16> to vector<8x64xf32>
    %209 = arith.mulf %208, %178 : vector<8x64xf32>
    %210 = vector.extract_strided_slice %204 {offsets = [0, 0], sizes = [8, 64], strides = [1, 1]} : vector<8x192xbf16> to vector<8x64xbf16>
    %211 = arith.mulf %210, %206 : vector<8x64xbf16>
    %212 = arith.extf %211 : vector<8x64xbf16> to vector<8x64xf32>
    %213 = arith.addf %209, %212 : vector<8x64xf32>
    %214 = vector.extract_strided_slice %204 {offsets = [0, 128], sizes = [8, 64], strides = [1, 1]} : vector<8x192xbf16> to vector<8x64xbf16>
    %215 = arith.truncf %213 : vector<8x64xf32> to vector<8x64xbf16>
    %216 = math.tanh %215 : vector<8x64xbf16>
    %217 = arith.mulf %214, %216 : vector<8x64xbf16>
    %218 = arith.extf %217 : vector<8x64xbf16> to vector<8x64xf32>
    %219 = arith.index_cast %c5_i32 : i32 to index
    %c0_66 = arith.constant 0 : index
    %c0_67 = arith.constant 0 : index
    %220 = vector.load %arg17[%219, %c0_66, %c0_67] : memref<8x8x128xf32, #tpu.memory_space<vmem>>, vector<1x8x64xf32>
    %221 = vector.shape_cast %220 : vector<1x8x64xf32> to vector<8x64xf32>
    %222 = vector.shape_cast %218 : vector<8x64xf32> to vector<1x8x64xf32>
    tpu.vector_store %arg17[%219, %c0_66, %c0_67], %222 {strides = array<i32>} : memref<8x8x128xf32, #tpu.memory_space<vmem>>, vector<1x8x64xf32>,
    %c7_i32_68 = arith.constant 7 : i32
    %223 = arith.subi %c7_i32_68, %c5_i32 : i32
    %224 = arith.index_cast %223 : i32 to index
    %c0_69 = arith.constant 0 : index
    %c64_70 = arith.constant 64 : index
    %225 = vector.load %arg17[%224, %c0_69, %c64_70] : memref<8x8x128xf32, #tpu.memory_space<vmem>>, vector<1x8x64xf32>
    %226 = vector.shape_cast %225 : vector<1x8x64xf32> to vector<8x64xf32>
    %227 = vector.shape_cast %218 : vector<8x64xf32> to vector<1x8x64xf32>
    tpu.vector_store %arg17[%224, %c0_69, %c64_70], %227 {strides = array<i32>} : memref<8x8x128xf32, #tpu.memory_space<vmem>>, vector<1x8x64xf32>,
    %c6_i32 = arith.constant 6 : i32
    %228 = arith.index_cast %c6_i32 : i32 to index
    %c0_71 = arith.constant 0 : index
    %c0_72 = arith.constant 0 : index
    %229 = vector.load %arg16[%228, %c0_71, %c0_72] : memref<8x8x256xf32, #tpu.memory_space<vmem>>, vector<1x8x256xf32>
    %230 = vector.shape_cast %229 : vector<1x8x256xf32> to vector<8x256xf32>
    %cst_73 = arith.constant dense<0.000000e+00> : vector<8x256xf32>
    %231 = tpu.matmul %217, %17, %cst_73 {dimension_numbers = #tpu.dot_dimension_numbers<[1], [0], [0], [1], [0, 0, 1, 1], [], []>} : vector<8x64xbf16>, vector<64x256xbf16>, vector<8x256xf32> -> vector<8x256xf32>
    %232 = arith.addf %230, %231 : vector<8x256xf32>
    %233 = arith.truncf %232 : vector<8x256xf32> to vector<8x256xbf16>
    %234 = vector.extract_strided_slice %233 {offsets = [0, 0], sizes = [8, 192], strides = [1, 1]} : vector<8x256xbf16> to vector<8x192xbf16>
    %235 = arith.negf %234 : vector<8x192xbf16>
    %236 = math.exp %235 : vector<8x192xbf16>
    %cst_74 = arith.constant 1.000000e+00 : bf16
    %237 = vector.broadcast %cst_74 : bf16 to vector<8x192xbf16>
    %238 = arith.addf %237, %236 : vector<8x192xbf16>
    %239 = arith.divf %237, %238 : vector<8x192xbf16>
    %240 = vector.extract_strided_slice %233 {offsets = [0, 192], sizes = [8, 64], strides = [1, 1]} : vector<8x256xbf16> to vector<8x64xbf16>
    %241 = math.tanh %240 : vector<8x64xbf16>
    %242 = vector.extract_strided_slice %239 {offsets = [0, 64], sizes = [8, 64], strides = [1, 1]} : vector<8x192xbf16> to vector<8x64xbf16>
    %243 = arith.extf %242 : vector<8x64xbf16> to vector<8x64xf32>
    %244 = arith.mulf %243, %213 : vector<8x64xf32>
    %245 = vector.extract_strided_slice %239 {offsets = [0, 0], sizes = [8, 64], strides = [1, 1]} : vector<8x192xbf16> to vector<8x64xbf16>
    %246 = arith.mulf %245, %241 : vector<8x64xbf16>
    %247 = arith.extf %246 : vector<8x64xbf16> to vector<8x64xf32>
    %248 = arith.addf %244, %247 : vector<8x64xf32>
    %249 = vector.extract_strided_slice %239 {offsets = [0, 128], sizes = [8, 64], strides = [1, 1]} : vector<8x192xbf16> to vector<8x64xbf16>
    %250 = arith.truncf %248 : vector<8x64xf32> to vector<8x64xbf16>
    %251 = math.tanh %250 : vector<8x64xbf16>
    %252 = arith.mulf %249, %251 : vector<8x64xbf16>
    %253 = arith.extf %252 : vector<8x64xbf16> to vector<8x64xf32>
    %254 = arith.index_cast %c6_i32 : i32 to index
    %c0_75 = arith.constant 0 : index
    %c0_76 = arith.constant 0 : index
    %255 = vector.load %arg17[%254, %c0_75, %c0_76] : memref<8x8x128xf32, #tpu.memory_space<vmem>>, vector<1x8x64xf32>
    %256 = vector.shape_cast %255 : vector<1x8x64xf32> to vector<8x64xf32>
    %257 = vector.shape_cast %253 : vector<8x64xf32> to vector<1x8x64xf32>
    tpu.vector_store %arg17[%254, %c0_75, %c0_76], %257 {strides = array<i32>} : memref<8x8x128xf32, #tpu.memory_space<vmem>>, vector<1x8x64xf32>,
    %c7_i32_77 = arith.constant 7 : i32
    %258 = arith.subi %c7_i32_77, %c6_i32 : i32
    %259 = arith.index_cast %258 : i32 to index
    %c0_78 = arith.constant 0 : index
    %c64_79 = arith.constant 64 : index
    %260 = vector.load %arg17[%259, %c0_78, %c64_79] : memref<8x8x128xf32, #tpu.memory_space<vmem>>, vector<1x8x64xf32>
    %261 = vector.shape_cast %260 : vector<1x8x64xf32> to vector<8x64xf32>
    %262 = vector.shape_cast %253 : vector<8x64xf32> to vector<1x8x64xf32>
    tpu.vector_store %arg17[%259, %c0_78, %c64_79], %262 {strides = array<i32>} : memref<8x8x128xf32, #tpu.memory_space<vmem>>, vector<1x8x64xf32>,
    %c7_i32_80 = arith.constant 7 : i32
    %263 = arith.index_cast %c7_i32_80 : i32 to index
    %c0_81 = arith.constant 0 : index
    %c0_82 = arith.constant 0 : index
    %264 = vector.load %arg16[%263, %c0_81, %c0_82] : memref<8x8x256xf32, #tpu.memory_space<vmem>>, vector<1x8x256xf32>
    %265 = vector.shape_cast %264 : vector<1x8x256xf32> to vector<8x256xf32>
    %cst_83 = arith.constant dense<0.000000e+00> : vector<8x256xf32>
    %266 = tpu.matmul %252, %17, %cst_83 {dimension_numbers = #tpu.dot_dimension_numbers<[1], [0], [0], [1], [0, 0, 1, 1], [], []>} : vector<8x64xbf16>, vector<64x256xbf16>, vector<8x256xf32> -> vector<8x256xf32>
    %267 = arith.addf %265, %266 : vector<8x256xf32>
    %268 = arith.truncf %267 : vector<8x256xf32> to vector<8x256xbf16>
    %269 = vector.extract_strided_slice %268 {offsets = [0, 0], sizes = [8, 192], strides = [1, 1]} : vector<8x256xbf16> to vector<8x192xbf16>
    %270 = arith.negf %269 : vector<8x192xbf16>
    %271 = math.exp %270 : vector<8x192xbf16>
    %cst_84 = arith.constant 1.000000e+00 : bf16
    %272 = vector.broadcast %cst_84 : bf16 to vector<8x192xbf16>
    %273 = arith.addf %272, %271 : vector<8x192xbf16>
    %274 = arith.divf %272, %273 : vector<8x192xbf16>
    %275 = vector.extract_strided_slice %268 {offsets = [0, 192], sizes = [8, 64], strides = [1, 1]} : vector<8x256xbf16> to vector<8x64xbf16>
    %276 = math.tanh %275 : vector<8x64xbf16>
    %277 = vector.extract_strided_slice %274 {offsets = [0, 64], sizes = [8, 64], strides = [1, 1]} : vector<8x192xbf16> to vector<8x64xbf16>
    %278 = arith.extf %277 : vector<8x64xbf16> to vector<8x64xf32>
    %279 = arith.mulf %278, %248 : vector<8x64xf32>
    %280 = vector.extract_strided_slice %274 {offsets = [0, 0], sizes = [8, 64], strides = [1, 1]} : vector<8x192xbf16> to vector<8x64xbf16>
    %281 = arith.mulf %280, %276 : vector<8x64xbf16>
    %282 = arith.extf %281 : vector<8x64xbf16> to vector<8x64xf32>
    %283 = arith.addf %279, %282 : vector<8x64xf32>
    %284 = vector.extract_strided_slice %274 {offsets = [0, 128], sizes = [8, 64], strides = [1, 1]} : vector<8x192xbf16> to vector<8x64xbf16>
    %285 = arith.truncf %283 : vector<8x64xf32> to vector<8x64xbf16>
    %286 = math.tanh %285 : vector<8x64xbf16>
    %287 = arith.mulf %284, %286 : vector<8x64xbf16>
    %288 = arith.extf %287 : vector<8x64xbf16> to vector<8x64xf32>
    %289 = arith.index_cast %c7_i32_80 : i32 to index
    %c0_85 = arith.constant 0 : index
    %c0_86 = arith.constant 0 : index
    %290 = vector.load %arg17[%289, %c0_85, %c0_86] : memref<8x8x128xf32, #tpu.memory_space<vmem>>, vector<1x8x64xf32>
    %291 = vector.shape_cast %290 : vector<1x8x64xf32> to vector<8x64xf32>
    %292 = vector.shape_cast %288 : vector<8x64xf32> to vector<1x8x64xf32>
    tpu.vector_store %arg17[%289, %c0_85, %c0_86], %292 {strides = array<i32>} : memref<8x8x128xf32, #tpu.memory_space<vmem>>, vector<1x8x64xf32>,
    %c7_i32_87 = arith.constant 7 : i32
    %293 = arith.subi %c7_i32_87, %c7_i32_80 : i32
    %294 = arith.index_cast %293 : i32 to index
    %c0_88 = arith.constant 0 : index
    %c64_89 = arith.constant 64 : index
    %295 = vector.load %arg17[%294, %c0_88, %c64_89] : memref<8x8x128xf32, #tpu.memory_space<vmem>>, vector<1x8x64xf32>
    %296 = vector.shape_cast %295 : vector<1x8x64xf32> to vector<8x64xf32>
    %297 = vector.shape_cast %288 : vector<8x64xf32> to vector<1x8x64xf32>
    tpu.vector_store %arg17[%294, %c0_88, %c64_89], %297 {strides = array<i32>} : memref<8x8x128xf32, #tpu.memory_space<vmem>>, vector<1x8x64xf32>,
    %c8_i32 = arith.constant 8 : i32
    %c0_90 = arith.constant 0 : index
    %c0_91 = arith.constant 0 : index
    %c0_92 = arith.constant 0 : index
    %298 = vector.load %arg17[%c0_90, %c0_91, %c0_92] : memref<8x8x128xf32, #tpu.memory_space<vmem>>, vector<8x8x128xf32>
    %299 = vector.shape_cast %298 : vector<8x8x128xf32> to vector<64x128xf32>
    %300 = arith.truncf %299 : vector<64x128xf32> to vector<64x128xbf16>
    %c0_93 = arith.constant 0 : index
    %c0_94 = arith.constant 0 : index
    %301 = vector.load %arg6[%c0_93, %c0_94] : memref<128x256xbf16, #tpu.memory_space<vmem>>, vector<128x256xbf16>
    %cst_95 = arith.constant dense<0.000000e+00> : vector<64x256xf32>
    %302 = tpu.matmul %300, %301, %cst_95 {dimension_numbers = #tpu.dot_dimension_numbers<[1], [0], [0], [1], [0, 0, 1, 1], [], []>} : vector<64x128xbf16>, vector<128x256xbf16>, vector<64x256xf32> -> vector<64x256xf32>
    %303 = vector.shape_cast %302 : vector<64x256xf32> to vector<8x8x256xf32>
    %c0_96 = arith.constant 0 : index
    %c0_97 = arith.constant 0 : index
    %c0_98 = arith.constant 0 : index
    %304 = vector.load %arg7[%c0_96, %c0_97, %c0_98] : memref<1x1x256xf32, #tpu.memory_space<vmem>>, vector<1x1x256xf32>
    %305 = vector.broadcast %304 : vector<1x1x256xf32> to vector<8x8x256xf32>
    %306 = arith.addf %303, %305 : vector<8x8x256xf32>
    %c0_99 = arith.constant 0 : index
    %c0_100 = arith.constant 0 : index
    %c0_101 = arith.constant 0 : index
    %307 = vector.load %arg16[%c0_99, %c0_100, %c0_101] : memref<8x8x256xf32, #tpu.memory_space<vmem>>, vector<8x8x256xf32>
    tpu.vector_store %arg16[%c0_99, %c0_100, %c0_101], %306 {strides = array<i32>} : memref<8x8x256xf32, #tpu.memory_space<vmem>>, vector<8x8x256xf32>,
    %c0_102 = arith.constant 0 : index
    %c0_103 = arith.constant 0 : index
    %308 = vector.load %arg8[%c0_102, %c0_103] : memref<64x256xbf16, #tpu.memory_space<vmem>>, vector<64x256xbf16>
    %c0_i32_104 = arith.constant 0 : i32
    %309 = arith.index_cast %c0_i32_104 : i32 to index
    %c0_105 = arith.constant 0 : index
    %c0_106 = arith.constant 0 : index
    %310 = vector.load %arg16[%309, %c0_105, %c0_106] : memref<8x8x256xf32, #tpu.memory_space<vmem>>, vector<1x8x256xf32>
    %311 = vector.shape_cast %310 : vector<1x8x256xf32> to vector<8x256xf32>
    %cst_107 = arith.constant dense<0.000000e+00> : vector<8x256xf32>
    %312 = tpu.matmul %15, %308, %cst_107 {dimension_numbers = #tpu.dot_dimension_numbers<[1], [0], [0], [1], [0, 0, 1, 1], [], []>} : vector<8x64xbf16>, vector<64x256xbf16>, vector<8x256xf32> -> vector<8x256xf32>
    %313 = arith.addf %311, %312 : vector<8x256xf32>
    %314 = arith.truncf %313 : vector<8x256xf32> to vector<8x256xbf16>
    %315 = vector.extract_strided_slice %314 {offsets = [0, 0], sizes = [8, 192], strides = [1, 1]} : vector<8x256xbf16> to vector<8x192xbf16>
    %316 = arith.negf %315 : vector<8x192xbf16>
    %317 = math.exp %316 : vector<8x192xbf16>
    %cst_108 = arith.constant 1.000000e+00 : bf16
    %318 = vector.broadcast %cst_108 : bf16 to vector<8x192xbf16>
    %319 = arith.addf %318, %317 : vector<8x192xbf16>
    %320 = arith.divf %318, %319 : vector<8x192xbf16>
    %321 = vector.extract_strided_slice %314 {offsets = [0, 192], sizes = [8, 64], strides = [1, 1]} : vector<8x256xbf16> to vector<8x64xbf16>
    %322 = math.tanh %321 : vector<8x64xbf16>
    %323 = vector.extract_strided_slice %320 {offsets = [0, 64], sizes = [8, 64], strides = [1, 1]} : vector<8x192xbf16> to vector<8x64xbf16>
    %324 = arith.extf %323 : vector<8x64xbf16> to vector<8x64xf32>
    %325 = arith.mulf %324, %16 : vector<8x64xf32>
    %326 = vector.extract_strided_slice %320 {offsets = [0, 0], sizes = [8, 64], strides = [1, 1]} : vector<8x192xbf16> to vector<8x64xbf16>
    %327 = arith.mulf %326, %322 : vector<8x64xbf16>
    %328 = arith.extf %327 : vector<8x64xbf16> to vector<8x64xf32>
    %329 = arith.addf %325, %328 : vector<8x64xf32>
    %330 = vector.extract_strided_slice %320 {offsets = [0, 128], sizes = [8, 64], strides = [1, 1]} : vector<8x192xbf16> to vector<8x64xbf16>
    %331 = arith.truncf %329 : vector<8x64xf32> to vector<8x64xbf16>
    %332 = math.tanh %331 : vector<8x64xbf16>
    %333 = arith.mulf %330, %332 : vector<8x64xbf16>
    %c1_i32_109 = arith.constant 1 : i32
    %334 = arith.index_cast %c1_i32_109 : i32 to index
    %c0_110 = arith.constant 0 : index
    %c0_111 = arith.constant 0 : index
    %335 = vector.load %arg16[%334, %c0_110, %c0_111] : memref<8x8x256xf32, #tpu.memory_space<vmem>>, vector<1x8x256xf32>
    %336 = vector.shape_cast %335 : vector<1x8x256xf32> to vector<8x256xf32>
    %cst_112 = arith.constant dense<0.000000e+00> : vector<8x256xf32>
    %337 = tpu.matmul %333, %308, %cst_112 {dimension_numbers = #tpu.dot_dimension_numbers<[1], [0], [0], [1], [0, 0, 1, 1], [], []>} : vector<8x64xbf16>, vector<64x256xbf16>, vector<8x256xf32> -> vector<8x256xf32>
    %338 = arith.addf %336, %337 : vector<8x256xf32>
    %339 = arith.truncf %338 : vector<8x256xf32> to vector<8x256xbf16>
    %340 = vector.extract_strided_slice %339 {offsets = [0, 0], sizes = [8, 192], strides = [1, 1]} : vector<8x256xbf16> to vector<8x192xbf16>
    %341 = arith.negf %340 : vector<8x192xbf16>
    %342 = math.exp %341 : vector<8x192xbf16>
    %cst_113 = arith.constant 1.000000e+00 : bf16
    %343 = vector.broadcast %cst_113 : bf16 to vector<8x192xbf16>
    %344 = arith.addf %343, %342 : vector<8x192xbf16>
    %345 = arith.divf %343, %344 : vector<8x192xbf16>
    %346 = vector.extract_strided_slice %339 {offsets = [0, 192], sizes = [8, 64], strides = [1, 1]} : vector<8x256xbf16> to vector<8x64xbf16>
    %347 = math.tanh %346 : vector<8x64xbf16>
    %348 = vector.extract_strided_slice %345 {offsets = [0, 64], sizes = [8, 64], strides = [1, 1]} : vector<8x192xbf16> to vector<8x64xbf16>
    %349 = arith.extf %348 : vector<8x64xbf16> to vector<8x64xf32>
    %350 = arith.mulf %349, %329 : vector<8x64xf32>
    %351 = vector.extract_strided_slice %345 {offsets = [0, 0], sizes = [8, 64], strides = [1, 1]} : vector<8x192xbf16> to vector<8x64xbf16>
    %352 = arith.mulf %351, %347 : vector<8x64xbf16>
    %353 = arith.extf %352 : vector<8x64xbf16> to vector<8x64xf32>
    %354 = arith.addf %350, %353 : vector<8x64xf32>
    %355 = vector.extract_strided_slice %345 {offsets = [0, 128], sizes = [8, 64], strides = [1, 1]} : vector<8x192xbf16> to vector<8x64xbf16>
    %356 = arith.truncf %354 : vector<8x64xf32> to vector<8x64xbf16>
    %357 = math.tanh %356 : vector<8x64xbf16>
    %358 = arith.mulf %355, %357 : vector<8x64xbf16>
    %c2_i32_114 = arith.constant 2 : i32
    %359 = arith.index_cast %c2_i32_114 : i32 to index
    %c0_115 = arith.constant 0 : index
    %c0_116 = arith.constant 0 : index
    %360 = vector.load %arg16[%359, %c0_115, %c0_116] : memref<8x8x256xf32, #tpu.memory_space<vmem>>, vector<1x8x256xf32>
    %361 = vector.shape_cast %360 : vector<1x8x256xf32> to vector<8x256xf32>
    %cst_117 = arith.constant dense<0.000000e+00> : vector<8x256xf32>
    %362 = tpu.matmul %358, %308, %cst_117 {dimension_numbers = #tpu.dot_dimension_numbers<[1], [0], [0], [1], [0, 0, 1, 1], [], []>} : vector<8x64xbf16>, vector<64x256xbf16>, vector<8x256xf32> -> vector<8x256xf32>
    %363 = arith.addf %361, %362 : vector<8x256xf32>
    %364 = arith.truncf %363 : vector<8x256xf32> to vector<8x256xbf16>
    %365 = vector.extract_strided_slice %364 {offsets = [0, 0], sizes = [8, 192], strides = [1, 1]} : vector<8x256xbf16> to vector<8x192xbf16>
    %366 = arith.negf %365 : vector<8x192xbf16>
    %367 = math.exp %366 : vector<8x192xbf16>
    %cst_118 = arith.constant 1.000000e+00 : bf16
    %368 = vector.broadcast %cst_118 : bf16 to vector<8x192xbf16>
    %369 = arith.addf %368, %367 : vector<8x192xbf16>
    %370 = arith.divf %368, %369 : vector<8x192xbf16>
    %371 = vector.extract_strided_slice %364 {offsets = [0, 192], sizes = [8, 64], strides = [1, 1]} : vector<8x256xbf16> to vector<8x64xbf16>
    %372 = math.tanh %371 : vector<8x64xbf16>
    %373 = vector.extract_strided_slice %370 {offsets = [0, 64], sizes = [8, 64], strides = [1, 1]} : vector<8x192xbf16> to vector<8x64xbf16>
    %374 = arith.extf %373 : vector<8x64xbf16> to vector<8x64xf32>
    %375 = arith.mulf %374, %354 : vector<8x64xf32>
    %376 = vector.extract_strided_slice %370 {offsets = [0, 0], sizes = [8, 64], strides = [1, 1]} : vector<8x192xbf16> to vector<8x64xbf16>
    %377 = arith.mulf %376, %372 : vector<8x64xbf16>
    %378 = arith.extf %377 : vector<8x64xbf16> to vector<8x64xf32>
    %379 = arith.addf %375, %378 : vector<8x64xf32>
    %380 = vector.extract_strided_slice %370 {offsets = [0, 128], sizes = [8, 64], strides = [1, 1]} : vector<8x192xbf16> to vector<8x64xbf16>
    %381 = arith.truncf %379 : vector<8x64xf32> to vector<8x64xbf16>
    %382 = math.tanh %381 : vector<8x64xbf16>
    %383 = arith.mulf %380, %382 : vector<8x64xbf16>
    %c3_i32_119 = arith.constant 3 : i32
    %384 = arith.index_cast %c3_i32_119 : i32 to index
    %c0_120 = arith.constant 0 : index
    %c0_121 = arith.constant 0 : index
    %385 = vector.load %arg16[%384, %c0_120, %c0_121] : memref<8x8x256xf32, #tpu.memory_space<vmem>>, vector<1x8x256xf32>
    %386 = vector.shape_cast %385 : vector<1x8x256xf32> to vector<8x256xf32>
    %cst_122 = arith.constant dense<0.000000e+00> : vector<8x256xf32>
    %387 = tpu.matmul %383, %308, %cst_122 {dimension_numbers = #tpu.dot_dimension_numbers<[1], [0], [0], [1], [0, 0, 1, 1], [], []>} : vector<8x64xbf16>, vector<64x256xbf16>, vector<8x256xf32> -> vector<8x256xf32>
    %388 = arith.addf %386, %387 : vector<8x256xf32>
    %389 = arith.truncf %388 : vector<8x256xf32> to vector<8x256xbf16>
    %390 = vector.extract_strided_slice %389 {offsets = [0, 0], sizes = [8, 192], strides = [1, 1]} : vector<8x256xbf16> to vector<8x192xbf16>
    %391 = arith.negf %390 : vector<8x192xbf16>
    %392 = math.exp %391 : vector<8x192xbf16>
    %cst_123 = arith.constant 1.000000e+00 : bf16
    %393 = vector.broadcast %cst_123 : bf16 to vector<8x192xbf16>
    %394 = arith.addf %393, %392 : vector<8x192xbf16>
    %395 = arith.divf %393, %394 : vector<8x192xbf16>
    %396 = vector.extract_strided_slice %389 {offsets = [0, 192], sizes = [8, 64], strides = [1, 1]} : vector<8x256xbf16> to vector<8x64xbf16>
    %397 = math.tanh %396 : vector<8x64xbf16>
    %398 = vector.extract_strided_slice %395 {offsets = [0, 64], sizes = [8, 64], strides = [1, 1]} : vector<8x192xbf16> to vector<8x64xbf16>
    %399 = arith.extf %398 : vector<8x64xbf16> to vector<8x64xf32>
    %400 = arith.mulf %399, %379 : vector<8x64xf32>
    %401 = vector.extract_strided_slice %395 {offsets = [0, 0], sizes = [8, 64], strides = [1, 1]} : vector<8x192xbf16> to vector<8x64xbf16>
    %402 = arith.mulf %401, %397 : vector<8x64xbf16>
    %403 = arith.extf %402 : vector<8x64xbf16> to vector<8x64xf32>
    %404 = arith.addf %400, %403 : vector<8x64xf32>
    %405 = vector.extract_strided_slice %395 {offsets = [0, 128], sizes = [8, 64], strides = [1, 1]} : vector<8x192xbf16> to vector<8x64xbf16>
    %406 = arith.truncf %404 : vector<8x64xf32> to vector<8x64xbf16>
    %407 = math.tanh %406 : vector<8x64xbf16>
    %408 = arith.mulf %405, %407 : vector<8x64xbf16>
    %c4_i32_124 = arith.constant 4 : i32
    %409 = arith.index_cast %c4_i32_124 : i32 to index
    %c0_125 = arith.constant 0 : index
    %c0_126 = arith.constant 0 : index
    %410 = vector.load %arg16[%409, %c0_125, %c0_126] : memref<8x8x256xf32, #tpu.memory_space<vmem>>, vector<1x8x256xf32>
    %411 = vector.shape_cast %410 : vector<1x8x256xf32> to vector<8x256xf32>
    %cst_127 = arith.constant dense<0.000000e+00> : vector<8x256xf32>
    %412 = tpu.matmul %408, %308, %cst_127 {dimension_numbers = #tpu.dot_dimension_numbers<[1], [0], [0], [1], [0, 0, 1, 1], [], []>} : vector<8x64xbf16>, vector<64x256xbf16>, vector<8x256xf32> -> vector<8x256xf32>
    %413 = arith.addf %411, %412 : vector<8x256xf32>
    %414 = arith.truncf %413 : vector<8x256xf32> to vector<8x256xbf16>
    %415 = vector.extract_strided_slice %414 {offsets = [0, 0], sizes = [8, 192], strides = [1, 1]} : vector<8x256xbf16> to vector<8x192xbf16>
    %416 = arith.negf %415 : vector<8x192xbf16>
    %417 = math.exp %416 : vector<8x192xbf16>
    %cst_128 = arith.constant 1.000000e+00 : bf16
    %418 = vector.broadcast %cst_128 : bf16 to vector<8x192xbf16>
    %419 = arith.addf %418, %417 : vector<8x192xbf16>
    %420 = arith.divf %418, %419 : vector<8x192xbf16>
    %421 = vector.extract_strided_slice %414 {offsets = [0, 192], sizes = [8, 64], strides = [1, 1]} : vector<8x256xbf16> to vector<8x64xbf16>
    %422 = math.tanh %421 : vector<8x64xbf16>
    %423 = vector.extract_strided_slice %420 {offsets = [0, 64], sizes = [8, 64], strides = [1, 1]} : vector<8x192xbf16> to vector<8x64xbf16>
    %424 = arith.extf %423 : vector<8x64xbf16> to vector<8x64xf32>
    %425 = arith.mulf %424, %404 : vector<8x64xf32>
    %426 = vector.extract_strided_slice %420 {offsets = [0, 0], sizes = [8, 64], strides = [1, 1]} : vector<8x192xbf16> to vector<8x64xbf16>
    %427 = arith.mulf %426, %422 : vector<8x64xbf16>
    %428 = arith.extf %427 : vector<8x64xbf16> to vector<8x64xf32>
    %429 = arith.addf %425, %428 : vector<8x64xf32>
    %430 = vector.extract_strided_slice %420 {offsets = [0, 128], sizes = [8, 64], strides = [1, 1]} : vector<8x192xbf16> to vector<8x64xbf16>
    %431 = arith.truncf %429 : vector<8x64xf32> to vector<8x64xbf16>
    %432 = math.tanh %431 : vector<8x64xbf16>
    %433 = arith.mulf %430, %432 : vector<8x64xbf16>
    %c5_i32_129 = arith.constant 5 : i32
    %434 = arith.index_cast %c5_i32_129 : i32 to index
    %c0_130 = arith.constant 0 : index
    %c0_131 = arith.constant 0 : index
    %435 = vector.load %arg16[%434, %c0_130, %c0_131] : memref<8x8x256xf32, #tpu.memory_space<vmem>>, vector<1x8x256xf32>
    %436 = vector.shape_cast %435 : vector<1x8x256xf32> to vector<8x256xf32>
    %cst_132 = arith.constant dense<0.000000e+00> : vector<8x256xf32>
    %437 = tpu.matmul %433, %308, %cst_132 {dimension_numbers = #tpu.dot_dimension_numbers<[1], [0], [0], [1], [0, 0, 1, 1], [], []>} : vector<8x64xbf16>, vector<64x256xbf16>, vector<8x256xf32> -> vector<8x256xf32>
    %438 = arith.addf %436, %437 : vector<8x256xf32>
    %439 = arith.truncf %438 : vector<8x256xf32> to vector<8x256xbf16>
    %440 = vector.extract_strided_slice %439 {offsets = [0, 0], sizes = [8, 192], strides = [1, 1]} : vector<8x256xbf16> to vector<8x192xbf16>
    %441 = arith.negf %440 : vector<8x192xbf16>
    %442 = math.exp %441 : vector<8x192xbf16>
    %cst_133 = arith.constant 1.000000e+00 : bf16
    %443 = vector.broadcast %cst_133 : bf16 to vector<8x192xbf16>
    %444 = arith.addf %443, %442 : vector<8x192xbf16>
    %445 = arith.divf %443, %444 : vector<8x192xbf16>
    %446 = vector.extract_strided_slice %439 {offsets = [0, 192], sizes = [8, 64], strides = [1, 1]} : vector<8x256xbf16> to vector<8x64xbf16>
    %447 = math.tanh %446 : vector<8x64xbf16>
    %448 = vector.extract_strided_slice %445 {offsets = [0, 64], sizes = [8, 64], strides = [1, 1]} : vector<8x192xbf16> to vector<8x64xbf16>
    %449 = arith.extf %448 : vector<8x64xbf16> to vector<8x64xf32>
    %450 = arith.mulf %449, %429 : vector<8x64xf32>
    %451 = vector.extract_strided_slice %445 {offsets = [0, 0], sizes = [8, 64], strides = [1, 1]} : vector<8x192xbf16> to vector<8x64xbf16>
    %452 = arith.mulf %451, %447 : vector<8x64xbf16>
    %453 = arith.extf %452 : vector<8x64xbf16> to vector<8x64xf32>
    %454 = arith.addf %450, %453 : vector<8x64xf32>
    %455 = vector.extract_strided_slice %445 {offsets = [0, 128], sizes = [8, 64], strides = [1, 1]} : vector<8x192xbf16> to vector<8x64xbf16>
    %456 = arith.truncf %454 : vector<8x64xf32> to vector<8x64xbf16>
    %457 = math.tanh %456 : vector<8x64xbf16>
    %458 = arith.mulf %455, %457 : vector<8x64xbf16>
    %c6_i32_134 = arith.constant 6 : i32
    %459 = arith.index_cast %c6_i32_134 : i32 to index
    %c0_135 = arith.constant 0 : index
    %c0_136 = arith.constant 0 : index
    %460 = vector.load %arg16[%459, %c0_135, %c0_136] : memref<8x8x256xf32, #tpu.memory_space<vmem>>, vector<1x8x256xf32>
    %461 = vector.shape_cast %460 : vector<1x8x256xf32> to vector<8x256xf32>
    %cst_137 = arith.constant dense<0.000000e+00> : vector<8x256xf32>
    %462 = tpu.matmul %458, %308, %cst_137 {dimension_numbers = #tpu.dot_dimension_numbers<[1], [0], [0], [1], [0, 0, 1, 1], [], []>} : vector<8x64xbf16>, vector<64x256xbf16>, vector<8x256xf32> -> vector<8x256xf32>
    %463 = arith.addf %461, %462 : vector<8x256xf32>
    %464 = arith.truncf %463 : vector<8x256xf32> to vector<8x256xbf16>
    %465 = vector.extract_strided_slice %464 {offsets = [0, 0], sizes = [8, 192], strides = [1, 1]} : vector<8x256xbf16> to vector<8x192xbf16>
    %466 = arith.negf %465 : vector<8x192xbf16>
    %467 = math.exp %466 : vector<8x192xbf16>
    %cst_138 = arith.constant 1.000000e+00 : bf16
    %468 = vector.broadcast %cst_138 : bf16 to vector<8x192xbf16>
    %469 = arith.addf %468, %467 : vector<8x192xbf16>
    %470 = arith.divf %468, %469 : vector<8x192xbf16>
    %471 = vector.extract_strided_slice %464 {offsets = [0, 192], sizes = [8, 64], strides = [1, 1]} : vector<8x256xbf16> to vector<8x64xbf16>
    %472 = math.tanh %471 : vector<8x64xbf16>
    %473 = vector.extract_strided_slice %470 {offsets = [0, 64], sizes = [8, 64], strides = [1, 1]} : vector<8x192xbf16> to vector<8x64xbf16>
    %474 = arith.extf %473 : vector<8x64xbf16> to vector<8x64xf32>
    %475 = arith.mulf %474, %454 : vector<8x64xf32>
    %476 = vector.extract_strided_slice %470 {offsets = [0, 0], sizes = [8, 64], strides = [1, 1]} : vector<8x192xbf16> to vector<8x64xbf16>
    %477 = arith.mulf %476, %472 : vector<8x64xbf16>
    %478 = arith.extf %477 : vector<8x64xbf16> to vector<8x64xf32>
    %479 = arith.addf %475, %478 : vector<8x64xf32>
    %480 = vector.extract_strided_slice %470 {offsets = [0, 128], sizes = [8, 64], strides = [1, 1]} : vector<8x192xbf16> to vector<8x64xbf16>
    %481 = arith.truncf %479 : vector<8x64xf32> to vector<8x64xbf16>
    %482 = math.tanh %481 : vector<8x64xbf16>
    %483 = arith.mulf %480, %482 : vector<8x64xbf16>
    %c7_i32_139 = arith.constant 7 : i32
    %484 = arith.index_cast %c7_i32_139 : i32 to index
    %c0_140 = arith.constant 0 : index
    %c0_141 = arith.constant 0 : index
    %485 = vector.load %arg16[%484, %c0_140, %c0_141] : memref<8x8x256xf32, #tpu.memory_space<vmem>>, vector<1x8x256xf32>
    %486 = vector.shape_cast %485 : vector<1x8x256xf32> to vector<8x256xf32>
    %cst_142 = arith.constant dense<0.000000e+00> : vector<8x256xf32>
    %487 = tpu.matmul %483, %308, %cst_142 {dimension_numbers = #tpu.dot_dimension_numbers<[1], [0], [0], [1], [0, 0, 1, 1], [], []>} : vector<8x64xbf16>, vector<64x256xbf16>, vector<8x256xf32> -> vector<8x256xf32>
    %488 = arith.addf %486, %487 : vector<8x256xf32>
    %489 = arith.truncf %488 : vector<8x256xf32> to vector<8x256xbf16>
    %490 = vector.extract_strided_slice %489 {offsets = [0, 0], sizes = [8, 192], strides = [1, 1]} : vector<8x256xbf16> to vector<8x192xbf16>
    %491 = arith.negf %490 : vector<8x192xbf16>
    %492 = math.exp %491 : vector<8x192xbf16>
    %cst_143 = arith.constant 1.000000e+00 : bf16
    %493 = vector.broadcast %cst_143 : bf16 to vector<8x192xbf16>
    %494 = arith.addf %493, %492 : vector<8x192xbf16>
    %495 = arith.divf %493, %494 : vector<8x192xbf16>
    %496 = vector.extract_strided_slice %489 {offsets = [0, 192], sizes = [8, 64], strides = [1, 1]} : vector<8x256xbf16> to vector<8x64xbf16>
    %497 = math.tanh %496 : vector<8x64xbf16>
    %498 = vector.extract_strided_slice %495 {offsets = [0, 64], sizes = [8, 64], strides = [1, 1]} : vector<8x192xbf16> to vector<8x64xbf16>
    %499 = arith.extf %498 : vector<8x64xbf16> to vector<8x64xf32>
    %500 = arith.mulf %499, %479 : vector<8x64xf32>
    %501 = vector.extract_strided_slice %495 {offsets = [0, 0], sizes = [8, 64], strides = [1, 1]} : vector<8x192xbf16> to vector<8x64xbf16>
    %502 = arith.mulf %501, %497 : vector<8x64xbf16>
    %503 = arith.extf %502 : vector<8x64xbf16> to vector<8x64xf32>
    %504 = arith.addf %500, %503 : vector<8x64xf32>
    %505 = vector.extract_strided_slice %495 {offsets = [0, 128], sizes = [8, 64], strides = [1, 1]} : vector<8x192xbf16> to vector<8x64xbf16>
    %506 = arith.truncf %504 : vector<8x64xf32> to vector<8x64xbf16>
    %507 = math.tanh %506 : vector<8x64xbf16>
    %508 = arith.mulf %505, %507 : vector<8x64xbf16>
    %c8_i32_144 = arith.constant 8 : i32
    %509 = arith.extf %508 : vector<8x64xbf16> to vector<8x64xf32>
    %c0_145 = arith.constant 0 : index
    %c0_146 = arith.constant 0 : index
    %510 = vector.load %arg9[%c0_145, %c0_146] : memref<64x80xf32, #tpu.memory_space<vmem>>, vector<64x80xf32>
    %cst_147 = arith.constant dense<0.000000e+00> : vector<8x80xf32>
    %511 = tpu.matmul %509, %510, %cst_147 {dimension_numbers = #tpu.dot_dimension_numbers<[1], [0], [0], [1], [0, 0, 1, 1], [], []>} : vector<8x64xf32>, vector<64x80xf32>, vector<8x80xf32> -> vector<8x80xf32>
    %c0_148 = arith.constant 0 : index
    %c0_149 = arith.constant 0 : index
    %512 = vector.load %arg10[%c0_148, %c0_149] : memref<1x80xf32, #tpu.memory_space<vmem>>, vector<1x80xf32>
    %513 = vector.broadcast %512 : vector<1x80xf32> to vector<8x80xf32>
    %514 = arith.addf %511, %513 : vector<8x80xf32>
    %cst_150 = arith.constant 0.000000e+00 : f32
    %515 = vector.broadcast %cst_150 : f32 to vector<8x80xf32>
    %516 = arith.maximumf %514, %515 : vector<8x80xf32>
    %c0_151 = arith.constant 0 : index
    %c0_152 = arith.constant 0 : index
    %517 = vector.load %arg11[%c0_151, %c0_152] : memref<80x100xf32, #tpu.memory_space<vmem>>, vector<80x100xf32>
    %cst_153 = arith.constant dense<0.000000e+00> : vector<8x100xf32>
    %518 = tpu.matmul %516, %517, %cst_153 {dimension_numbers = #tpu.dot_dimension_numbers<[1], [0], [0], [1], [0, 0, 1, 1], [], []>} : vector<8x80xf32>, vector<80x100xf32>, vector<8x100xf32> -> vector<8x100xf32>
    %c0_154 = arith.constant 0 : index
    %c0_155 = arith.constant 0 : index
    %519 = vector.load %arg12[%c0_154, %c0_155] : memref<1x100xf32, #tpu.memory_space<vmem>>, vector<1x100xf32>
    %520 = vector.broadcast %519 : vector<1x100xf32> to vector<8x100xf32>
    %521 = arith.addf %518, %520 : vector<8x100xf32>
    %cst_156 = arith.constant 0.000000e+00 : f32
    %522 = vector.broadcast %cst_156 : f32 to vector<8x100xf32>
    %523 = arith.maximumf %521, %522 : vector<8x100xf32>
    %c0_157 = arith.constant 0 : index
    %c0_158 = arith.constant 0 : index
    %524 = vector.load %arg13[%c0_157, %c0_158] : memref<100x2xf32, #tpu.memory_space<vmem>>, vector<100x2xf32>
    %cst_159 = arith.constant dense<0.000000e+00> : vector<8x2xf32>
    %525 = tpu.matmul %523, %524, %cst_159 {dimension_numbers = #tpu.dot_dimension_numbers<[1], [0], [0], [1], [0, 0, 1, 1], [], []>} : vector<8x100xf32>, vector<100x2xf32>, vector<8x2xf32> -> vector<8x2xf32>
    %c0_160 = arith.constant 0 : index
    %c0_161 = arith.constant 0 : index
    %526 = vector.load %arg14[%c0_160, %c0_161] : memref<1x2xf32, #tpu.memory_space<vmem>>, vector<1x2xf32>
    %527 = vector.broadcast %526 : vector<1x2xf32> to vector<8x2xf32>
    %528 = arith.addf %525, %527 : vector<8x2xf32>
    %529 = arith.negf %528 : vector<8x2xf32>
    %530 = math.exp %529 : vector<8x2xf32>
    %cst_162 = arith.constant 1.000000e+00 : f32
    %531 = vector.broadcast %cst_162 : f32 to vector<8x2xf32>
    %532 = arith.addf %531, %530 : vector<8x2xf32>
    %533 = arith.divf %531, %532 : vector<8x2xf32>
    %c0_163 = arith.constant 0 : index
    %c0_164 = arith.constant 0 : index
    %534 = vector.load %arg15[%c0_163, %c0_164] : memref<8x2xf32, #tpu.memory_space<vmem>>, vector<8x2xf32>
    tpu.vector_store %arg15[%c0_163, %c0_164], %533 {strides = array<i32>} : memref<8x2xf32, #tpu.memory_space<vmem>>, vector<8x2xf32>,
    return
  }
  func.func @transform_0(%arg0: i32) -> (i32, i32, i32) {
    %c0_i32 = arith.constant 0 : i32
    %c0_i32_0 = arith.constant 0 : i32
    %c0_i32_1 = arith.constant 0 : i32
    return %c0_i32, %arg0, %c0_i32_0 : i32, i32, i32
  }
  func.func @transform_1(%arg0: i32) -> (i32, i32, i32) {
    %c0_i32 = arith.constant 0 : i32
    %c0_i32_0 = arith.constant 0 : i32
    %c0_i32_1 = arith.constant 0 : i32
    %c0_i32_2 = arith.constant 0 : i32
    return %c0_i32, %c0_i32_0, %c0_i32_1 : i32, i32, i32
  }
  func.func @transform_2(%arg0: i32) -> (i32, i32, i32) {
    %c0_i32 = arith.constant 0 : i32
    %c0_i32_0 = arith.constant 0 : i32
    %c0_i32_1 = arith.constant 0 : i32
    %c0_i32_2 = arith.constant 0 : i32
    return %c0_i32, %c0_i32_0, %c0_i32_1 : i32, i32, i32
  }
  func.func @transform_3(%arg0: i32) -> (i32, i32, i32) {
    %c0_i32 = arith.constant 0 : i32
    %c0_i32_0 = arith.constant 0 : i32
    %c0_i32_1 = arith.constant 0 : i32
    %c0_i32_2 = arith.constant 0 : i32
    return %c0_i32, %c0_i32_0, %c0_i32_1 : i32, i32, i32
  }
  func.func @transform_4(%arg0: i32) -> (i32, i32) {
    %c0_i32 = arith.constant 0 : i32
    %c0_i32_0 = arith.constant 0 : i32
    %c0_i32_1 = arith.constant 0 : i32
    return %c0_i32, %c0_i32_0 : i32, i32
  }
  func.func @transform_5(%arg0: i32) -> (i32, i32) {
    %c0_i32 = arith.constant 0 : i32
    %c0_i32_0 = arith.constant 0 : i32
    %c0_i32_1 = arith.constant 0 : i32
    return %c0_i32, %c0_i32_0 : i32, i32
  }
  func.func @transform_6(%arg0: i32) -> (i32, i32, i32) {
    %c0_i32 = arith.constant 0 : i32
    %c0_i32_0 = arith.constant 0 : i32
    %c0_i32_1 = arith.constant 0 : i32
    %c0_i32_2 = arith.constant 0 : i32
    return %c0_i32, %c0_i32_0, %c0_i32_1 : i32, i32, i32
  }
  func.func @transform_7(%arg0: i32) -> (i32, i32) {
    %c0_i32 = arith.constant 0 : i32
    %c0_i32_0 = arith.constant 0 : i32
    %c0_i32_1 = arith.constant 0 : i32
    return %c0_i32, %c0_i32_0 : i32, i32
  }
  func.func @transform_8(%arg0: i32) -> (i32, i32) {
    %c0_i32 = arith.constant 0 : i32
    %c0_i32_0 = arith.constant 0 : i32
    %c0_i32_1 = arith.constant 0 : i32
    return %c0_i32, %c0_i32_0 : i32, i32
  }
  func.func @transform_9(%arg0: i32) -> (i32, i32) {
    %c0_i32 = arith.constant 0 : i32
    %c0_i32_0 = arith.constant 0 : i32
    %c0_i32_1 = arith.constant 0 : i32
    return %c0_i32, %c0_i32_0 : i32, i32
  }
  func.func @transform_10(%arg0: i32) -> (i32, i32) {
    %c0_i32 = arith.constant 0 : i32
    %c0_i32_0 = arith.constant 0 : i32
    %c0_i32_1 = arith.constant 0 : i32
    return %c0_i32, %c0_i32_0 : i32, i32
  }
  func.func @transform_11(%arg0: i32) -> (i32, i32) {
    %c0_i32 = arith.constant 0 : i32
    %c0_i32_0 = arith.constant 0 : i32
    %c0_i32_1 = arith.constant 0 : i32
    return %c0_i32, %c0_i32_0 : i32, i32
  }
  func.func @transform_12(%arg0: i32) -> (i32, i32) {
    %c0_i32 = arith.constant 0 : i32
    %c0_i32_0 = arith.constant 0 : i32
    %c0_i32_1 = arith.constant 0 : i32
    return %c0_i32, %c0_i32_0 : i32, i32
  }
  func.func @transform_13(%arg0: i32) -> (i32, i32) {
    %c0_i32 = arith.constant 0 : i32
    %c0_i32_0 = arith.constant 0 : i32
    %c0_i32_1 = arith.constant 0 : i32
    return %c0_i32, %c0_i32_0 : i32, i32
  }
  func.func @transform_14(%arg0: i32) -> (i32, i32) {
    %c0_i32 = arith.constant 0 : i32
    %c0_i32_0 = arith.constant 0 : i32
    return %arg0, %c0_i32 : i32, i32
  }
}

</mosaic_0001>

<bundles_post_ra>
// kernel: tpu_custom_call.1
= control target key start
LH: loop header
LB: loop body
LE: loop exit
PB: predicated region body
PF: predicated region fallthrough
CT: control target
= control target key end

     0   :  { %19 = vsyncpa [#allocation5], 0  ;;  %s3752_s0 = inlined_call_operand.vmem [shape: f32[8,8,2], index: 0, kind: input, shape index: {}]   ;;  %s3753_s1 = inlined_call_operand.vmem [shape: f32[1,1,256], index: 1, kind: input, shape index: {}]   ;;  %s3754_s2 = inlined_call_operand.hbm [shape: f32[1,1,256], index: 2, kind: input, shape index: {}]   ;;  %s3755_s3 = inlined_call_operand.hbm [shape: f32[1,1,256], index: 3, kind: input, shape index: {}]   ;;  %s3756_s4 = inlined_call_operand.vmem [shape: bf16[64,256], index: 4, kind: input, shape index: {}]   ;;  %s3757_s5 = inlined_call_operand.vmem [shape: bf16[128,256], index: 5, kind: input, shape index: {}]   ;;  %s3758_s6 = inlined_call_operand.hbm [shape: f32[1,1,256], index: 6, kind: input, shape index: {}]   ;;  %s3759_s7 = inlined_call_operand.hbm [shape: bf16[64,256], index: 7, kind: input, shape index: {}]   ;;  %s3760_s8 = inlined_call_operand.hbm [shape: f32[64,80], index: 8, kind: input, shape index: {}]   ;;  %s3761_s9 = inlined_call_operand.vmem [shape: f32[1,80], index: 9, kind: input, shape index: {}]   ;;  %s3762_s10 = inlined_call_operand.hbm [shape: f32[80,100], index: 10, kind: input, shape index: {}]   ;;  %s3763_s11 = inlined_call_operand.vmem [shape: f32[1,100], index: 11, kind: input, shape index: {}]   ;;  %s3764_s12 = inlined_call_operand.vmem [shape: f32[100,2], index: 12, kind: input, shape index: {}]   ;;  %s3765_s13 = inlined_call_operand.vmem [shape: f32[1,2], index: 13, kind: input, shape index: {}]   ;;  %s3766_s14 = inlined_call_operand.vmem [shape: f32[8,2], index: 14, kind: output, shape index: {}]  }
   0x1   :  { %20 = vsyncpa [#allocation7], 0 }
   0x2   :  { %21 = vsyncpa [#allocation10], 0 }
   0x3   :  { %22 = vsyncpa [#allocation13], 0  ;;  %s2973_s29 = smov [#allocation6]   ;;  %s2974_s15 = smov [#allocation9]  }
   0x4   :  { %s43_s30 = sshll.u32 %s2973_s29, 4  ;;  %s66_s16 = sshll.u32 %s2974_s15, 4  ;;  %s44_s30 = int_to_ptr.vmem [resolvable:$true] %s43_s30  ;;  %s67_s16 = int_to_ptr.vmem [resolvable:$true] %s66_s16 }
   0x5   :  { %s2853_s17 = scalar_lea.vmem %s44_s30, 32  ;;  %p2858_p1 = scmp.lt.s32.totalorder %s44_s30, %s44_s30 }
   0x6   :  { %p2854_p0 = scmp.ne.s32.totalorder %s44_s30, %s2853_s17  ;;  %p2859_p2 = scmp.lt.s32.totalorder %s2853_s17, %s2853_s17 }
   0x8   :  { %p2860_p3 = por %p2859_p2, %p2858_p1 }
   0xa   :  { %p2861_p4 = pnand %p2860_p3, %p2854_p0 }
   0xc   :  { %2864 = shalt.err (!%p2861_p4)
}
   0xd   :  { %46 = dma.hbm_to_vmem [thread:$0]  %s3755_s3, 32, %s44_s30, [#allocation7]  }
   0xe   :  { %s2873_s20 = scalar_lea.vmem %s67_s16, 1024  ;;  %p2878_p6 = scmp.lt.s32.totalorder %s67_s16, %s67_s16 }
   0xf   :  { %p2874_p5 = scmp.ne.s32.totalorder %s67_s16, %s2873_s20  ;;  %p2879_p7 = scmp.lt.s32.totalorder %s2873_s20, %s2873_s20 }
  0x11   :  { %p2880_p8 = por %p2879_p7, %p2878_p6 }
  0x13   :  { %p2881_p9 = pnand %p2880_p8, %p2874_p5 }
  0x15   :  { %2884 = shalt.err (!%p2881_p9)
}
  0x16   :  { %s2975_s21 = smov 128   ;;  %s2976_s22 = smov 8  }
  0x17   :  { %72 = dma.hbm_to_vmem [thread:$0]  %s3759_s7, 1024, %s67_s16, [#allocation10], %s2975_s21, %s2975_s21, %s2976_s22  }
  0x18   :  { %s2977_s25 = smov [#allocation4]   ;;  %s2978_s27 = smov [#allocation8]  }
  0x19   :  { %s33_s26 = sshll.u32 %s2977_s25, 4  ;;  %s57_s3 = sshll.u32 %s2978_s27, 4  ;;  %s34_s26 = int_to_ptr.vmem [resolvable:$true] %s33_s26  ;;  %s58_s3 = int_to_ptr.vmem [resolvable:$true] %s57_s3 }
  0x1a   :  { %s2893_s28 = scalar_lea.vmem %s34_s26, 32  ;;  %p2898_p11 = scmp.lt.s32.totalorder %s34_s26, %s34_s26 }
  0x1b   :  { %p2894_p10 = scmp.ne.s32.totalorder %s34_s26, %s2893_s28  ;;  %p2899_p12 = scmp.lt.s32.totalorder %s2893_s28, %s2893_s28 }
  0x1d   :  { %p2900_p13 = por %p2899_p12, %p2898_p11 }
  0x1f   :  { %p2901_p0 = pnand %p2900_p13, %p2894_p10 }
  0x21   :  { %2904 = shalt.err (!%p2901_p0)
}
  0x22   :  { %36 = dma.hbm_to_vmem [thread:$0]  %s3754_s2, 32, %s34_s26, [#allocation5]  }
  0x23   :  { %s2913_s15 = scalar_lea.vmem %s58_s3, 32  ;;  %p2918_p2 = scmp.lt.s32.totalorder %s58_s3, %s58_s3 }
  0x24   :  { %p2914_p1 = scmp.ne.s32.totalorder %s58_s3, %s2913_s15  ;;  %p2919_p3 = scmp.lt.s32.totalorder %s2913_s15, %s2913_s15 }
  0x26   :  { %p2920_p4 = por %p2919_p3, %p2918_p2 }
  0x28   :  { %p2921_p5 = pnand %p2920_p4, %p2914_p1 }
  0x2a   :  { %2924 = shalt.err (!%p2921_p5)
}
  0x2b   :  { %60 = dma.hbm_to_vmem [thread:$0]  %s3758_s6, 32, %s58_s3, [#allocation7]  }
  0x2c   :  { %s2979_s17 = smov [#allocation11]   ;;  %s2980_s19 = smov [#allocation12]  }
  0x2d   :  { %s78_s18 = sshll.u32 %s2979_s17, 4  ;;  %s92_s20 = sshll.u32 %s2980_s19, 4  ;;  %s79_s18 = int_to_ptr.vmem [resolvable:$true] %s78_s18  ;;  %s93_s20 = int_to_ptr.vmem [resolvable:$true] %s92_s20 }
  0x2e   :  { %s2933_s23 = scalar_lea.vmem %s79_s18, 1024  ;;  %p2938_p7 = scmp.lt.s32.totalorder %s79_s18, %s79_s18 }
  0x2f   :  { %p2934_p6 = scmp.ne.s32.totalorder %s79_s18, %s2933_s23  ;;  %p2939_p8 = scmp.lt.s32.totalorder %s2933_s23, %s2933_s23 }
  0x31   :  { %p2940_p9 = por %p2939_p8, %p2938_p7 }
  0x33   :  { %p2941_p10 = pnand %p2940_p9, %p2934_p6 }
  0x35   :  { %2944 = shalt.err (!%p2941_p10)
}
  0x36   :  { %84 = dma.hbm_to_vmem [thread:$0]  %s3760_s8, 1024, %s79_s18, [#allocation10], %s2975_s21, %s2975_s21, %s2976_s22  }
  0x37   :  { %s2953_s6 = scalar_lea.vmem %s93_s20, 1280  ;;  %p2958_p12 = scmp.lt.s32.totalorder %s93_s20, %s93_s20 }
  0x38   :  { %p2954_p11 = scmp.ne.s32.totalorder %s93_s20, %s2953_s6  ;;  %p2959_p13 = scmp.lt.s32.totalorder %s2953_s6, %s2953_s6 }
  0x3a   :  { %p2960_p0 = por %p2959_p13, %p2958_p12 }
  0x3c   :  { %p2961_p1 = pnand %p2960_p0, %p2954_p11 }
  0x3e   :  { %2964 = shalt.err (!%p2961_p1)
}
  0x3f   :  { %98 = dma.hbm_to_vmem [thread:$0]  %s3762_s10, 1280, %s93_s20, [#allocation13], %s2975_s21, %s2975_s21, %s2976_s22  }
  0x40   :  { %2965 = dma.done.wait [#allocation5], 32  }
  0x41   :  { %2966 = vsyncadd [#allocation5], 4294967264 }
  0x42   :  { %2967 = dma.done.wait [#allocation7], 64  }
  0x43   :  { %2968 = vsyncadd [#allocation7], 4294967232 }
  0x44   :  { %2969 = dma.done.wait [#allocation10], 2048  }
  0x45   :  { %2970 = vsyncadd [#allocation10], 4294965248 }
  0x46   :  { %2971 = dma.done.wait [#allocation13], 1280  }
  0x47   :  { %2972 = vsyncadd [#allocation13], 4294966016  ;;  %v2981_v0 = vmov 0   ;;  %v2982_v1 = vmov 1   ;;  %v3095_v2 = vld [vmem:[%s3756_s4 + $0x34] ss:$8 sps:$4 sm:$0xff]   ;;  %v175_v11 = vlaneseq }
  0x48   :  { %407 = vmatprep.mubr.bf16.mxu0 %v2981_v0  ;;  %2571 = vset.pattern.permute.xlu0 %v2981_v0  ;;  %v3100_v3 = vld [vmem:[%s3756_s4 + $0x30] ss:$8 sps:$4 sm:$0xff]   ;;  %v3106_v4 = vld [vmem:[%s3756_s4 + $0x24] ss:$8 sps:$4 sm:$0xff]   ;;  %v3113_v5 = vld [vmem:[%s3756_s4 + $0x20] ss:$8 sps:$4 sm:$0xff]  }
  0x49   :  { %502 = vmatprep.mubr.bf16.mxu1 %v2981_v0  ;;  %2574 = vset.pattern.permute.xlu1 %v2982_v1  ;;  %v3120_v6 = vld [vmem:[%s3756_s4 + $0x14] ss:$8 sps:$4 sm:$0xff]   ;;  %v3126_v7 = vld [vmem:[%s3756_s4 + $0x10] ss:$8 sps:$4 sm:$0xff]   ;;  %v125_v8 = vld [vmem:[%s3752_s0] sm:$0xff]  ;;  %v176_v12 = vshrl.u32 %v175_v11, 7 }
  0x4a   :  { %383 = vmatprep.subr.bf16.mxu0 %v3095_v2  ;;  %478 = vmatprep.subr.bf16.mxu1 %v3095_v2  ;;  %v3134_v9 = vld [vmem:[%s3756_s4 + $0x4] ss:$8 sps:$4 sm:$0xff]   ;;  %v3143_v10 = vld [vmem:[%s3756_s4] ss:$8 sps:$4 sm:$0xff]   ;;  %vm371_vm0 = vcmask 523264   ;;  %vm462_vm1 = vcmask 1048064  }
  0x4b   :  { %384 = vmatpush1.bf16.msra.mxu0 %v3100_v3  ;;  %479 = vmatpush1.bf16.msra.mxu1 %v3100_v3  ;;  %v3165_v14 = vsub.s32 0, %v176_v12  ;;  %v133_v15 = vld [vmem:[%s3753_s1] sm:$0x3]  ;;  %v3170_v17 = vsub.s32 1, %v176_v12  ;;  %v277_v25 = vld [vmem:[#allocation6] sm:$0x3] }
  0x4c   :  { %385 = vmatprep.subr.bf16.mxu0 %v3106_v4  ;;  %480 = vmatprep.subr.bf16.mxu1 %v3106_v4  ;;  %v201_v16 = vld [vmem:[#allocation4] sm:$0x3]  ;;  %s2983_s1 = smov 64   ;;  %v126_v56 = vld [vmem:[%s3752_s0 + $0x8] sm:$0xff]  ;;  %vm2985_vm2 = vmmov 0   ;;  %vm2277_vm3 = vcmask 1043456  }
  0x4d   :  { %136 = vperm.xlu0 %2571, %v125_v8   ;;  %v3173_v18 = vrot.slane %v133_v15, %v3165_v14  ;;  %v3176_v19 = vrot.slane %v201_v16, %v3165_v14  ;;  %v3179_v21 = vrot.slane %v133_v15, %v3170_v17  ;;  %v3182_v22 = vrot.slane %v201_v16, %v3170_v17 }
  0x4e   :  { %v3189_v29 = vrot.slane %v277_v25, %v3165_v14  ;;  %v3192_v31 = vrot.slane %v277_v25, %v3170_v17  ;;  %vm2178_vm4 = vcmask 654336   ;;  %vm2273_vm5 = vcmask 818176  }
  0x4f   :  { %386 = vmatpush1.bf16.msra.mxu0 %v3113_v5  ;;  %481 = vmatpush1.bf16.msra.mxu1 %v3113_v5  ;;  %vm2357_vm6 = vcmask 15360  }
  0x50   :  { %387 = vmatprep.subr.bf16.mxu0 %v3120_v6  ;;  %482 = vmatprep.subr.bf16.mxu1 %v3120_v6 }
  0x51   :  { %2572 = vset.pattern.permute.xlu0 %v2982_v1 }
  0x52   :  { %203 = vperm.xlu0 %2572, %v125_v8  }
  0x53   :  { %388 = vmatpush1.bf16.msra.mxu0 %v3126_v7  ;;  %483 = vmatpush1.bf16.msra.mxu1 %v3126_v7 }
  0x54   :  { %389 = vmatprep.subr.bf16.mxu0 %v3134_v9  ;;  %484 = vmatprep.subr.bf16.mxu1 %v3134_v9 }
  0x56   :  { %2573 = vset.pattern.permute.xlu0 %v2981_v0 }
  0x57   :  { %390 = vmatpush1.bf16.msra.mxu0 %v3143_v10  ;;  %485 = vmatpush1.bf16.msra.mxu1 %v3143_v10 }
  0x58   :  { %573 = vmatprep.subr.bf16.mxu0 %v3095_v2  ;;  %668 = vmatprep.subr.bf16.mxu1 %v3095_v2 }
  0x59   :  { %141 = vperm.xlu0 %2573, %v126_v56  }
  0x5a   :  { %408 = vmatmul.mubr.bf16.vlgmr.msra.gmra.mxu0 %v2981_v0 }
  0x5b   :  { %574 = vmatpush1.bf16.msra.mxu0 %v3100_v3  ;;  %597 = vmatprep.mubr.bf16.mxu0 %v2981_v0 }
  0x5c   :  { %575 = vmatprep.subr.bf16.mxu0 %v3106_v4 }
  0x5f   :  { %576 = vmatpush1.bf16.msra.mxu0 %v3113_v5 }
  0x60   :  { %577 = vmatprep.subr.bf16.mxu0 %v3120_v6 }
  0x63   :  { %578 = vmatpush1.bf16.msra.mxu0 %v3126_v7 }
  0x64   :  { %579 = vmatprep.subr.bf16.mxu0 %v3134_v9 }
  0x67   :  { %580 = vmatpush1.bf16.msra.mxu0 %v3143_v10 }
  0x68   :  { %763 = vmatprep.subr.bf16.mxu0 %v3095_v2 }
  0xc8   :  { %v137_v13 = vpop.permute.xlu0 %136 }
  0xc9   :  { %v185_v23 = vmul.f32 %v3173_v18, %v137_v13  ;;  %v186_v26 = vmul.f32 %v3179_v21, %v137_v13 }
  0xcd   :  { %v204_v20 = vpop.permute.xlu0 %203 }
  0xce   :  { %v245_v24 = vmul.f32 %v3176_v19, %v204_v20  ;;  %v246_v27 = vmul.f32 %v3182_v22, %v204_v20 }
  0xd0   :  { %v261_v28 = vadd.f32 %v245_v24, %v185_v23  ;;  %v262_v30 = vadd.f32 %v246_v27, %v186_v26 }
  0xd2   :  { %v289_v32 = vadd.f32 %v3189_v29, %v261_v28  ;;  %v290_v35 = vadd.f32 %v3192_v31, %v262_v30 }
  0xd4   :  { %v142_v13 = vpop.permute.xlu0 %141 }
  0xd5   :  { %v188_v16 = vmul.f32 %v3179_v21, %v142_v13 }
 0x11a   :  { %v409_v33 = vpop.f32.mrf.mxu0 }
 0x11b   :  { %v416_v34 = vadd.f32 %v409_v33, %v289_v32 }
 0x11c   :  { %v411_v36 = vpop.f32.mrf.mxu0 }
 0x11d   :  { %v417_v37 = vadd.f32 %v411_v36, %v290_v35  ;;  %v418_v42 = vpack.c.bf16 %v416_v34, %v416_v34  ;;  %v187_v34 = vmul.f32 %v3173_v18, %v142_v13 }
 0x11e   :  { %v413_v38 = vpop.f32.mrf.mxu0 }
 0x11f   :  { %v419_v39 = vpack.c.bf16 %v417_v37, %v417_v37  ;;  %v2375_v43 = vmul.bf16 3216621497, %v418_v42 }
 0x120   :  { %v414_v40 = vpop.f32.mrf.mxu0 }
 0x121   :  { %2649 = vtanh.bf16 %v419_v39  ;;  %v2376_v58 = vmul.bf16 3216621497, %v419_v39 }
 0x122   :  { %2651 = vpow.bf16 %v2375_v43 }
 0x12f   :  { %v2650_v41 = vpop.eup %2649 }
 0x130   :  { %438 = vrot.lane.b32.xlu1 %v2650_v41, %s2983_s1  ;;  %v2652_v44 = vpop.eup %2651 }
 0x131   :  { %v428_v45 = vadd.bf16 1065369472, %v2652_v44 }
 0x133   :  { %2653 = vrcp.bf16 %v428_v45 }
 0x141   :  { %v2654_v46 = vpop.eup %2653 }
 0x142   :  { %v431_v47 = vmul.bf16 1065369472, %v2654_v46 }
 0x144   :  { %v435_v51 = vunpack.c.l.bf16 %v431_v47 }
 0x146   :  { %v436_v52 = vmul.f32 0.0, %v435_v51 }
 0x1a2   :  { %v439_v48 = vpop.permute.xlu1 %438 }
 0x1a3   :  { %v441_v49 = vmul.bf16 %v439_v48, %v431_v47  ;;  %v127_v47 = vld [vmem:[%s3752_s0 + $0x10] sm:$0xff] }
 0x1a5   :  { %v442_v50 = vunpack.c.l.bf16 %v441_v49 }
 0x1a7   :  { %444 = vrot.lane.b32.xlu1 %v442_v50, %s2983_s1 }
 0x219   :  { %v445_v53 = vpop.permute.xlu1 %444 }
 0x21a   :  { %v3198_v54 = vadd.f32 %v445_v53, %v436_v52 }
 0x21c   :  { %v448_v55 = vpack.c.bf16 %v3198_v54, %v3198_v54 }
 0x21e   :  { %2655 = vtanh.bf16 %v448_v55 }
 0x21f   :  { %2657 = vpow.bf16 %v2376_v58 }
 0x22c   :  { %v2656_v57 = vpop.eup %2655 }
 0x22d   :  { %451 = vrot.lane.b32.xlu1 %v2656_v57, %s2983_s1  ;;  %v2658_v59 = vpop.eup %2657 }
 0x22e   :  { %v429_v60 = vadd.bf16 1065369472, %v2658_v59 }
 0x230   :  { %2659 = vrcp.bf16 %v429_v60 }
 0x231   :  { %207 = vperm.xlu1 %2574, %v126_v56  }
 0x23e   :  { %v2660_v61 = vpop.eup %2659 }
 0x23f   :  { %v433_v62 = vmul.bf16 1065369472, %v2660_v61 }
 0x29f   :  { %v452_v63 = vpop.permute.xlu1 %451 }
 0x2a0   :  { %v3206_v8 = vmul.bf16 %v452_v63, %v433_v62 }
 0x2a2   :  { %v455_v11 = vunpack.c.l.bf16 %v3206_v8  ;;  %2377 = vmatmul.mubr.msk.bf16.vlgmr.msra.gmra.mxu1 %vm371_vm0, %v3206_v8 }
 0x2a3   :  { %669 = vmatpush1.bf16.msra.mxu1 %v3100_v3  ;;  %692 = vmatprep.mubr.bf16.mxu1 %v2981_v0 }
 0x2a4   :  { %456 = vst.msk [vmem:[#allocation3] sm:$0xff] %vm371_vm0, %v455_v11  ;;  %670 = vmatprep.subr.bf16.mxu1 %v3106_v4 }
 0x2a7   :  { %671 = vmatpush1.bf16.msra.mxu1 %v3113_v5 }
 0x2a8   :  { %672 = vmatprep.subr.bf16.mxu1 %v3120_v6 }
 0x2ab   :  { %673 = vmatpush1.bf16.msra.mxu1 %v3126_v7 }
 0x2ac   :  { %674 = vmatprep.subr.bf16.mxu1 %v3134_v9  ;;  %v208_v12 = vpop.permute.xlu1 %207 }
 0x2ad   :  { %v248_v15 = vmul.f32 %v3182_v22, %v208_v12  ;;  %v247_v33 = vmul.f32 %v3176_v19, %v208_v12 }
 0x2af   :  { %675 = vmatpush1.bf16.msra.mxu1 %v3143_v10  ;;  %v264_v20 = vadd.f32 %v248_v15, %v188_v16  ;;  %v263_v35 = vadd.f32 %v247_v33, %v187_v34 }
 0x2b0   :  { %856 = vmatprep.subr.bf16.mxu1 %v3095_v2 }
 0x2b1   :  { %v292_v23 = vadd.f32 %v3192_v31, %v264_v20  ;;  %v291_v36 = vadd.f32 %v3189_v29, %v263_v35 }
 0x362   :  { %v504_v24 = vpop.f32.mrf.mxu1 }
 0x363   :  { %v511_v37 = vadd.f32 %v504_v24, %v291_v36 }
 0x364   :  { %v506_v25 = vpop.f32.mrf.mxu1 }
 0x365   :  { %v512_v26 = vadd.f32 %v506_v25, %v292_v23  ;;  %v513_v38 = vpack.c.bf16 %v511_v37, %v511_v37 }
 0x366   :  { %v508_v27 = vpop.f32.mrf.mxu1 }
 0x367   :  { %v514_v28 = vpack.c.bf16 %v512_v26, %v512_v26  ;;  %v2378_v39 = vmul.bf16 3216621497, %v513_v38 }
 0x368   :  { %v509_v30 = vpop.f32.mrf.mxu1 }
 0x369   :  { %2661 = vtanh.bf16 %v514_v28  ;;  %v2379_v55 = vmul.bf16 3216621497, %v514_v28 }
 0x36a   :  { %2663 = vpow.bf16 %v2378_v39 }
 0x377   :  { %v2662_v32 = vpop.eup %2661 }
 0x378   :  { %533 = vrot.lane.b32.xlu1 %v2662_v32, %s2983_s1  ;;  %v2664_v40 = vpop.eup %2663 }
 0x379   :  { %v523_v41 = vadd.bf16 1065369472, %v2664_v40 }
 0x37b   :  { %2665 = vrcp.bf16 %v523_v41 }
 0x389   :  { %v2666_v42 = vpop.eup %2665 }
 0x38a   :  { %v526_v43 = vmul.bf16 1065369472, %v2666_v42 }
 0x38c   :  { %v530_v48 = vunpack.c.l.bf16 %v526_v43 }
 0x38e   :  { %v531_v49 = vmul.f32 %v530_v48, %v3198_v54 }
 0x3ea   :  { %v534_v44 = vpop.permute.xlu1 %533 }
 0x3eb   :  { %v536_v45 = vmul.bf16 %v534_v44, %v526_v43 }
 0x3ed   :  { %v537_v46 = vunpack.c.l.bf16 %v536_v45 }
 0x3ef   :  { %539 = vrot.lane.b32.xlu0 %v537_v46, %s2983_s1 }
 0x3f3   :  { %146 = vperm.xlu0 %2573, %v127_v47  }
 0x3f7   :  { %2576 = vset.pattern.permute.xlu0 %v2982_v1 }
 0x461   :  { %v540_v50 = vpop.permute.xlu0 %539 }
 0x462   :  { %v542_v51 = vadd.f32 %v540_v50, %v531_v49  ;;  %v128_v50 = vld [vmem:[%s3752_s0 + $0x18] sm:$0xff] }
 0x464   :  { %v543_v52 = vpack.c.bf16 %v542_v51, %v542_v51 }
 0x466   :  { %2667 = vtanh.bf16 %v543_v52 }
 0x467   :  { %2669 = vpow.bf16 %v2379_v55 }
 0x46e   :  { %v147_v63 = vpop.permute.xlu0 %146 }
 0x46f   :  { %v190_v13 = vmul.f32 %v3179_v21, %v147_v63  ;;  %v189_v32 = vmul.f32 %v3173_v18, %v147_v63 }
 0x474   :  { %v2668_v53 = vpop.eup %2667 }
 0x475   :  { %546 = vrot.lane.b32.xlu1 %v2668_v53, %s2983_s1  ;;  %v2670_v56 = vpop.eup %2669 }
 0x476   :  { %v524_v57 = vadd.bf16 1065369472, %v2670_v56 }
 0x478   :  { %2671 = vrcp.bf16 %v524_v57 }
 0x479   :  { %211 = vperm.xlu1 %2574, %v127_v47  }
 0x47d   :  { %2575 = vset.pattern.permute.xlu1 %v2981_v0 }
 0x486   :  { %v2672_v58 = vpop.eup %2671 }
 0x487   :  { %v528_v59 = vmul.bf16 1065369472, %v2672_v58 }
 0x4e7   :  { %v547_v60 = vpop.permute.xlu1 %546 }
 0x4e8   :  { %v3238_v61 = vmul.bf16 %v547_v60, %v528_v59 }
 0x4ea   :  { %v550_v54 = vunpack.c.l.bf16 %v3238_v61  ;;  %2380 = vmatmul.mubr.msk.bf16.vlgmr.msra.gmra.mxu0 %vm371_vm0, %v3238_v61 }
 0x4eb   :  { %764 = vmatpush1.bf16.msra.mxu0 %v3100_v3  ;;  %787 = vmatprep.mubr.bf16.mxu0 %v2981_v0 }
 0x4ec   :  { %552 = vst.msk [vmem:[#allocation3 + $0x8] sm:$0xff] %vm371_vm0, %v550_v54  ;;  %765 = vmatprep.subr.bf16.mxu0 %v3106_v4 }
 0x4ef   :  { %766 = vmatpush1.bf16.msra.mxu0 %v3113_v5 }
 0x4f0   :  { %767 = vmatprep.subr.bf16.mxu0 %v3120_v6 }
 0x4f3   :  { %768 = vmatpush1.bf16.msra.mxu0 %v3126_v7 }
 0x4f4   :  { %769 = vmatprep.subr.bf16.mxu0 %v3134_v9  ;;  %v212_v62 = vpop.permute.xlu1 %211 }
 0x4f5   :  { %v250_v12 = vmul.f32 %v3182_v22, %v212_v62  ;;  %v249_v30 = vmul.f32 %v3176_v19, %v212_v62 }
 0x4f7   :  { %770 = vmatpush1.bf16.msra.mxu0 %v3143_v10  ;;  %v266_v15 = vadd.f32 %v250_v12, %v190_v13  ;;  %v265_v33 = vadd.f32 %v249_v30, %v189_v32 }
 0x4f8   :  { %949 = vmatprep.subr.bf16.mxu0 %v3095_v2 }
 0x4f9   :  { %v294_v20 = vadd.f32 %v3192_v31, %v266_v15  ;;  %v293_v34 = vadd.f32 %v3189_v29, %v265_v33 }
 0x5aa   :  { %v599_v16 = vpop.f32.mrf.mxu0 }
 0x5ab   :  { %v606_v35 = vadd.f32 %v599_v16, %v293_v34 }
 0x5ac   :  { %v601_v23 = vpop.f32.mrf.mxu0 }
 0x5ad   :  { %v607_v24 = vadd.f32 %v601_v23, %v294_v20  ;;  %v608_v36 = vpack.c.bf16 %v606_v35, %v606_v35 }
 0x5ae   :  { %v603_v25 = vpop.f32.mrf.mxu0 }
 0x5af   :  { %v609_v26 = vpack.c.bf16 %v607_v24, %v607_v24  ;;  %v2381_v37 = vmul.bf16 3216621497, %v608_v36 }
 0x5b0   :  { %v604_v27 = vpop.f32.mrf.mxu0 }
 0x5b1   :  { %2673 = vtanh.bf16 %v609_v26  ;;  %v2382_v53 = vmul.bf16 3216621497, %v609_v26 }
 0x5b2   :  { %2675 = vpow.bf16 %v2381_v37 }
 0x5bf   :  { %v2674_v28 = vpop.eup %2673 }
 0x5c0   :  { %628 = vrot.lane.b32.xlu0 %v2674_v28, %s2983_s1  ;;  %v2676_v38 = vpop.eup %2675 }
 0x5c1   :  { %v618_v39 = vadd.bf16 1065369472, %v2676_v38 }
 0x5c3   :  { %2677 = vrcp.bf16 %v618_v39 }
 0x5d1   :  { %v2678_v40 = vpop.eup %2677 }
 0x5d2   :  { %v621_v41 = vmul.bf16 1065369472, %v2678_v40 }
 0x5d4   :  { %v625_v45 = vunpack.c.l.bf16 %v621_v41 }
 0x5d6   :  { %v626_v46 = vmul.f32 %v625_v45, %v542_v51 }
 0x632   :  { %v629_v42 = vpop.permute.xlu0 %628 }
 0x633   :  { %v631_v43 = vmul.bf16 %v629_v42, %v621_v41 }
 0x635   :  { %v632_v44 = vunpack.c.l.bf16 %v631_v43 }
 0x637   :  { %634 = vrot.lane.b32.xlu1 %v632_v44, %s2983_s1  ;;  %v129_v44 = vld [vmem:[%s3752_s0 + $0x20] sm:$0xff] }
 0x63b   :  { %151 = vperm.xlu1 %2575, %v128_v50  }
 0x6a9   :  { %v635_v47 = vpop.permute.xlu1 %634 }
 0x6aa   :  { %v3263_v48 = vadd.f32 %v635_v47, %v626_v46 }
 0x6ac   :  { %v638_v49 = vpack.c.bf16 %v3263_v48, %v3263_v48 }
 0x6ae   :  { %2679 = vtanh.bf16 %v638_v49 }
 0x6af   :  { %2681 = vpow.bf16 %v2382_v53 }
 0x6b6   :  { %v152_v62 = vpop.permute.xlu1 %151 }
 0x6b7   :  { %v192_v12 = vmul.f32 %v3179_v21, %v152_v62 }
 0x6bc   :  { %v2680_v52 = vpop.eup %2679 }
 0x6bd   :  { %641 = vrot.lane.b32.xlu0 %v2680_v52, %s2983_s1  ;;  %v2682_v55 = vpop.eup %2681 }
 0x6be   :  { %v619_v51 = vadd.bf16 1065369472, %v2682_v55 }
 0x6c0   :  { %2683 = vrcp.bf16 %v619_v51 }
 0x6c1   :  { %215 = vperm.xlu0 %2576, %v128_v50  }
 0x6ce   :  { %v2684_v56 = vpop.eup %2683 }
 0x6cf   :  { %v623_v57 = vmul.bf16 1065369472, %v2684_v56 }
 0x72f   :  { %v642_v58 = vpop.permute.xlu0 %641 }
 0x730   :  { %v3271_v59 = vmul.bf16 %v642_v58, %v623_v57 }
 0x732   :  { %v645_v60 = vunpack.c.l.bf16 %v3271_v59  ;;  %2383 = vmatmul.mubr.msk.bf16.vlgmr.msra.gmra.mxu1 %vm371_vm0, %v3271_v59  ;;  %v2596_v59 = vpack.i.bf16 %v550_v54, %v455_v11 }
 0x733   :  { %857 = vmatpush1.bf16.msra.mxu1 %v3100_v3  ;;  %880 = vmatprep.mubr.bf16.mxu1 %v2981_v0 }
 0x734   :  { %647 = vst.msk [vmem:[#allocation3 + $0x10] sm:$0xff] %vm371_vm0, %v645_v60  ;;  %858 = vmatprep.subr.bf16.mxu1 %v3106_v4 }
 0x737   :  { %859 = vmatpush1.bf16.msra.mxu1 %v3113_v5 }
 0x738   :  { %860 = vmatprep.subr.bf16.mxu1 %v3120_v6 }
 0x73b   :  { %861 = vmatpush1.bf16.msra.mxu1 %v3126_v7 }
 0x73c   :  { %862 = vmatprep.subr.bf16.mxu1 %v3134_v9  ;;  %v216_v63 = vpop.permute.xlu0 %215 }
 0x73d   :  { %v252_v13 = vmul.f32 %v3182_v22, %v216_v63  ;;  %v251_v30 = vmul.f32 %v3176_v19, %v216_v63 }
 0x73f   :  { %863 = vmatpush1.bf16.msra.mxu1 %v3143_v10  ;;  %v268_v15 = vadd.f32 %v252_v13, %v192_v12 }
 0x740   :  { %1042 = vmatprep.subr.bf16.mxu1 %v3095_v2  ;;  %v191_v2 = vmul.f32 %v3173_v18, %v152_v62 }
 0x741   :  { %v296_v16 = vadd.f32 %v3192_v31, %v268_v15 }
 0x742   :  { %v267_v32 = vadd.f32 %v251_v30, %v191_v2 }
 0x744   :  { %v295_v33 = vadd.f32 %v3189_v29, %v267_v32 }
 0x7f2   :  { %v694_v20 = vpop.f32.mrf.mxu1 }
 0x7f3   :  { %v701_v34 = vadd.f32 %v694_v20, %v295_v33 }
 0x7f4   :  { %v696_v23 = vpop.f32.mrf.mxu1 }
 0x7f5   :  { %v702_v24 = vadd.f32 %v696_v23, %v296_v16  ;;  %v703_v35 = vpack.c.bf16 %v701_v34, %v701_v34 }
 0x7f6   :  { %v698_v25 = vpop.f32.mrf.mxu1 }
 0x7f7   :  { %v704_v26 = vpack.c.bf16 %v702_v24, %v702_v24  ;;  %v2384_v36 = vmul.bf16 3216621497, %v703_v35 }
 0x7f8   :  { %v699_v27 = vpop.f32.mrf.mxu1 }
 0x7f9   :  { %2685 = vtanh.bf16 %v704_v26  ;;  %v2385_v53 = vmul.bf16 3216621497, %v704_v26 }
 0x7fa   :  { %2687 = vpow.bf16 %v2384_v36 }
 0x807   :  { %v2686_v28 = vpop.eup %2685 }
 0x808   :  { %723 = vrot.lane.b32.xlu1 %v2686_v28, %s2983_s1  ;;  %v2688_v37 = vpop.eup %2687 }
 0x809   :  { %v713_v38 = vadd.bf16 1065369472, %v2688_v37 }
 0x80b   :  { %2689 = vrcp.bf16 %v713_v38 }
 0x819   :  { %v2690_v39 = vpop.eup %2689 }
 0x81a   :  { %v716_v40 = vmul.bf16 1065369472, %v2690_v39 }
 0x81c   :  { %v720_v45 = vunpack.c.l.bf16 %v716_v40 }
 0x81e   :  { %v721_v46 = vmul.f32 %v720_v45, %v3263_v48 }
 0x87a   :  { %v724_v41 = vpop.permute.xlu1 %723 }
 0x87b   :  { %v726_v42 = vmul.bf16 %v724_v41, %v716_v40 }
 0x87d   :  { %v727_v43 = vunpack.c.l.bf16 %v726_v42 }
 0x87f   :  { %729 = vrot.lane.b32.xlu1 %v727_v43, %s2983_s1 }
 0x883   :  { %156 = vperm.xlu1 %2575, %v129_v44  }
 0x887   :  { %2578 = vset.pattern.permute.xlu1 %v2982_v1 }
 0x8f1   :  { %v730_v47 = vpop.permute.xlu1 %729 }
 0x8f2   :  { %v732_v49 = vadd.f32 %v730_v47, %v721_v46 }
 0x8f4   :  { %v733_v50 = vpack.c.bf16 %v732_v49, %v732_v49 }
 0x8f6   :  { %2691 = vtanh.bf16 %v733_v50 }
 0x8f7   :  { %2693 = vpow.bf16 %v2385_v53  ;;  %v130_v53 = vld [vmem:[%s3752_s0 + $0x28] sm:$0xff] }
 0x8fe   :  { %v157_v12 = vpop.permute.xlu1 %156 }
 0x8ff   :  { %v194_v15 = vmul.f32 %v3179_v21, %v157_v12  ;;  %v193_v32 = vmul.f32 %v3173_v18, %v157_v12 }
 0x904   :  { %v2692_v52 = vpop.eup %2691 }
 0x905   :  { %736 = vrot.lane.b32.xlu0 %v2692_v52, %s2983_s1  ;;  %v2694_v55 = vpop.eup %2693 }
 0x906   :  { %v714_v51 = vadd.bf16 1065369472, %v2694_v55 }
 0x908   :  { %2695 = vrcp.bf16 %v714_v51 }
 0x909   :  { %219 = vperm.xlu0 %2576, %v129_v44  }
 0x90d   :  { %2577 = vset.pattern.permute.xlu0 %v2981_v0 }
 0x916   :  { %v2696_v56 = vpop.eup %2695 }
 0x917   :  { %v718_v57 = vmul.bf16 1065369472, %v2696_v56 }
 0x977   :  { %v737_v58 = vpop.permute.xlu0 %736 }
 0x978   :  { %v3303_v62 = vmul.bf16 %v737_v58, %v718_v57 }
 0x97a   :  { %v740_v48 = vunpack.c.l.bf16 %v3303_v62  ;;  %2386 = vmatmul.mubr.msk.bf16.vlgmr.msra.gmra.mxu0 %vm371_vm0, %v3303_v62 }
 0x97b   :  { %950 = vmatpush1.bf16.msra.mxu0 %v3100_v3  ;;  %973 = vmatprep.mubr.bf16.mxu0 %v2981_v0 }
 0x97c   :  { %742 = vst.msk [vmem:[#allocation3 + $0x18] sm:$0xff] %vm371_vm0, %v740_v48  ;;  %951 = vmatprep.subr.bf16.mxu0 %v3106_v4 }
 0x97f   :  { %952 = vmatpush1.bf16.msra.mxu0 %v3113_v5 }
 0x980   :  { %953 = vmatprep.subr.bf16.mxu0 %v3120_v6 }
 0x983   :  { %954 = vmatpush1.bf16.msra.mxu0 %v3126_v7 }
 0x984   :  { %955 = vmatprep.subr.bf16.mxu0 %v3134_v9  ;;  %v220_v63 = vpop.permute.xlu0 %219 }
 0x985   :  { %v254_v13 = vmul.f32 %v3182_v22, %v220_v63  ;;  %v253_v30 = vmul.f32 %v3176_v19, %v220_v63 }
 0x987   :  { %956 = vmatpush1.bf16.msra.mxu0 %v3143_v10  ;;  %v270_v16 = vadd.f32 %v254_v13, %v194_v15  ;;  %v269_v33 = vadd.f32 %v253_v30, %v193_v32 }
 0x989   :  { %v298_v23 = vadd.f32 %v3192_v31, %v270_v16  ;;  %v297_v34 = vadd.f32 %v3189_v29, %v269_v33 }
 0xa3a   :  { %v789_v20 = vpop.f32.mrf.mxu0 }
 0xa3b   :  { %v796_v35 = vadd.f32 %v789_v20, %v297_v34 }
 0xa3c   :  { %v791_v24 = vpop.f32.mrf.mxu0 }
 0xa3d   :  { %v797_v25 = vadd.f32 %v791_v24, %v298_v23  ;;  %v798_v36 = vpack.c.bf16 %v796_v35, %v796_v35 }
 0xa3e   :  { %v793_v26 = vpop.f32.mrf.mxu0 }
 0xa3f   :  { %v799_v27 = vpack.c.bf16 %v797_v25, %v797_v25  ;;  %v2387_v37 = vmul.bf16 3216621497, %v798_v36 }
 0xa40   :  { %v794_v28 = vpop.f32.mrf.mxu0 }
 0xa41   :  { %2697 = vtanh.bf16 %v799_v27  ;;  %v2388_v51 = vmul.bf16 3216621497, %v799_v27 }
 0xa42   :  { %2699 = vpow.bf16 %v2387_v37 }
 0xa4f   :  { %v2698_v2 = vpop.eup %2697 }
 0xa50   :  { %818 = vrot.lane.b32.xlu1 %v2698_v2, %s2983_s1  ;;  %v2700_v38 = vpop.eup %2699 }
 0xa51   :  { %v808_v39 = vadd.bf16 1065369472, %v2700_v38 }
 0xa53   :  { %2701 = vrcp.bf16 %v808_v39 }
 0xa61   :  { %v2702_v40 = vpop.eup %2701 }
 0xa62   :  { %v811_v41 = vmul.bf16 1065369472, %v2702_v40  ;;  %v131_v40 = vld [vmem:[%s3752_s0 + $0x30] sm:$0xff] }
 0xa64   :  { %v815_v45 = vunpack.c.l.bf16 %v811_v41 }
 0xa66   :  { %v816_v46 = vmul.f32 %v815_v45, %v732_v49 }
 0xac2   :  { %v819_v42 = vpop.permute.xlu1 %818 }
 0xac3   :  { %v821_v43 = vmul.bf16 %v819_v42, %v811_v41 }
 0xac5   :  { %v822_v44 = vunpack.c.l.bf16 %v821_v43 }
 0xac7   :  { %824 = vrot.lane.b32.xlu0 %v822_v44, %s2983_s1 }
 0xacb   :  { %161 = vperm.xlu0 %2577, %v130_v53  }
 0xb39   :  { %v825_v47 = vpop.permute.xlu0 %824 }
 0xb3a   :  { %v827_v50 = vadd.f32 %v825_v47, %v816_v46 }
 0xb3c   :  { %v828_v52 = vpack.c.bf16 %v827_v50, %v827_v50 }
 0xb3e   :  { %2703 = vtanh.bf16 %v828_v52 }
 0xb3f   :  { %2705 = vpow.bf16 %v2388_v51 }
 0xb46   :  { %v162_v13 = vpop.permute.xlu0 %161 }
 0xb47   :  { %v196_v16 = vmul.f32 %v3179_v21, %v162_v13 }
 0xb4c   :  { %v2704_v55 = vpop.eup %2703 }
 0xb4d   :  { %831 = vrot.lane.b32.xlu1 %v2704_v55, %s2983_s1  ;;  %v2706_v56 = vpop.eup %2705 }
 0xb4e   :  { %v809_v57 = vadd.bf16 1065369472, %v2706_v56 }
 0xb50   :  { %2707 = vrcp.bf16 %v809_v57 }
 0xb51   :  { %223 = vperm.xlu1 %2578, %v130_v53  }
 0xb5e   :  { %v2708_v58 = vpop.eup %2707 }
 0xb5f   :  { %v813_v49 = vmul.bf16 1065369472, %v2708_v58 }
 0xbbf   :  { %v832_v63 = vpop.permute.xlu1 %831 }
 0xbc0   :  { %v3331_v12 = vmul.bf16 %v832_v63, %v813_v49 }
 0xbc2   :  { %2389 = vmatmul.mubr.msk.bf16.vlgmr.msra.gmra.mxu1 %vm371_vm0, %v3331_v12 }
 0xbc3   :  { %1043 = vmatpush1.bf16.msra.mxu1 %v3100_v3  ;;  %1066 = vmatprep.mubr.bf16.mxu1 %v2981_v0 }
 0xbc4   :  { %1044 = vmatprep.subr.bf16.mxu1 %v3106_v4 }
 0xbc7   :  { %1045 = vmatpush1.bf16.msra.mxu1 %v3113_v5 }
 0xbc8   :  { %1046 = vmatprep.subr.bf16.mxu1 %v3120_v6 }
 0xbcb   :  { %1047 = vmatpush1.bf16.msra.mxu1 %v3126_v7 }
 0xbcc   :  { %1048 = vmatprep.subr.bf16.mxu1 %v3134_v9  ;;  %v224_v15 = vpop.permute.xlu1 %223  ;;  %v195_v9 = vmul.f32 %v3173_v18, %v162_v13 }
 0xbcd   :  { %v256_v3 = vmul.f32 %v3182_v22, %v224_v15 }
 0xbcf   :  { %1049 = vmatpush1.bf16.msra.mxu1 %v3143_v10  ;;  %v272_v20 = vadd.f32 %v256_v3, %v196_v16  ;;  %v255_v10 = vmul.f32 %v3176_v19, %v224_v15 }
 0xbd1   :  { %v300_v23 = vadd.f32 %v3192_v31, %v272_v20  ;;  %v271_v27 = vadd.f32 %v255_v10, %v195_v9 }
 0xbd3   :  { %v299_v28 = vadd.f32 %v3189_v29, %v271_v27 }
 0xc82   :  { %v882_v4 = vpop.f32.mrf.mxu1 }
 0xc83   :  { %v889_v2 = vadd.f32 %v882_v4, %v299_v28 }
 0xc84   :  { %v884_v24 = vpop.f32.mrf.mxu1 }
 0xc85   :  { %v890_v5 = vadd.f32 %v884_v24, %v300_v23  ;;  %v891_v30 = vpack.c.bf16 %v889_v2, %v889_v2 }
 0xc86   :  { %v886_v25 = vpop.f32.mrf.mxu1 }
 0xc87   :  { %v892_v6 = vpack.c.bf16 %v890_v5, %v890_v5  ;;  %v2390_v32 = vmul.bf16 3216621497, %v891_v30 }
 0xc88   :  { %v887_v26 = vpop.f32.mrf.mxu1 }
 0xc89   :  { %2709 = vtanh.bf16 %v892_v6  ;;  %v2391_v47 = vmul.bf16 3216621497, %v892_v6 }
 0xc8a   :  { %2711 = vpow.bf16 %v2390_v32 }
 0xc97   :  { %v2710_v7 = vpop.eup %2709 }
 0xc98   :  { %911 = vrot.lane.b32.xlu1 %v2710_v7, %s2983_s1  ;;  %v2712_v33 = vpop.eup %2711 }
 0xc99   :  { %v901_v34 = vadd.bf16 1065369472, %v2712_v33 }
 0xc9b   :  { %2713 = vrcp.bf16 %v901_v34 }
 0xca9   :  { %v2714_v35 = vpop.eup %2713 }
 0xcaa   :  { %v904_v36 = vmul.bf16 1065369472, %v2714_v35 }
 0xcac   :  { %v908_v41 = vunpack.c.l.bf16 %v904_v36 }
 0xcae   :  { %v909_v42 = vmul.f32 %v908_v41, %v827_v50 }
 0xd0a   :  { %v912_v37 = vpop.permute.xlu1 %911 }
 0xd0b   :  { %v914_v38 = vmul.bf16 %v912_v37, %v904_v36 }
 0xd0d   :  { %v915_v39 = vunpack.c.l.bf16 %v914_v38 }
 0xd0f   :  { %917 = vrot.lane.b32.xlu0 %v915_v39, %s2983_s1 }
 0xd13   :  { %166 = vperm.xlu0 %2577, %v131_v40  }
 0xd17   :  { %2580 = vset.pattern.permute.xlu0 %v2982_v1 }
 0xd81   :  { %v918_v43 = vpop.permute.xlu0 %917 }
 0xd82   :  { %v920_v44 = vadd.f32 %v918_v43, %v909_v42 }
 0xd84   :  { %v921_v45 = vpack.c.bf16 %v920_v44, %v920_v44 }
 0xd86   :  { %2715 = vtanh.bf16 %v921_v45 }
 0xd87   :  { %2717 = vpow.bf16 %v2391_v47 }
 0xd8e   :  { %v167_v57 = vpop.permute.xlu0 %166 }
 0xd8f   :  { %v198_v49 = vmul.f32 %v3179_v21, %v167_v57  ;;  %v197_v25 = vmul.f32 %v3173_v18, %v167_v57 }
 0xd94   :  { %v2716_v46 = vpop.eup %2715 }
 0xd95   :  { %924 = vrot.lane.b32.xlu1 %v2716_v46, %s2983_s1  ;;  %v2718_v52 = vpop.eup %2717 }
 0xd96   :  { %v902_v53 = vadd.bf16 1065369472, %v2718_v52 }
 0xd98   :  { %2719 = vrcp.bf16 %v902_v53 }
 0xd99   :  { %227 = vperm.xlu1 %2578, %v131_v40   ;;  %v132_v40 = vld [vmem:[%s3752_s0 + $0x38] sm:$0xff] }
 0xd9d   :  { %2579 = vset.pattern.permute.xlu1 %v2981_v0 }
 0xda6   :  { %v2720_v55 = vpop.eup %2719 }
 0xda7   :  { %v906_v51 = vmul.bf16 1065369472, %v2720_v55 }
 0xe07   :  { %v925_v1 = vpop.permute.xlu1 %924 }
 0xe08   :  { %v3357_v56 = vmul.bf16 %v925_v1, %v906_v51 }
 0xe0a   :  { %2392 = vmatmul.mubr.msk.bf16.vlgmr.msra.gmra.mxu0 %vm371_vm0, %v3357_v56 }
 0xe0b   :  { %1261 = vmatprep.mubr.bf16.mxu0 %v2981_v0 }
 0xe14   :  { %v228_v50 = vpop.permute.xlu1 %227 }
 0xe15   :  { %v258_v58 = vmul.f32 %v3182_v22, %v228_v50  ;;  %v257_v5 = vmul.f32 %v3176_v19, %v228_v50 }
 0xe17   :  { %v274_v63 = vadd.f32 %v258_v58, %v198_v49  ;;  %v273_v6 = vadd.f32 %v257_v5, %v197_v25 }
 0xe19   :  { %v302_v15 = vadd.f32 %v3192_v31, %v274_v63  ;;  %v301_v26 = vadd.f32 %v3189_v29, %v273_v6 }
 0xeca   :  { %v975_v13 = vpop.f32.mrf.mxu0 }
 0xecb   :  { %v982_v7 = vadd.f32 %v975_v13, %v301_v26 }
 0xecc   :  { %v977_v16 = vpop.f32.mrf.mxu0 }
 0xecd   :  { %v983_v3 = vadd.f32 %v977_v16, %v302_v15  ;;  %v984_v9 = vpack.c.bf16 %v982_v7, %v982_v7 }
 0xece   :  { %v979_v20 = vpop.f32.mrf.mxu0 }
 0xecf   :  { %v985_v23 = vpack.c.bf16 %v983_v3, %v983_v3  ;;  %v2393_v10 = vmul.bf16 3216621497, %v984_v9 }
 0xed0   :  { %v980_v4 = vpop.f32.mrf.mxu0 }
 0xed1   :  { %2721 = vtanh.bf16 %v985_v23  ;;  %v2394_v42 = vmul.bf16 3216621497, %v985_v23 }
 0xed2   :  { %2723 = vpow.bf16 %v2393_v10 }
 0xedf   :  { %v2722_v24 = vpop.eup %2721 }
 0xee0   :  { %1004 = vrot.lane.b32.xlu0 %v2722_v24, %s2983_s1  ;;  %v2724_v27 = vpop.eup %2723 }
 0xee1   :  { %v994_v28 = vadd.bf16 1065369472, %v2724_v27 }
 0xee3   :  { %2725 = vrcp.bf16 %v994_v28 }
 0xef1   :  { %v2726_v2 = vpop.eup %2725 }
 0xef2   :  { %v997_v30 = vmul.bf16 1065369472, %v2726_v2 }
 0xef4   :  { %v1001_v35 = vunpack.c.l.bf16 %v997_v30 }
 0xef6   :  { %v1002_v36 = vmul.f32 %v1001_v35, %v920_v44  ;;  %v3401_v35 = vld [vmem:[#allocation9 + $0x30] ss:$8 sps:$4 sm:$0xff]  }
 0xf52   :  { %v1005_v32 = vpop.permute.xlu0 %1004 }
 0xf53   :  { %v1007_v33 = vmul.bf16 %v1005_v32, %v997_v30  ;;  %v2615_v30 = vld [vmem:[%s3757_s5 + $0x74] ss:$8 sps:$4 sm:$0xff]   ;;  %v2618_v32 = vld [vmem:[%s3757_s5 + $0x64] ss:$8 sps:$4 sm:$0xff]  }
 0xf54   :  { %1229 = vmatprep.subr.bf16.mxu0 %v2615_v30 }
 0xf55   :  { %v1008_v34 = vunpack.c.l.bf16 %v1007_v33  ;;  %v3396_v33 = vld [vmem:[#allocation9 + $0x34] ss:$8 sps:$4 sm:$0xff]  }
 0xf56   :  { %1404 = vmatprep.subr.bf16.mxu1 %v3396_v33 }
 0xf57   :  { %1010 = vrot.lane.b32.xlu1 %v1008_v34, %s2983_s1  ;;  %v2616_v34 = vld [vmem:[%s3757_s5 + $0x60] ss:$8 sps:$4 sm:$0xff]  }
 0xf5b   :  { %171 = vperm.xlu1 %2579, %v132_v40  }
 0xfc9   :  { %v1011_v37 = vpop.permute.xlu1 %1010 }
 0xfca   :  { %v1013_v38 = vadd.f32 %v1011_v37, %v1002_v36  ;;  %v2621_v36 = vld [vmem:[%s3757_s5 + $0x54] ss:$8 sps:$4 sm:$0xff]  }
 0xfcb   :  { %v3407_v37 = vld [vmem:[#allocation9 + $0x24] ss:$8 sps:$4 sm:$0xff]  }
 0xfcc   :  { %v1014_v39 = vpack.c.bf16 %v1013_v38, %v1013_v38 }
 0xfce   :  { %2727 = vtanh.bf16 %v1014_v39 }
 0xfcf   :  { %2729 = vpow.bf16 %v2394_v42  ;;  %v2622_v42 = vld [vmem:[%s3757_s5 + $0x40] ss:$8 sps:$4 sm:$0xff]  }
 0xfd6   :  { %v172_v53 = vpop.permute.xlu1 %171 }
 0xfd7   :  { %v200_v51 = vmul.f32 %v3179_v21, %v172_v53  ;;  %v199_v20 = vmul.f32 %v3173_v18, %v172_v53  ;;  %v2636_v53 = vld [vmem:[%s3757_s5 + $0x24] ss:$8 sps:$4 sm:$0xff]  }
 0xfdc   :  { %v2728_v41 = vpop.eup %2727 }
 0xfdd   :  { %1017 = vrot.lane.b32.xlu0 %v2728_v41, %s2983_s1  ;;  %v2730_v43 = vpop.eup %2729  ;;  %v2624_v41 = vld [vmem:[%s3757_s5 + $0x44] ss:$8 sps:$4 sm:$0xff]  }
 0xfde   :  { %v995_v45 = vadd.bf16 1065369472, %v2730_v43  ;;  %v2630_v43 = vld [vmem:[%s3757_s5 + $0x34] ss:$8 sps:$4 sm:$0xff]  }
 0xfe0   :  { %2731 = vrcp.bf16 %v995_v45  ;;  %v2628_v45 = vld [vmem:[%s3757_s5 + $0x30] ss:$8 sps:$4 sm:$0xff]  }
 0xfe1   :  { %231 = vperm.xlu0 %2580, %v132_v40   ;;  %v2619_v40 = vld [vmem:[%s3757_s5 + $0x50] ss:$8 sps:$4 sm:$0xff]  }
 0xfee   :  { %v2732_v46 = vpop.eup %2731 }
 0xfef   :  { %v999_v44 = vmul.bf16 1065369472, %v2732_v46 }
0x104f   :  { %v1018_v47 = vpop.permute.xlu0 %1017 }
0x1050   :  { %v3374_v52 = vmul.bf16 %v1018_v47, %v999_v44 }
0x1052   :  { %2395 = vmatmul.mubr.msk.bf16.vlgmr.msra.gmra.mxu1 %vm371_vm0, %v3374_v52 }
0x1053   :  { %1428 = vmatprep.mubr.bf16.mxu1 %v2981_v0  ;;  %1405 = vmatpush1.bf16.msra.mxu1 %v3401_v35 }
0x1054   :  { %1406 = vmatprep.subr.bf16.mxu1 %v3407_v37 }
0x105c   :  { %v232_v55 = vpop.permute.xlu0 %231 }
0x105d   :  { %v260_v1 = vmul.f32 %v3182_v22, %v232_v55  ;;  %v259_v23 = vmul.f32 %v3176_v19, %v232_v55  ;;  %v3433_v55 = vld [vmem:[#allocation9 + $0x14] ss:$8 sps:$4 sm:$0xff]  }
0x105f   :  { %v276_v50 = vadd.f32 %v260_v1, %v200_v51  ;;  %v275_v21 = vadd.f32 %v259_v23, %v199_v20  ;;  %v2634_v51 = vld [vmem:[%s3757_s5 + $0x20] ss:$8 sps:$4 sm:$0xff]   ;;  %v1021_v23 = vunpack.c.l.bf16 %v3374_v52 }
0x1060   :  { %v3438_v1 = vld [vmem:[#allocation9 + $0x10] ss:$8 sps:$4 sm:$0xff]  }
0x1061   :  { %v304_v57 = vadd.f32 %v3192_v31, %v276_v50  ;;  %v303_v22 = vadd.f32 %v3189_v29, %v275_v21  ;;  %v2613_v29 = vld [vmem:[%s3757_s5 + $0x70] ss:$8 sps:$4 sm:$0xff]  }
0x1062   :  { %1230 = vmatpush1.bf16.msra.mxu0 %v2613_v29 }
0x1063   :  { %1231 = vmatprep.subr.bf16.mxu0 %v2618_v32 }
0x1066   :  { %1232 = vmatpush1.bf16.msra.mxu0 %v2616_v34 }
0x1067   :  { %1233 = vmatprep.subr.bf16.mxu0 %v2621_v36 }
0x106a   :  { %1234 = vmatpush1.bf16.msra.mxu0 %v2619_v40 }
0x106b   :  { %1235 = vmatprep.subr.bf16.mxu0 %v2624_v41 }
0x106e   :  { %1236 = vmatpush1.bf16.msra.mxu0 %v2622_v42 }
0x106f   :  { %1237 = vmatprep.subr.bf16.mxu0 %v2630_v43 }
0x1072   :  { %1238 = vmatpush1.bf16.msra.mxu0 %v2628_v45 }
0x1073   :  { %1239 = vmatprep.subr.bf16.mxu0 %v2636_v53 }
0x1076   :  { %1240 = vmatpush1.bf16.msra.mxu0 %v2634_v51 }
0x1112   :  { %v1068_v58 = vpop.f32.mrf.mxu1 }
0x1113   :  { %v1075_v4 = vadd.f32 %v1068_v58, %v303_v22  ;;  %v2642_v58 = vld [vmem:[%s3757_s5 + $0x14] ss:$8 sps:$4 sm:$0xff]  }
0x1114   :  { %v1070_v49 = vpop.f32.mrf.mxu1  ;;  %1241 = vmatprep.subr.bf16.mxu0 %v2642_v58 }
0x1115   :  { %v1076_v63 = vadd.f32 %v1070_v49, %v304_v57  ;;  %v1077_v24 = vpack.c.bf16 %v1075_v4, %v1075_v4  ;;  %v2640_v57 = vld [vmem:[%s3757_s5 + $0x10] ss:$8 sps:$4 sm:$0xff]  }
0x1116   :  { %v1072_v13 = vpop.f32.mrf.mxu1  ;;  %v3448_v49 = vld [vmem:[#allocation9 + $0x4] ss:$8 sps:$4 sm:$0xff]   ;;  %1242 = vmatpush1.bf16.msra.mxu0 %v2640_v57 }
0x1117   :  { %v1078_v15 = vpack.c.bf16 %v1076_v63, %v1076_v63  ;;  %v2396_v31 = vmul.bf16 3216621497, %v1077_v24  ;;  %v3450_v63 = vld [vmem:[#allocation9] ss:$8 sps:$4 sm:$0xff]  }
0x1118   :  { %v1073_v16 = vpop.f32.mrf.mxu1  ;;  %v2648_v13 = vld [vmem:[%s3757_s5 + $0x4] ss:$8 sps:$4 sm:$0xff]  }
0x1119   :  { %2733 = vtanh.bf16 %v1078_v15  ;;  %v2397_v46 = vmul.bf16 3216621497, %v1078_v15  ;;  %v2646_v16 = vld [vmem:[%s3757_s5] ss:$8 sps:$4 sm:$0xff]   ;;  %1243 = vmatprep.subr.bf16.mxu0 %v2648_v13 }
0x111a   :  { %2735 = vpow.bf16 %v2396_v31  ;;  %1244 = vmatpush1.bf16.msra.mxu0 %v2646_v16 }
0x111b   :  { %1659 = vmatprep.subr.bf16.mxu0 %v3396_v33 }
0x1127   :  { %v2734_v3 = vpop.eup %2733 }
0x1128   :  { %1097 = vrot.lane.b32.xlu1 %v2734_v3, %s2983_s1  ;;  %v2736_v5 = vpop.eup %2735 }
0x1129   :  { %v1087_v25 = vadd.bf16 1065369472, %v2736_v5 }
0x112b   :  { %2737 = vrcp.bf16 %v1087_v25 }
0x1139   :  { %v2738_v6 = vpop.eup %2737 }
0x113a   :  { %v1090_v26 = vmul.bf16 1065369472, %v2738_v6 }
0x113c   :  { %v1094_v18 = vunpack.c.l.bf16 %v1090_v26 }
0x113e   :  { %v1095_v27 = vmul.f32 %v1094_v18, %v1013_v38  ;;  %v3410_v38 = vld [vmem:[#allocation9 + $0x20] ss:$8 sps:$4 sm:$0xff]   ;;  %v1302_v18 = vld [vmem:[#allocation8] sm:$0x3] }
0x113f   :  { %1407 = vmatpush1.bf16.msra.mxu1 %v3410_v38  ;;  %v3498_v34 = vrot.slane %v1302_v18, %v3165_v14 }
0x1140   :  { %1408 = vmatprep.subr.bf16.mxu1 %v3433_v55 }
0x1143   :  { %1409 = vmatpush1.bf16.msra.mxu1 %v3438_v1 }
0x1144   :  { %1410 = vmatprep.subr.bf16.mxu1 %v3448_v49 }
0x1147   :  { %1411 = vmatpush1.bf16.msra.mxu1 %v3450_v63 }
0x1148   :  { %1489 = vmatprep.subr.bf16.mxu1 %v3396_v33 }
0x114a   :  { %1429 = vmatmul.mubr.bf16.vlgmr.msra.gmra.mxu1 %v2981_v0 }
0x114b   :  { %1490 = vmatpush1.bf16.msra.mxu1 %v3401_v35  ;;  %1513 = vmatprep.mubr.bf16.mxu1 %v2981_v0 }
0x114c   :  { %1491 = vmatprep.subr.bf16.mxu1 %v3407_v37 }
0x114f   :  { %1492 = vmatpush1.bf16.msra.mxu1 %v3410_v38 }
0x1150   :  { %1493 = vmatprep.subr.bf16.mxu1 %v3433_v55 }
0x1153   :  { %1494 = vmatpush1.bf16.msra.mxu1 %v3438_v1 }
0x1154   :  { %1495 = vmatprep.subr.bf16.mxu1 %v3448_v49 }
0x1157   :  { %1496 = vmatpush1.bf16.msra.mxu1 %v3450_v63 }
0x1158   :  { %1574 = vmatprep.subr.bf16.mxu1 %v3396_v33 }
0x119a   :  { %v1098_v7 = vpop.permute.xlu1 %1097 }
0x119b   :  { %v1100_v9 = vmul.bf16 %v1098_v7, %v1090_v26 }
0x119d   :  { %v1101_v10 = vunpack.c.l.bf16 %v1100_v9 }
0x119f   :  { %1103 = vrot.lane.b32.xlu1 %v1101_v10, %s2983_s1 }
0x120a   :  { %v1430_v26 = vpop.f32.mrf.mxu1 }
0x120c   :  { %v1432_v7 = vpop.f32.mrf.mxu1 }
0x120e   :  { %v1434_v9 = vpop.f32.mrf.mxu1 }
0x1210   :  { %v1435_v10 = vpop.f32.mrf.mxu1 }
0x1211   :  { %v1104_v19 = vpop.permute.xlu1 %1103 }
0x1212   :  { %v1106_v28 = vadd.f32 %v1104_v19, %v1095_v27  ;;  %v3493_v27 = vrot.slane %v1302_v18, %v3170_v17 }
0x1214   :  { %v1107_v2 = vpack.c.bf16 %v1106_v28, %v1106_v28 }
0x1216   :  { %2739 = vtanh.bf16 %v1107_v2 }
0x1217   :  { %2741 = vpow.bf16 %v2397_v46 }
0x1224   :  { %v2740_v39 = vpop.eup %2739 }
0x1225   :  { %1110 = vrot.lane.b32.xlu0 %v2740_v39, %s2983_s1  ;;  %v2742_v44 = vpop.eup %2741 }
0x1226   :  { %v1088_v47 = vadd.bf16 1065369472, %v2742_v44 }
0x1228   :  { %2743 = vrcp.bf16 %v1088_v47 }
0x1236   :  { %v2744_v50 = vpop.eup %2743 }
0x1237   :  { %v1092_v15 = vmul.bf16 1065369472, %v2744_v50 }
0x1297   :  { %v1111_v3 = vpop.permute.xlu0 %1110 }
0x1298   :  { %v3461_v20 = vmul.bf16 %v1111_v3, %v1092_v15 }
0x129a   :  { %v1114_v21 = vunpack.c.l.bf16 %v3461_v20 }
0x129c   :  { %v2581_v22 = vpack.i.bf16 %v1114_v21, %v1021_v23 }
0x129e   :  { %2582 = vrot.lane.b32.xlu1 %v2581_v22, %s2983_s1 }
0x1310   :  { %v2583_v4 = vpop.permute.xlu1 %2582 }
0x1311   :  { %v2585_v24 = vunpack.i.h.bf16 %v2583_v4  ;;  %v2584_v31 = vunpack.i.l.bf16 %v2583_v4 }
0x1313   :  { %1120 = vst.msk [vmem:[#allocation3] sm:$0xff] %vm462_vm1, %v2585_v24  ;;  %1027 = vst.msk [vmem:[#allocation3 + $0x8] sm:$0xff] %vm462_vm1, %v2584_v31 }
0x131a   :  { %v1121_v5 = vld [vmem:[#allocation3] sm:$0xff]  ;;  %v1122_v25 = vld [vmem:[#allocation3 + $0x8] sm:$0xff] }
0x131b   :  { %v1129_v6 = vpack.c.bf16 %v1122_v25, %v1121_v5 }
0x131d   :  { %1262 = vmatmul.mubr.bf16.vlgmr.msra.gmra.mxu0 %v1129_v6 }
0x131e   :  { %1271 = vmatprep.mubr.bf16.mxu0 %v2981_v0  ;;  %1660 = vmatpush1.bf16.msra.mxu0 %v3401_v35 }
0x131f   :  { %1661 = vmatprep.subr.bf16.mxu0 %v3407_v37 }
0x1322   :  { %1662 = vmatpush1.bf16.msra.mxu0 %v3410_v38 }
0x1323   :  { %1663 = vmatprep.subr.bf16.mxu0 %v3433_v55 }
0x1326   :  { %1664 = vmatpush1.bf16.msra.mxu0 %v3438_v1 }
0x1327   :  { %1665 = vmatprep.subr.bf16.mxu0 %v3448_v49 }
0x132a   :  { %1666 = vmatpush1.bf16.msra.mxu0 %v3450_v63 }
0x132b   :  { %1829 = vmatprep.subr.bf16.mxu0 %v3396_v33 }
0x13dd   :  { %v1263_v19 = vpop.f32.mrf.mxu0 }
0x13de   :  { %v1314_v36 = vadd.f32 %v3498_v34, %v1263_v19 }
0x13df   :  { %v1265_v28 = vpop.f32.mrf.mxu0 }
0x13e0   :  { %v1315_v2 = vadd.f32 %v3493_v27, %v1265_v28  ;;  %v1437_v39 = vadd.f32 %v1430_v26, %v1314_v36 }
0x13e1   :  { %v1267_v31 = vpop.f32.mrf.mxu0 }
0x13e2   :  { %v1438_v29 = vadd.f32 %v1432_v7, %v1315_v2  ;;  %v1439_v40 = vpack.c.bf16 %v1437_v39, %v1437_v39  ;;  %v1316_v25 = vadd.f32 %v3498_v34, %v1267_v31  ;;  %v928_v2 = vunpack.c.l.bf16 %v3357_v56 }
0x13e3   :  { %v1269_v5 = vpop.f32.mrf.mxu0 }
0x13e4   :  { %v1440_v30 = vpack.c.bf16 %v1438_v29, %v1438_v29  ;;  %v2422_v41 = vmul.bf16 3216621497, %v1439_v40  ;;  %v1317_v26 = vadd.f32 %v3493_v27, %v1269_v5 }
0x13e6   :  { %2745 = vtanh.bf16 %v1440_v30  ;;  %v2423_v13 = vmul.bf16 3216621497, %v1440_v30  ;;  %v835_v30 = vunpack.c.l.bf16 %v3331_v12 }
0x13e7   :  { %2747 = vpow.bf16 %v2422_v41 }
0x13f4   :  { %v2746_v32 = vpop.eup %2745 }
0x13f5   :  { %1459 = vrot.lane.b32.xlu0 %v2746_v32, %s2983_s1  ;;  %v2748_v17 = vpop.eup %2747  ;;  %v2586_v32 = vpack.i.bf16 %v928_v2, %v835_v30 }
0x13f6   :  { %v1449_v42 = vadd.bf16 1065369472, %v2748_v17 }
0x13f8   :  { %2749 = vrcp.bf16 %v1449_v42 }
0x1406   :  { %v2750_v43 = vpop.eup %2749 }
0x1407   :  { %v1452_v45 = vmul.bf16 1065369472, %v2750_v43 }
0x1409   :  { %v1456_v53 = vunpack.c.l.bf16 %v1452_v45 }
0x140b   :  { %v1457_v51 = vmul.f32 0.0, %v1456_v53 }
0x1467   :  { %v1460_v46 = vpop.permute.xlu0 %1459 }
0x1468   :  { %v1462_v44 = vmul.bf16 %v1460_v46, %v1452_v45 }
0x146a   :  { %v1463_v47 = vunpack.c.l.bf16 %v1462_v44 }
0x146c   :  { %1465 = vrot.lane.b32.xlu1 %v1463_v47, %s2983_s1 }
0x14de   :  { %v1466_v14 = vpop.permute.xlu1 %1465 }
0x14df   :  { %v3502_v50 = vadd.f32 %v1466_v14, %v1457_v51 }
0x14e1   :  { %v1469_v57 = vpack.c.bf16 %v3502_v50, %v3502_v50 }
0x14e3   :  { %2751 = vtanh.bf16 %v1469_v57 }
0x14e4   :  { %2753 = vpow.bf16 %v2423_v13 }
0x14f1   :  { %v2752_v58 = vpop.eup %2751 }
0x14f2   :  { %1472 = vrot.lane.b32.xlu0 %v2752_v58, %s2983_s1  ;;  %v2754_v15 = vpop.eup %2753 }
0x14f3   :  { %v1450_v16 = vadd.bf16 1065369472, %v2754_v15 }
0x14f5   :  { %2755 = vrcp.bf16 %v1450_v16 }
0x1503   :  { %v2756_v3 = vpop.eup %2755 }
0x1504   :  { %v1454_v22 = vmul.bf16 1065369472, %v2756_v3 }
0x1564   :  { %v1473_v4 = vpop.permute.xlu0 %1472 }
0x1565   :  { %v1475_v24 = vmul.bf16 %v1473_v4, %v1454_v22 }
0x1567   :  { %2424 = vmatmul.mubr.msk.bf16.vlgmr.msra.gmra.mxu1 %vm371_vm0, %v1475_v24 }
0x1568   :  { %1575 = vmatpush1.bf16.msra.mxu1 %v3401_v35  ;;  %1598 = vmatprep.mubr.bf16.mxu1 %v2981_v0 }
0x1569   :  { %1576 = vmatprep.subr.bf16.mxu1 %v3407_v37 }
0x156c   :  { %1577 = vmatpush1.bf16.msra.mxu1 %v3410_v38 }
0x156d   :  { %1578 = vmatprep.subr.bf16.mxu1 %v3433_v55 }
0x1570   :  { %1579 = vmatpush1.bf16.msra.mxu1 %v3438_v1 }
0x1571   :  { %1580 = vmatprep.subr.bf16.mxu1 %v3448_v49 }
0x1574   :  { %1581 = vmatpush1.bf16.msra.mxu1 %v3450_v63 }
0x1575   :  { %1744 = vmatprep.subr.bf16.mxu1 %v3396_v33 }
0x1627   :  { %v1515_v6 = vpop.f32.mrf.mxu1 }
0x1628   :  { %v1522_v7 = vadd.f32 %v1515_v6, %v1316_v25 }
0x1629   :  { %v1517_v9 = vpop.f32.mrf.mxu1 }
0x162a   :  { %v1523_v10 = vadd.f32 %v1517_v9, %v1317_v26  ;;  %v1524_v36 = vpack.c.bf16 %v1522_v7, %v1522_v7 }
0x162b   :  { %v1519_v18 = vpop.f32.mrf.mxu1 }
0x162c   :  { %v1525_v19 = vpack.c.bf16 %v1523_v10, %v1523_v10  ;;  %v2425_v39 = vmul.bf16 3216621497, %v1524_v36 }
0x162d   :  { %v1520_v28 = vpop.f32.mrf.mxu1 }
0x162e   :  { %2757 = vtanh.bf16 %v1525_v19  ;;  %v2426_v4 = vmul.bf16 3216621497, %v1525_v19 }
0x162f   :  { %2759 = vpow.bf16 %v2425_v39 }
0x163c   :  { %v2758_v29 = vpop.eup %2757 }
0x163d   :  { %1544 = vrot.lane.b32.xlu1 %v2758_v29, %s2983_s1  ;;  %v2760_v40 = vpop.eup %2759 }
0x163e   :  { %v1534_v41 = vadd.bf16 1065369472, %v2760_v40 }
0x1640   :  { %2761 = vrcp.bf16 %v1534_v41  ;;  %v2591_v41 = vpack.i.bf16 %v740_v48, %v645_v60 }
0x1641   :  { %2587 = vrot.lane.b32.xlu1 %v2586_v32, %s2983_s1 }
0x164e   :  { %v2762_v17 = vpop.eup %2761 }
0x164f   :  { %v1537_v42 = vmul.bf16 1065369472, %v2762_v17 }
0x1651   :  { %v1541_v58 = vunpack.c.l.bf16 %v1537_v42 }
0x1653   :  { %v1542_v13 = vmul.f32 %v1541_v58, %v3502_v50 }
0x16af   :  { %v1545_v43 = vpop.permute.xlu1 %1544 }
0x16b0   :  { %v1547_v45 = vmul.bf16 %v1545_v43, %v1537_v42 }
0x16b2   :  { %v1548_v46 = vunpack.c.l.bf16 %v1547_v45 }
0x16b3   :  { %v2588_v44 = vpop.permute.xlu1 %2587 }
0x16b4   :  { %v2590_v47 = vunpack.i.h.bf16 %v2588_v44  ;;  %v2589_v53 = vunpack.i.l.bf16 %v2588_v44  ;;  %1550 = vrot.lane.b32.xlu0 %v1548_v46, %s2983_s1 }
0x16b6   :  { %934 = vst.msk [vmem:[#allocation3 + $0x10] sm:$0xff] %vm462_vm1, %v2590_v47  ;;  %841 = vst.msk [vmem:[#allocation3 + $0x18] sm:$0xff] %vm462_vm1, %v2589_v53 }
0x16bd   :  { %v1123_v51 = vld [vmem:[#allocation3 + $0x10] sm:$0xff]  ;;  %v1124_v14 = vld [vmem:[#allocation3 + $0x18] sm:$0xff] }
0x16be   :  { %v1130_v57 = vpack.c.bf16 %v1124_v14, %v1123_v51 }
0x16c0   :  { %1272 = vmatmul.mubr.bf16.gmra.mxu0 %v1130_v57 }
0x16c1   :  { %1281 = vmatprep.mubr.bf16.mxu0 %v2981_v0 }
0x1726   :  { %v1551_v15 = vpop.permute.xlu0 %1550 }
0x1727   :  { %v3532_v16 = vadd.f32 %v1551_v15, %v1542_v13 }
0x1729   :  { %v1554_v3 = vpack.c.bf16 %v3532_v16, %v3532_v16 }
0x172b   :  { %2763 = vtanh.bf16 %v1554_v3 }
0x172c   :  { %2765 = vpow.bf16 %v2426_v4 }
0x1739   :  { %v2764_v22 = vpop.eup %2763 }
0x173a   :  { %1557 = vrot.lane.b32.xlu0 %v2764_v22, %s2983_s1  ;;  %v2766_v24 = vpop.eup %2765 }
0x173b   :  { %v1535_v31 = vadd.bf16 1065369472, %v2766_v24 }
0x173d   :  { %2767 = vrcp.bf16 %v1535_v31 }
0x174b   :  { %v2768_v5 = vpop.eup %2767 }
0x174c   :  { %v1539_v25 = vmul.bf16 1065369472, %v2768_v5 }
0x1780   :  { %v1273_v50 = vpop.f32.mrf.mxu0 }
0x1781   :  { %v1318_v9 = vadd.f32 %v3498_v34, %v1273_v50 }
0x1782   :  { %v1275_v7 = vpop.f32.mrf.mxu0 }
0x1783   :  { %v1319_v18 = vadd.f32 %v3493_v27, %v1275_v7 }
0x17ac   :  { %v1558_v6 = vpop.permute.xlu0 %1557 }
0x17ad   :  { %v1560_v26 = vmul.bf16 %v1558_v6, %v1539_v25 }
0x17af   :  { %2427 = vmatmul.mubr.msk.bf16.vlgmr.msra.gmra.mxu1 %vm371_vm0, %v1560_v26 }
0x17b0   :  { %1745 = vmatpush1.bf16.msra.mxu1 %v3401_v35  ;;  %1768 = vmatprep.mubr.bf16.mxu1 %v2981_v0 }
0x17b1   :  { %1746 = vmatprep.subr.bf16.mxu1 %v3407_v37 }
0x17b4   :  { %1747 = vmatpush1.bf16.msra.mxu1 %v3410_v38 }
0x17b5   :  { %1748 = vmatprep.subr.bf16.mxu1 %v3433_v55 }
0x17b8   :  { %1749 = vmatpush1.bf16.msra.mxu1 %v3438_v1 }
0x17b9   :  { %1750 = vmatprep.subr.bf16.mxu1 %v3448_v49 }
0x17bc   :  { %1751 = vmatpush1.bf16.msra.mxu1 %v3450_v63 }
0x17bd   :  { %1914 = vmatprep.subr.bf16.mxu1 %v3396_v33 }
0x186f   :  { %v1600_v10 = vpop.f32.mrf.mxu1 }
0x1870   :  { %v1607_v19 = vadd.f32 %v1600_v10, %v1318_v9 }
0x1871   :  { %v1602_v28 = vpop.f32.mrf.mxu1 }
0x1872   :  { %v1608_v29 = vadd.f32 %v1602_v28, %v1319_v18  ;;  %v1609_v17 = vpack.c.bf16 %v1607_v19, %v1607_v19 }
0x1873   :  { %v1604_v32 = vpop.f32.mrf.mxu1 }
0x1874   :  { %v1610_v36 = vpack.c.bf16 %v1608_v29, %v1608_v29  ;;  %v2428_v42 = vmul.bf16 3216621497, %v1609_v17 }
0x1875   :  { %v1605_v39 = vpop.f32.mrf.mxu1 }
0x1876   :  { %2769 = vtanh.bf16 %v1610_v36  ;;  %v2429_v22 = vmul.bf16 3216621497, %v1610_v36 }
0x1877   :  { %2771 = vpow.bf16 %v2428_v42 }
0x1884   :  { %v2770_v40 = vpop.eup %2769 }
0x1885   :  { %1629 = vrot.lane.b32.xlu1 %v2770_v40, %s2983_s1  ;;  %v2772_v43 = vpop.eup %2771 }
0x1886   :  { %v1619_v45 = vadd.bf16 1065369472, %v2772_v43 }
0x1888   :  { %2773 = vrcp.bf16 %v1619_v45 }
0x1889   :  { %2592 = vrot.lane.b32.xlu1 %v2591_v41, %s2983_s1 }
0x1896   :  { %v2774_v46 = vpop.eup %2773 }
0x1897   :  { %v1622_v44 = vmul.bf16 1065369472, %v2774_v46 }
0x1899   :  { %v1626_v8 = vunpack.c.l.bf16 %v1622_v44 }
0x189b   :  { %v1627_v61 = vmul.f32 %v1626_v8, %v3532_v16 }
0x18f7   :  { %v1630_v47 = vpop.permute.xlu1 %1629 }
0x18f8   :  { %v1632_v53 = vmul.bf16 %v1630_v47, %v1622_v44 }
0x18fa   :  { %v1633_v51 = vunpack.c.l.bf16 %v1632_v53 }
0x18fb   :  { %v2593_v14 = vpop.permute.xlu1 %2592 }
0x18fc   :  { %v2595_v57 = vunpack.i.h.bf16 %v2593_v14  ;;  %v2594_v58 = vunpack.i.l.bf16 %v2593_v14  ;;  %1635 = vrot.lane.b32.xlu0 %v1633_v51, %s2983_s1 }
0x18fe   :  { %748 = vst.msk [vmem:[#allocation3 + $0x20] sm:$0xff] %vm462_vm1, %v2595_v57  ;;  %653 = vst.msk [vmem:[#allocation3 + $0x28] sm:$0xff] %vm462_vm1, %v2594_v58 }
0x18ff   :  { %836 = vst.msk [vmem:[#allocation3 + $0x20] sm:$0xff] %vm371_vm0, %v835_v30  ;;  %929 = vst.msk [vmem:[#allocation3 + $0x28] sm:$0xff] %vm371_vm0, %v928_v2 }
0x1900   :  { %2597 = vrot.lane.b32.xlu0 %v2596_v59, %s2983_s1 }
0x1906   :  { %v1125_v60 = vld [vmem:[#allocation3 + $0x20] sm:$0xff]  ;;  %v1126_v62 = vld [vmem:[#allocation3 + $0x28] sm:$0xff] }
0x1907   :  { %v1131_v48 = vpack.c.bf16 %v1126_v62, %v1125_v60 }
0x1909   :  { %1282 = vmatmul.mubr.bf16.gmra.mxu0 %v1131_v48 }
0x190a   :  { %1291 = vmatprep.mubr.bf16.mxu0 %v2981_v0 }
0x196e   :  { %v1636_v11 = vpop.permute.xlu0 %1635 }
0x196f   :  { %v3571_v54 = vadd.f32 %v1636_v11, %v1627_v61 }
0x1971   :  { %v1639_v12 = vpack.c.bf16 %v3571_v54, %v3571_v54 }
0x1972   :  { %v2598_v56 = vpop.permute.xlu0 %2597 }
0x1973   :  { %2775 = vtanh.bf16 %v1639_v12  ;;  %v2600_v2 = vunpack.i.h.bf16 %v2598_v56  ;;  %v2599_v30 = vunpack.i.l.bf16 %v2598_v56 }
0x1974   :  { %2777 = vpow.bf16 %v2429_v22 }
0x1975   :  { %558 = vst.msk [vmem:[#allocation3 + $0x30] sm:$0xff] %vm462_vm1, %v2600_v2  ;;  %463 = vst.msk [vmem:[#allocation3 + $0x38] sm:$0xff] %vm462_vm1, %v2599_v30 }
0x1976   :  { %1022 = vst.msk [vmem:[#allocation3 + $0x30] sm:$0xff] %vm371_vm0, %v1021_v23  ;;  %1115 = vst.msk [vmem:[#allocation3 + $0x38] sm:$0xff] %vm371_vm0, %v1114_v21  ;;  %v1277_v21 = vpop.f32.mrf.mxu0 }
0x1977   :  { %v1320_v19 = vadd.f32 %v3498_v34, %v1277_v21 }
0x1978   :  { %v1279_v5 = vpop.f32.mrf.mxu0 }
0x197d   :  { %v1127_v13 = vld [vmem:[#allocation3 + $0x30] sm:$0xff]  ;;  %v1128_v15 = vld [vmem:[#allocation3 + $0x38] sm:$0xff] }
0x197e   :  { %v1132_v16 = vpack.c.bf16 %v1128_v15, %v1127_v13 }
0x1980   :  { %1292 = vmatmul.mubr.bf16.gmra.mxu0 %v1132_v16 }
0x1981   :  { %v2776_v3 = vpop.eup %2775  ;;  %1683 = vmatprep.mubr.bf16.mxu0 %v2981_v0 }
0x1982   :  { %1642 = vrot.lane.b32.xlu1 %v2776_v3, %s2983_s1  ;;  %v2778_v4 = vpop.eup %2777 }
0x1983   :  { %v1620_v24 = vadd.bf16 1065369472, %v2778_v4 }
0x1985   :  { %2779 = vrcp.bf16 %v1620_v24 }
0x1993   :  { %v2780_v52 = vpop.eup %2779 }
0x1994   :  { %v1624_v23 = vmul.bf16 1065369472, %v2780_v52 }
0x19c9   :  { %v1283_v25 = vpop.f32.mrf.mxu0 }
0x19cb   :  { %v1285_v6 = vpop.f32.mrf.mxu0 }
0x19cc   :  { %v1323_v15 = vadd.f32 %v3493_v27, %v1285_v6 }
0x19cd   :  { %v3595_v26 = vpop.f32.mrf.mxu0 }
0x19cf   :  { %v3597_v50 = vpop.f32.mrf.mxu0 }
0x19f4   :  { %v1643_v31 = vpop.permute.xlu1 %1642 }
0x19f5   :  { %v1645_v20 = vmul.bf16 %v1643_v31, %v1624_v23 }
0x19f7   :  { %2430 = vmatmul.mubr.msk.bf16.vlgmr.msra.gmra.mxu0 %vm371_vm0, %v1645_v20 }
0x19f8   :  { %1830 = vmatpush1.bf16.msra.mxu0 %v3401_v35  ;;  %1853 = vmatprep.mubr.bf16.mxu0 %v2981_v0 }
0x19f9   :  { %1831 = vmatprep.subr.bf16.mxu0 %v3407_v37 }
0x19fc   :  { %1832 = vmatpush1.bf16.msra.mxu0 %v3410_v38 }
0x19fd   :  { %1833 = vmatprep.subr.bf16.mxu0 %v3433_v55 }
0x1a00   :  { %1834 = vmatpush1.bf16.msra.mxu0 %v3438_v1 }
0x1a01   :  { %1835 = vmatprep.subr.bf16.mxu0 %v3448_v49 }
0x1a04   :  { %1836 = vmatpush1.bf16.msra.mxu0 %v3450_v63 }
0x1a05   :  { %1999 = vmatprep.subr.bf16.mxu0 %v3396_v33  ;;  %v1321_v33 = vadd.f32 %v3493_v27, %v1279_v5 }
0x1a40   :  { %v3599_v7 = vpop.f32.mrf.mxu0 }
0x1a42   :  { %v3601_v9 = vpop.f32.mrf.mxu0 }
0x1a44   :  { %v3603_v10 = vpop.f32.mrf.mxu0 }
0x1a46   :  { %v3605_v18 = vpop.f32.mrf.mxu0 }
0x1ab7   :  { %v1685_v28 = vpop.f32.mrf.mxu0 }
0x1ab8   :  { %v1692_v29 = vadd.f32 %v1685_v28, %v1320_v19 }
0x1ab9   :  { %v1687_v32 = vpop.f32.mrf.mxu0 }
0x1aba   :  { %v1693_v36 = vadd.f32 %v1687_v32, %v1321_v33  ;;  %v1694_v42 = vpack.c.bf16 %v1692_v29, %v1692_v29 }
0x1abb   :  { %v1689_v39 = vpop.f32.mrf.mxu0 }
0x1abc   :  { %v1695_v40 = vpack.c.bf16 %v1693_v36, %v1693_v36  ;;  %v2431_v43 = vmul.bf16 3216621497, %v1694_v42 }
0x1abd   :  { %v1690_v41 = vpop.f32.mrf.mxu0 }
0x1abe   :  { %2781 = vtanh.bf16 %v1695_v40  ;;  %v2432_v8 = vmul.bf16 3216621497, %v1695_v40 }
0x1abf   :  { %2783 = vpow.bf16 %v2431_v43 }
0x1acc   :  { %v2782_v17 = vpop.eup %2781 }
0x1acd   :  { %1714 = vrot.lane.b32.xlu0 %v2782_v17, %s2983_s1  ;;  %v2784_v45 = vpop.eup %2783 }
0x1ace   :  { %v1704_v46 = vadd.bf16 1065369472, %v2784_v45 }
0x1ad0   :  { %2785 = vrcp.bf16 %v1704_v46 }
0x1ade   :  { %v2786_v44 = vpop.eup %2785 }
0x1adf   :  { %v1707_v47 = vmul.bf16 1065369472, %v2786_v44 }
0x1ae1   :  { %v1711_v57 = vunpack.c.l.bf16 %v1707_v47 }
0x1ae3   :  { %v1712_v58 = vmul.f32 %v1711_v57, %v3571_v54  ;;  %v1322_v54 = vadd.f32 %v3498_v34, %v1283_v25 }
0x1b3f   :  { %v1715_v53 = vpop.permute.xlu0 %1714 }
0x1b40   :  { %v1717_v51 = vmul.bf16 %v1715_v53, %v1707_v47  ;;  %v1324_v53 = vadd.f32 %v3498_v34, %v3595_v26 }
0x1b42   :  { %v1718_v14 = vunpack.c.l.bf16 %v1717_v51 }
0x1b44   :  { %1720 = vrot.lane.b32.xlu1 %v1718_v14, %s2983_s1 }
0x1bb6   :  { %v1721_v59 = vpop.permute.xlu1 %1720 }
0x1bb7   :  { %v1723_v60 = vadd.f32 %v1721_v59, %v1712_v58 }
0x1bb9   :  { %v1724_v62 = vpack.c.bf16 %v1723_v60, %v1723_v60 }
0x1bbb   :  { %2787 = vtanh.bf16 %v1724_v62 }
0x1bbc   :  { %2789 = vpow.bf16 %v2432_v8 }
0x1bc9   :  { %v2788_v48 = vpop.eup %2787 }
0x1bca   :  { %1727 = vrot.lane.b32.xlu0 %v2788_v48, %s2983_s1  ;;  %v2790_v61 = vpop.eup %2789 }
0x1bcb   :  { %v1705_v11 = vadd.bf16 1065369472, %v2790_v61 }
0x1bcd   :  { %2791 = vrcp.bf16 %v1705_v11 }
0x1bdb   :  { %v2792_v12 = vpop.eup %2791 }
0x1bdc   :  { %v1709_v56 = vmul.bf16 1065369472, %v2792_v12 }
0x1c3c   :  { %v1728_v2 = vpop.permute.xlu0 %1727 }
0x1c3d   :  { %v1730_v30 = vmul.bf16 %v1728_v2, %v1709_v56 }
0x1c3f   :  { %2433 = vmatmul.mubr.msk.bf16.vlgmr.msra.gmra.mxu1 %vm371_vm0, %v1730_v30 }
0x1c40   :  { %1915 = vmatpush1.bf16.msra.mxu1 %v3401_v35  ;;  %1938 = vmatprep.mubr.bf16.mxu1 %v2981_v0 }
0x1c41   :  { %1916 = vmatprep.subr.bf16.mxu1 %v3407_v37 }
0x1c44   :  { %1917 = vmatpush1.bf16.msra.mxu1 %v3410_v38 }
0x1c45   :  { %1918 = vmatprep.subr.bf16.mxu1 %v3433_v55 }
0x1c48   :  { %1919 = vmatpush1.bf16.msra.mxu1 %v3438_v1 }
0x1c49   :  { %1920 = vmatprep.subr.bf16.mxu1 %v3448_v49 }
0x1c4c   :  { %1921 = vmatpush1.bf16.msra.mxu1 %v3450_v63 }
0x1cff   :  { %v1770_v13 = vpop.f32.mrf.mxu1 }
0x1d00   :  { %v1777_v16 = vadd.f32 %v1770_v13, %v1322_v54 }
0x1d01   :  { %v1772_v3 = vpop.f32.mrf.mxu1 }
0x1d02   :  { %v1778_v22 = vadd.f32 %v1772_v3, %v1323_v15  ;;  %v1779_v31 = vpack.c.bf16 %v1777_v16, %v1777_v16 }
0x1d03   :  { %v1774_v4 = vpop.f32.mrf.mxu1 }
0x1d04   :  { %v1780_v24 = vpack.c.bf16 %v1778_v22, %v1778_v22  ;;  %v2434_v20 = vmul.bf16 3216621497, %v1779_v31  ;;  %v1326_v4 = vadd.f32 %v3498_v34, %v3599_v7 }
0x1d05   :  { %v1775_v52 = vpop.f32.mrf.mxu1 }
0x1d06   :  { %2793 = vtanh.bf16 %v1780_v24  ;;  %v2435_v17 = vmul.bf16 3216621497, %v1780_v24  ;;  %v1327_v52 = vadd.f32 %v3493_v27, %v3601_v9 }
0x1d07   :  { %2795 = vpow.bf16 %v2434_v20 }
0x1d14   :  { %v2794_v23 = vpop.eup %2793 }
0x1d15   :  { %1799 = vrot.lane.b32.xlu1 %v2794_v23, %s2983_s1  ;;  %v2796_v21 = vpop.eup %2795 }
0x1d16   :  { %v1789_v5 = vadd.bf16 1065369472, %v2796_v21 }
0x1d18   :  { %2797 = vrcp.bf16 %v1789_v5 }
0x1d26   :  { %v2798_v25 = vpop.eup %2797 }
0x1d27   :  { %v1792_v19 = vmul.bf16 1065369472, %v2798_v25 }
0x1d29   :  { %v1796_v29 = vunpack.c.l.bf16 %v1792_v19 }
0x1d2b   :  { %v1797_v32 = vmul.f32 %v1796_v29, %v1723_v60 }
0x1d87   :  { %v1800_v28 = vpop.permute.xlu1 %1799 }
0x1d88   :  { %v1802_v6 = vmul.bf16 %v1800_v28, %v1792_v19 }
0x1d8a   :  { %v1803_v33 = vunpack.c.l.bf16 %v1802_v6 }
0x1d8c   :  { %1805 = vrot.lane.b32.xlu0 %v1803_v33, %s2983_s1 }
0x1dfe   :  { %v1806_v36 = vpop.permute.xlu0 %1805 }
0x1dff   :  { %v1808_v39 = vadd.f32 %v1806_v36, %v1797_v32 }
0x1e01   :  { %v1809_v40 = vpack.c.bf16 %v1808_v39, %v1808_v39 }
0x1e03   :  { %2799 = vtanh.bf16 %v1809_v40 }
0x1e04   :  { %2801 = vpow.bf16 %v2435_v17 }
0x1e11   :  { %v2800_v41 = vpop.eup %2799 }
0x1e12   :  { %1812 = vrot.lane.b32.xlu1 %v2800_v41, %s2983_s1  ;;  %v2802_v42 = vpop.eup %2801 }
0x1e13   :  { %v1790_v43 = vadd.bf16 1065369472, %v2802_v42 }
0x1e15   :  { %2803 = vrcp.bf16 %v1790_v43 }
0x1e23   :  { %v2804_v45 = vpop.eup %2803 }
0x1e24   :  { %v1794_v46 = vmul.bf16 1065369472, %v2804_v45 }
0x1e84   :  { %v1813_v44 = vpop.permute.xlu1 %1812 }
0x1e85   :  { %v1815_v47 = vmul.bf16 %v1813_v44, %v1794_v46 }
0x1e87   :  { %2436 = vmatmul.mubr.msk.bf16.vlgmr.msra.gmra.mxu0 %vm371_vm0, %v1815_v47 }
0x1e88   :  { %2000 = vmatpush1.bf16.msra.mxu0 %v3401_v35  ;;  %2023 = vmatprep.mubr.bf16.mxu0 %v2981_v0  ;;  %v1325_v35 = vadd.f32 %v3493_v27, %v3597_v50 }
0x1e89   :  { %2001 = vmatprep.subr.bf16.mxu0 %v3407_v37 }
0x1e8c   :  { %2002 = vmatpush1.bf16.msra.mxu0 %v3410_v38 }
0x1e8d   :  { %2003 = vmatprep.subr.bf16.mxu0 %v3433_v55 }
0x1e90   :  { %2004 = vmatpush1.bf16.msra.mxu0 %v3438_v1 }
0x1e91   :  { %2005 = vmatprep.subr.bf16.mxu0 %v3448_v49 }
0x1e94   :  { %2006 = vmatpush1.bf16.msra.mxu0 %v3450_v63 }
0x1f47   :  { %v1855_v51 = vpop.f32.mrf.mxu0 }
0x1f48   :  { %v1862_v0 = vadd.f32 %v1855_v51, %v1324_v53 }
0x1f49   :  { %v1857_v14 = vpop.f32.mrf.mxu0 }
0x1f4a   :  { %v1863_v37 = vadd.f32 %v1857_v14, %v1325_v35  ;;  %v1864_v1 = vpack.c.bf16 %v1862_v0, %v1862_v0  ;;  %v1328_v14 = vadd.f32 %v3498_v34, %v3603_v10 }
0x1f4b   :  { %v1859_v57 = vpop.f32.mrf.mxu0 }
0x1f4c   :  { %v1865_v38 = vpack.c.bf16 %v1863_v37, %v1863_v37  ;;  %v2437_v49 = vmul.bf16 3216621497, %v1864_v1  ;;  %v1329_v57 = vadd.f32 %v3493_v27, %v3605_v18 }
0x1f4d   :  { %v1860_v58 = vpop.f32.mrf.mxu0 }
0x1f4e   :  { %2805 = vtanh.bf16 %v1865_v38  ;;  %v2438_v30 = vmul.bf16 3216621497, %v1865_v38 }
0x1f4f   :  { %2807 = vpow.bf16 %v2437_v49 }
0x1f5c   :  { %v2806_v55 = vpop.eup %2805 }
0x1f5d   :  { %1884 = vrot.lane.b32.xlu0 %v2806_v55, %s2983_s1  ;;  %v2808_v63 = vpop.eup %2807 }
0x1f5e   :  { %v1874_v59 = vadd.bf16 1065369472, %v2808_v63 }
0x1f60   :  { %2809 = vrcp.bf16 %v1874_v59 }
0x1f6e   :  { %v2810_v26 = vpop.eup %2809 }
0x1f6f   :  { %v1877_v60 = vmul.bf16 1065369472, %v2810_v26 }
0x1f71   :  { %v1881_v8 = vunpack.c.l.bf16 %v1877_v60 }
0x1f73   :  { %v1882_v61 = vmul.f32 %v1881_v8, %v1808_v39  ;;  %v2079_v8 = vld [vmem:[#allocation11 + $0x38] sm:$0xff] }
0x1fcf   :  { %v1885_v62 = vpop.permute.xlu0 %1884 }
0x1fd0   :  { %v1887_v50 = vmul.bf16 %v1885_v62, %v1877_v60 }
0x1fd2   :  { %v1888_v48 = vunpack.c.l.bf16 %v1887_v50 }
0x1fd4   :  { %1890 = vrot.lane.b32.xlu1 %v1888_v48, %s2983_s1 }
0x2046   :  { %v1891_v11 = vpop.permute.xlu1 %1890 }
0x2047   :  { %v1893_v12 = vadd.f32 %v1891_v11, %v1882_v61  ;;  %v2984_v61 = vmov 0.0   ;;  %v2078_v11 = vld [vmem:[#allocation11 + $0x30] sm:$0xff] }
0x2048   :  { %2487 = vmatprep.subr.mxu1 %v2984_v61  ;;  %2506 = vmatprep.subr.mxu0 %v2984_v61 }
0x2049   :  { %v1894_v56 = vpack.c.bf16 %v1893_v12, %v1893_v12 }
0x204b   :  { %2811 = vtanh.bf16 %v1894_v56  ;;  %v2076_v56 = vld [vmem:[#allocation11 + $0x20] sm:$0xff] }
0x204c   :  { %2813 = vpow.bf16 %v2438_v30  ;;  %v2074_v30 = vld [vmem:[#allocation11 + $0x10] sm:$0xff] }
0x2059   :  { %v2812_v2 = vpop.eup %2811 }
0x205a   :  { %1897 = vrot.lane.b32.xlu0 %v2812_v2, %s2983_s1  ;;  %v2814_v54 = vpop.eup %2813  ;;  %v2075_v2 = vld [vmem:[#allocation11 + $0x18] sm:$0xff] }
0x205b   :  { %v1875_v13 = vadd.bf16 1065369472, %v2814_v54 }
0x205d   :  { %2815 = vrcp.bf16 %v1875_v13 }
0x206b   :  { %v2816_v15 = vpop.eup %2815 }
0x206c   :  { %v1879_v16 = vmul.bf16 1065369472, %v2816_v15 }
0x20cc   :  { %v1898_v3 = vpop.permute.xlu0 %1897 }
0x20cd   :  { %v1900_v22 = vmul.bf16 %v1898_v3, %v1879_v16 }
0x20cf   :  { %2439 = vmatmul.mubr.msk.bf16.vlgmr.msra.gmra.mxu1 %vm371_vm0, %v1900_v22  ;;  %v2073_v22 = vld [vmem:[#allocation11 + $0x8] sm:$0xff] }
0x20d0   :  { %2488 = vmatpush3.msra.mxu1 %v2079_v8  ;;  %2503 = vmatprep.mubr.msk.f32.mxu1 %vm2985_vm2, %v2984_v61 }
0x20d1   :  { %2489 = vmatprep.subr.mxu1 %v2984_v61 }
0x20d2   :  { %2490 = vmatpush3.msra.mxu1 %v2078_v11 }
0x20d3   :  { %2491 = vmatprep.subr.mxu1 %v2984_v61 }
0x218f   :  { %v1940_v24 = vpop.f32.mrf.mxu1 }
0x2190   :  { %v1947_v23 = vadd.f32 %v1940_v24, %v1326_v4  ;;  %v2072_v4 = vld [vmem:[#allocation11] sm:$0xff]  ;;  %v2170_v24 = vld [vmem:[#allocation12 + $0x48] sm:$0xff] }
0x2191   :  { %v1942_v31 = vpop.f32.mrf.mxu1 }
0x2192   :  { %v1948_v20 = vadd.f32 %v1942_v31, %v1327_v52  ;;  %v1949_v28 = vpack.c.bf16 %v1947_v23, %v1947_v23  ;;  %v2169_v52 = vld [vmem:[#allocation12 + $0x40] sm:$0xff]  ;;  %v2168_v23 = vld [vmem:[#allocation12 + $0x38] sm:$0xff]  ;;  %v2167_v31 = vld [vmem:[#allocation12 + $0x30] sm:$0xff] }
0x2193   :  { %v1944_v21 = vpop.f32.mrf.mxu1 }
0x2194   :  { %v1950_v5 = vpack.c.bf16 %v1948_v20, %v1948_v20  ;;  %v2440_v6 = vmul.bf16 3216621497, %v1949_v28  ;;  %v2166_v20 = vld [vmem:[#allocation12 + $0x28] sm:$0xff] }
0x2195   :  { %v1945_v25 = vpop.f32.mrf.mxu1 }
0x2196   :  { %2817 = vtanh.bf16 %v1950_v5  ;;  %v2441_v46 = vmul.bf16 3216621497, %v1950_v5  ;;  %v2165_v5 = vld [vmem:[#allocation12 + $0x20] sm:$0xff]  ;;  %v2164_v25 = vld [vmem:[#allocation12 + $0x18] sm:$0xff] }
0x2197   :  { %2819 = vpow.bf16 %v2440_v6 }
0x21a4   :  { %v2818_v19 = vpop.eup %2817 }
0x21a5   :  { %1969 = vrot.lane.b32.xlu1 %v2818_v19, %s2983_s1  ;;  %v2820_v33 = vpop.eup %2819 }
0x21a6   :  { %v1959_v29 = vadd.bf16 1065369472, %v2820_v33 }
0x21a8   :  { %2821 = vrcp.bf16 %v1959_v29 }
0x21b6   :  { %v2822_v7 = vpop.eup %2821 }
0x21b7   :  { %v1962_v32 = vmul.bf16 1065369472, %v2822_v7 }
0x21b9   :  { %v1966_v40 = vunpack.c.l.bf16 %v1962_v32 }
0x21bb   :  { %v1967_v41 = vmul.f32 %v1966_v40, %v1893_v12  ;;  %v2077_v12 = vld [vmem:[#allocation11 + $0x28] sm:$0xff]  ;;  %v2161_v40 = vld [vmem:[#allocation12] sm:$0xff] }
0x21bc   :  { %2492 = vmatpush3.msra.mxu1 %v2077_v12 }
0x21bd   :  { %2493 = vmatprep.subr.mxu1 %v2984_v61 }
0x21be   :  { %2494 = vmatpush3.msra.mxu1 %v2076_v56 }
0x21bf   :  { %2495 = vmatprep.subr.mxu1 %v2984_v61 }
0x21c0   :  { %2496 = vmatpush3.msra.mxu1 %v2075_v2 }
0x21c1   :  { %2497 = vmatprep.subr.mxu1 %v2984_v61 }
0x21c2   :  { %2498 = vmatpush3.msra.mxu1 %v2074_v30 }
0x21c3   :  { %2499 = vmatprep.subr.mxu1 %v2984_v61 }
0x21c4   :  { %2500 = vmatpush3.msra.mxu1 %v2073_v22 }
0x21c5   :  { %2501 = vmatprep.subr.mxu1 %v2984_v61 }
0x21c6   :  { %2502 = vmatpush3.msra.mxu1 %v2072_v4 }
0x21c7   :  { %2529 = vmatprep.subr.mxu1 %v2984_v61 }
0x2217   :  { %v1970_v36 = vpop.permute.xlu1 %1969 }
0x2218   :  { %v1972_v9 = vmul.bf16 %v1970_v36, %v1962_v32 }
0x221a   :  { %v1973_v39 = vunpack.c.l.bf16 %v1972_v9  ;;  %v2163_v9 = vld [vmem:[#allocation12 + $0x10] sm:$0xff] }
0x221c   :  { %1975 = vrot.lane.b32.xlu0 %v1973_v39, %s2983_s1  ;;  %v2162_v39 = vld [vmem:[#allocation12 + $0x8] sm:$0xff] }
0x228e   :  { %v1976_v17 = vpop.permute.xlu0 %1975 }
0x228f   :  { %v1978_v42 = vadd.f32 %v1976_v17, %v1967_v41  ;;  %v2265_v41 = vld [vmem:[%s3764_s12 + $0x60] sm:$0xf]  ;;  %v2264_v17 = vld [vmem:[%s3764_s12 + $0x58] sm:$0xff] }
0x2291   :  { %v1979_v43 = vpack.c.bf16 %v1978_v42, %v1978_v42 }
0x2293   :  { %2823 = vtanh.bf16 %v1979_v43  ;;  %v2262_v43 = vld [vmem:[%s3764_s12 + $0x48] sm:$0xff] }
0x2294   :  { %2825 = vpow.bf16 %v2441_v46  ;;  %v2260_v46 = vld [vmem:[%s3764_s12 + $0x38] sm:$0xff] }
0x22a1   :  { %v2824_v45 = vpop.eup %2823 }
0x22a2   :  { %1982 = vrot.lane.b32.xlu1 %v2824_v45, %s2983_s1  ;;  %v2826_v44 = vpop.eup %2825  ;;  %v2261_v45 = vld [vmem:[%s3764_s12 + $0x40] sm:$0xff] }
0x22a3   :  { %v1960_v47 = vadd.bf16 1065369472, %v2826_v44  ;;  %v2259_v44 = vld [vmem:[%s3764_s12 + $0x30] sm:$0xff] }
0x22a5   :  { %2827 = vrcp.bf16 %v1960_v47  ;;  %v2258_v47 = vld [vmem:[%s3764_s12 + $0x28] sm:$0xff] }
0x22b3   :  { %v2828_v53 = vpop.eup %2827 }
0x22b4   :  { %v1964_v51 = vmul.bf16 1065369472, %v2828_v53  ;;  %v2257_v53 = vld [vmem:[%s3764_s12 + $0x20] sm:$0xff] }
0x2314   :  { %v1983_v35 = vpop.permute.xlu1 %1982 }
0x2315   :  { %v1985_v0 = vmul.bf16 %v1983_v35, %v1964_v51  ;;  %v2256_v51 = vld [vmem:[%s3764_s12 + $0x18] sm:$0xff]  ;;  %v2445_v35 = vld [vmem:[%s3761_s9] ss:$0 sm:$0xff] }
0x2317   :  { %2442 = vmatmul.mubr.msk.bf16.vlgmr.msra.gmra.mxu0 %vm371_vm0, %v1985_v0 }
0x2318   :  { %2526 = vmatprep.mubr.msk.f32.mxu0 %vm2985_vm2, %v2984_v61  ;;  %2507 = vmatpush3.msra.mxu0 %v2170_v24 }
0x2319   :  { %2508 = vmatprep.subr.mxu0 %v2984_v61 }
0x231a   :  { %2509 = vmatpush3.msra.mxu0 %v2169_v52 }
0x231b   :  { %2510 = vmatprep.subr.mxu0 %v2984_v61 }
0x231c   :  { %2511 = vmatpush3.msra.mxu0 %v2168_v23 }
0x231d   :  { %2512 = vmatprep.subr.mxu0 %v2984_v61 }
0x231e   :  { %2513 = vmatpush3.msra.mxu0 %v2167_v31 }
0x231f   :  { %2514 = vmatprep.subr.mxu0 %v2984_v61 }
0x2320   :  { %2515 = vmatpush3.msra.mxu0 %v2166_v20 }
0x2321   :  { %2516 = vmatprep.subr.mxu0 %v2984_v61 }
0x2322   :  { %2517 = vmatpush3.msra.mxu0 %v2165_v5 }
0x2323   :  { %2518 = vmatprep.subr.mxu0 %v2984_v61 }
0x2324   :  { %2519 = vmatpush3.msra.mxu0 %v2164_v25 }
0x2325   :  { %2520 = vmatprep.subr.mxu0 %v2984_v61 }
0x2326   :  { %2521 = vmatpush3.msra.mxu0 %v2163_v9 }
0x2327   :  { %2522 = vmatprep.subr.mxu0 %v2984_v61 }
0x2328   :  { %2523 = vmatpush3.msra.mxu0 %v2162_v39 }
0x2329   :  { %2524 = vmatprep.subr.mxu0 %v2984_v61 }
0x232a   :  { %2525 = vmatpush3.msra.mxu0 %v2161_v40 }
0x23d7   :  { %v2025_v37 = vpop.f32.mrf.mxu0 }
0x23d8   :  { %v2032_v38 = vadd.f32 %v2025_v37, %v1328_v14 }
0x23d9   :  { %v2027_v58 = vpop.f32.mrf.mxu0 }
0x23da   :  { %v2033_v55 = vadd.f32 %v2027_v58, %v1329_v57  ;;  %v2034_v26 = vpack.c.bf16 %v2032_v38, %v2032_v38  ;;  %v2255_v38 = vld [vmem:[%s3764_s12 + $0x10] sm:$0xff]  ;;  %v2254_v58 = vld [vmem:[%s3764_s12 + $0x8] sm:$0xff] }
0x23db   :  { %v2029_v1 = vpop.f32.mrf.mxu0 }
0x23dc   :  { %v3656_v49 = vpack.c.bf16 %v2033_v55, %v2033_v55  ;;  %v2443_v60 = vmul.bf16 3216621497, %v2034_v26  ;;  %v2253_v55 = vld [vmem:[%s3764_s12] sm:$0xff] }
0x23dd   :  { %v2030_v63 = vpop.f32.mrf.mxu0  ;;  %v2447_v1 = vld [vmem:[%s3763_s11] ss:$0 sm:$0xff] }
0x23de   :  { %2829 = vtanh.bf16 %v3656_v49  ;;  %v2444_v19 = vmul.bf16 3216621497, %v3656_v49 }
0x23df   :  { %2831 = vpow.bf16 %v2443_v60  ;;  %v2449_v60 = vld [vmem:[%s3765_s13] ss:$0 sm:$0xff] }
0x23ec   :  { %v2830_v59 = vpop.eup %2829 }
0x23ed   :  { %2054 = vrot.lane.b32.xlu0 %v2830_v59, %s2983_s1  ;;  %v2832_v34 = vpop.eup %2831 }
0x23ee   :  { %v2044_v10 = vadd.bf16 1065369472, %v2832_v34 }
0x23f0   :  { %2833 = vrcp.bf16 %v2044_v10 }
0x23fe   :  { %v2834_v62 = vpop.eup %2833 }
0x23ff   :  { %v2047_v27 = vmul.bf16 1065369472, %v2834_v62 }
0x2401   :  { %v2051_v54 = vunpack.c.l.bf16 %v2047_v27 }
0x2403   :  { %v2052_v13 = vmul.f32 %v2051_v54, %v1978_v42  ;;  %v2263_v42 = vld [vmem:[%s3764_s12 + $0x50] sm:$0xff] }
0x245f   :  { %v2055_v18 = vpop.permute.xlu0 %2054 }
0x2460   :  { %v2057_v50 = vmul.bf16 %v2055_v18, %v2047_v27 }
0x2462   :  { %v2058_v48 = vunpack.c.l.bf16 %v2057_v50 }
0x2464   :  { %2060 = vrot.lane.b32.xlu1 %v2058_v48, %s2983_s1 }
0x24d6   :  { %v2061_v15 = vpop.permute.xlu1 %2060 }
0x24d7   :  { %v2063_v16 = vadd.f32 %v2061_v15, %v2052_v13 }
0x24d9   :  { %v2064_v3 = vpack.c.bf16 %v2063_v16, %v2063_v16 }
0x24db   :  { %2835 = vtanh.bf16 %v2064_v3 }
0x24dc   :  { %2837 = vpow.bf16 %v2444_v19 }
0x24e9   :  { %v2836_v21 = vpop.eup %2835 }
0x24ea   :  { %2067 = vrot.lane.b32.xlu0 %v2836_v21, %s2983_s1  ;;  %v2838_v28 = vpop.eup %2837 }
0x24eb   :  { %v2045_v6 = vadd.bf16 1065369472, %v2838_v28 }
0x24ed   :  { %2839 = vrcp.bf16 %v2045_v6 }
0x24fb   :  { %v2840_v33 = vpop.eup %2839 }
0x24fc   :  { %v2049_v29 = vmul.bf16 1065369472, %v2840_v33 }
0x255c   :  { %v2068_v7 = vpop.permute.xlu0 %2067 }
0x255d   :  { %v2070_v32 = vmul.bf16 %v2068_v7, %v2049_v29 }
0x255f   :  { %v2071_v36 = vunpack.c.l.bf16 %v2070_v32 }
0x2561   :  { %2504 = vmatmul.mubr.msk.f32.vlgmr.msra.gmra.mxu1 %vm371_vm0, %v2071_v36 }
0x2562   :  { %2555 = vmatprep.mubr.msk.f32.mxu1 %vm2985_vm2, %v2984_v61  ;;  %2530 = vmatpush3.msk.msra.mxu1 %vm2277_vm3, %v2265_v41 }
0x2563   :  { %2531 = vmatprep.subr.mxu1 %v2984_v61 }
0x2564   :  { %2532 = vmatpush3.msra.mxu1 %v2264_v17 }
0x2565   :  { %2533 = vmatprep.subr.mxu1 %v2984_v61 }
0x2566   :  { %2534 = vmatpush3.msra.mxu1 %v2263_v42 }
0x2567   :  { %2535 = vmatprep.subr.mxu1 %v2984_v61 }
0x2568   :  { %2536 = vmatpush3.msra.mxu1 %v2262_v43 }
0x2569   :  { %2537 = vmatprep.subr.mxu1 %v2984_v61 }
0x256a   :  { %2538 = vmatpush3.msra.mxu1 %v2261_v45 }
0x256b   :  { %2539 = vmatprep.subr.mxu1 %v2984_v61 }
0x256c   :  { %2540 = vmatpush3.msra.mxu1 %v2260_v46 }
0x256d   :  { %2541 = vmatprep.subr.mxu1 %v2984_v61 }
0x256e   :  { %2542 = vmatpush3.msra.mxu1 %v2259_v44 }
0x256f   :  { %2543 = vmatprep.subr.mxu1 %v2984_v61 }
0x2570   :  { %2544 = vmatpush3.msra.mxu1 %v2258_v47 }
0x2571   :  { %2545 = vmatprep.subr.mxu1 %v2984_v61 }
0x2572   :  { %2546 = vmatpush3.msra.mxu1 %v2257_v53 }
0x2573   :  { %2547 = vmatprep.subr.mxu1 %v2984_v61 }
0x2574   :  { %2548 = vmatpush3.msra.mxu1 %v2256_v51 }
0x2575   :  { %2549 = vmatprep.subr.mxu1 %v2984_v61 }
0x2576   :  { %2550 = vmatpush3.msra.mxu1 %v2255_v38 }
0x2577   :  { %2551 = vmatprep.subr.mxu1 %v2984_v61 }
0x2578   :  { %2552 = vmatpush3.msra.mxu1 %v2254_v58 }
0x2579   :  { %2553 = vmatprep.subr.mxu1 %v2984_v61 }
0x257a   :  { %2554 = vmatpush3.msra.mxu1 %v2253_v55 }
0x2621   :  { %v2156_v0 = vpop.f32.mrf.mxu1 }
0x2622   :  { %v2157_v14 = vadd.f32 %v2445_v35, %v2156_v0 }
0x2623   :  { %v2505_v37 = vpop.f32.mrf.mxu1 }
0x2624   :  { %v2160_v57 = vmax.f32 %v2157_v14, 0.0 }
0x2626   :  { %2527 = vmatmul.mubr.msk.f32.vlgmr.msra.gmra.mxu0 %vm2178_vm4, %v2160_v57 }
0x26e6   :  { %v2248_v49 = vpop.f32.mrf.mxu0 }
0x26e7   :  { %v2249_v63 = vadd.f32 %v2447_v1, %v2248_v49 }
0x26e8   :  { %v2528_v59 = vpop.f32.mrf.mxu0 }
0x26e9   :  { %v2252_v26 = vmax.f32 %v2249_v63, 0.0 }
0x26eb   :  { %2556 = vmatmul.mubr.msk.f32.vlgmr.msra.gmra.mxu1 %vm2273_vm5, %v2252_v26 }
0x27ab   :  { %v2347_v34 = vpop.f32.mrf.mxu1 }
0x27ac   :  { %v2348_v10 = vadd.f32 %v2449_v60, %v2347_v34 }
0x27ad   :  { %v2557_v62 = vpop.f32.mrf.mxu1 }
0x27ae   :  { %v2452_v27 = vmul.f32 -1.442695, %v2348_v10 }
0x27b0   :  { %2841 = vpow2.f32 %v2452_v27 }
0x27bd   :  { %v2842_v18 = vpop.eup %2841 }
0x27be   :  { %v2354_v50 = vadd.f32 1.0, %v2842_v18 }
0x27c0   :  { %2843 = vrcp.f32 %v2354_v50 }
0x27cd   :  { %v2844_v48 = vpop.eup %2843 }
0x27ce   :  { %2358 = vst.msk [vmem:[%s3766_s14] sm:$0xff] %vm2357_vm6, %v2844_v48 }
0x27cf   :  { %2363 = vsyncpa [#allocation5], 1 }
0x27d0   :  { %2364 = vsyncpa [#allocation7], 1 }
0x27d1   :  { %2365 = vsyncpa [#allocation10], 1 }
0x27d2   :  { %2366 = vsyncpa [#allocation13], 1 }

</bundles_post_ra>
